<compile_context>
chip_gen: v7x
topology: tpu7x:2x2x1
jax: 0.10.0
libtpu: 0.0.40
codegen_flags: <defaults>
</compile_context>

<pallas_src>
import jax
import jax.numpy as jnp
from jax import lax
from jax.experimental import pallas as pl
from jax.experimental.pallas import tpu as pltpu

KH = KW = 3  # Conv2d kernel size of the module


# -----------------------------------------------------------------------------
# Kernel: one batch tile, three lane-dense 2-D GEMMs (conv-as-GEMM, fc1, fc_q).
# -----------------------------------------------------------------------------
def _soft_q_kernel(x_ref, g_ref, bc_ref, w1_ref, b1_ref, wq_ref, bq_ref, q_ref):
    # x_ref : (K_in, BT)   f32   flattened obs tile (row = c*H*W + y*W + x), batch in lanes
    # g_ref : (F, K_in)    bf16  conv-as-GEMM weight (im2col folded into the weight)
    # bc_ref: (F, 1)       f32   conv bias, rows in torch flatten order (oc*P + p)
    # w1_ref: (128, F)     bf16  fc1 weight, torch layout (no permutation needed)
    # b1_ref: (128, 1)     f32
    # wq_ref: (A_pad, 128) bf16  fc_q weight, rows zero-padded to 8 sublanes
    # bq_ref: (A_pad, 1)   f32
    # q_ref : (A_pad, BT)  f32   q-values, lane-dense (actions x batch tile)
    xb = x_ref[...].astype(jnp.bfloat16)                 # bf16 only at the MXU operand

    # Conv2d(3x3, VALID) + Flatten as a single 2-D MXU matmul.
    act = jnp.dot(g_ref[...], xb, preferred_element_type=jnp.float32)       # (F, BT)
    act = jnp.maximum(act + bc_ref[...], 0.0)                                # ReLU(conv)

    h = jnp.dot(w1_ref[...], act.astype(jnp.bfloat16),
                preferred_element_type=jnp.float32)                          # (128, BT)
    h = jnp.maximum(h + b1_ref[...], 0.0)                                    # ReLU(fc1)

    q = jnp.dot(wq_ref[...], h.astype(jnp.bfloat16),
                preferred_element_type=jnp.float32)                          # (A_pad, BT)
    q_ref[...] = q + bq_ref[...]                                             # lane-dense store


# -----------------------------------------------------------------------------
# Wrapper: one-time weight transforms (data-independent), then a gridded call.
# -----------------------------------------------------------------------------
def soft_q_forward(x, params, *, batch_tile=256):
    """x: (N, C, H, W) float32, params in PyTorch layout."""
    wconv, bconv, w1, b1, wq, bq = params
    N, C, H, W = x.shape
    ho, wo = H - KH + 1, W - KW + 1
    p_pos = ho * wo
    n_oc = wconv.shape[0]                   # 16
    feat = n_oc * p_pos                     # 1024 for MinAtar 10x10
    n_hidden = w1.shape[0]                  # 128
    A = wq.shape[0]
    a_pad = 8                               # sublane-aligned action rows
    k_in = C * H * W                        # 400

    # Batch tile: 256 is safe on all generations (512 on v6e also fits VMEM
    # easily).  Keep >= 2 grid steps when the batch allows it so v7x's two
    # TensorCores both get work on the parallel axis.
    bt = batch_tile
    while bt > 128 and N <= bt:
        bt //= 2
    n_tiles = pl.cdiv(N, bt)
    n_pad = n_tiles * bt

    # ---- activations: flatten to (C*H*W, N), batch in the lane dim ----------
    # TODO(synk): for repeated inference, keep observations batch-last /
    # pre-flattened upstream so this transpose + pad doesn't run every call.
    xf = x.reshape(N, k_in).T.astype(jnp.float32)          # torch flatten order c*H*W + y*W + x
    xf = jnp.pad(xf, ((0, 0), (0, n_pad - N)))

    # ---- conv folded into a single GEMM weight -------------------------------
    # G[(oc,h,w), (c,y,x)] = wconv[oc, c, y-h, x-w]   (0 outside the 3x3 window)
    sh = (jnp.arange(H)[None, None, :]
          == jnp.arange(ho)[None, :, None] + jnp.arange(KH)[:, None, None]
          ).astype(jnp.float32)                            # (KH, Ho, H)
    sw = (jnp.arange(W)[None, None, :]
          == jnp.arange(wo)[None, :, None] + jnp.arange(KW)[:, None, None]
          ).astype(jnp.float32)                            # (KW, Wo, W)
    g = jnp.einsum('ocij,ihy,jwx->ohwcyx', wconv.astype(jnp.float32), sh, sw)
    g = g.reshape(feat, k_in).astype(jnp.bfloat16)         # rows = oc*P + p (torch Flatten order)

    bcv = jnp.repeat(bconv.astype(jnp.float32), p_pos).reshape(feat, 1)     # row = oc*P + p
    w1b = w1.astype(jnp.bfloat16)                                           # torch layout, untouched
    b1c = b1.reshape(n_hidden, 1).astype(jnp.float32)
    wqp = jnp.zeros((a_pad, n_hidden), jnp.float32).at[:A].set(wq).astype(jnp.bfloat16)
    bqp = jnp.zeros((a_pad, 1), jnp.float32).at[:A, 0].set(bq)

    q_t = pl.pallas_call(
        _soft_q_kernel,
        out_shape=jax.ShapeDtypeStruct((a_pad, n_pad), jnp.float32),
        grid=(n_tiles,),
        in_specs=[
            pl.BlockSpec((k_in, bt), lambda i: (0, i)),        # streamed per batch tile
            pl.BlockSpec((feat, k_in), lambda i: (0, 0)),      # VMEM-resident weights
            pl.BlockSpec((feat, 1), lambda i: (0, 0)),
            pl.BlockSpec((n_hidden, feat), lambda i: (0, 0)),
            pl.BlockSpec((n_hidden, 1), lambda i: (0, 0)),
            pl.BlockSpec((a_pad, n_hidden), lambda i: (0, 0)),
            pl.BlockSpec((a_pad, 1), lambda i: (0, 0)),
        ],
        out_specs=pl.BlockSpec((a_pad, bt), lambda i: (0, i)),
        compiler_params=pltpu.CompilerParams(
            dimension_semantics=("parallel",)),
    )(xf, g, bcv, w1b, b1c, wqp, bqp)

    # Strip action padding and batch padding; return PyTorch layout (N, A).
    return q_t[:A, :N].T


# -----------------------------------------------------------------------------
# Pure-JAX f32 reference (semantics of the PyTorch module).
# -----------------------------------------------------------------------------
def reference_forward(x, params):
    wconv, bconv, w1, b1, wq, bq = params
    conv = lax.conv_general_dilated(
        x, wconv, window_strides=(1, 1), padding='VALID',
        dimension_numbers=('NCHW', 'OIHW', 'NCHW'))
    conv = conv + bconv.reshape(1, -1, 1, 1)
    flat = conv.reshape(x.shape[0], -1)                  # nn.Flatten (channel-major)
    h = jnp.maximum(flat, 0.0)                           # relu(conv(x))
    h = jnp.maximum(h @ w1.T + b1, 0.0)                  # relu(fc1)
    return h @ wq.T + bq                                 # fc_q


# -----------------------------------------------------------------------------
# Deterministic parameter init (kaiming_normal_ weights, zero bias).
# -----------------------------------------------------------------------------
def init_params(key, c_in, h, w, n_actions):
    ho, wo = h - 2, w - 2
    out_dim = 16 * ho * wo
    k = jax.random.split(key, 3)

    def kaiming(k_, shape, fan_in):
        return jax.random.normal(k_, shape, jnp.float32) * jnp.sqrt(2.0 / fan_in)

    wconv = kaiming(k[0], (16, c_in, 3, 3), c_in * 9)
    bconv = jnp.zeros((16,), jnp.float32)
    w1 = kaiming(k[1], (128, out_dim), out_dim)
    b1 = jnp.zeros((128,), jnp.float32)
    wq = kaiming(k[2], (n_actions, 128), 128)
    bq = jnp.zeros((n_actions,), jnp.float32)
    return (wconv, bconv, w1, b1, wq, bq)


if __name__ == "__main__":
    # MinAtar-like obs (4, 10, 10), 6 actions.  Batched states (replay batch /
    # vectorized envs): N=512 -> 2 grid steps of 256 (even tile count for v7x
    # dual-TC sharding of the parallel axis; no batch padding).
    N, C, H, W, A = 512, 4, 10, 10, 6
    key = jax.random.PRNGKey(0)
    kx, kp = jax.random.split(key)
    x = jax.random.normal(kx, (N, C, H, W), jnp.float32)
    params = init_params(kp, C, H, W, A)

    q_kernel = jax.block_until_ready(jax.jit(soft_q_forward)(x, params))
    q_ref = jax.block_until_ready(reference_forward(x, params))

    assert q_kernel.shape == (N, A)
    err = float(jnp.max(jnp.abs(q_kernel - q_ref)))
    # bf16 matmul operands with f32 accumulation -> loosened tolerance vs f32 ref.
    assert jnp.allclose(q_kernel, q_ref, atol=1e-1, rtol=1e-2), f"max abs err {err}"
    print("KERNEL_OK")
</pallas_src>

<mosaic_0001>
module attributes {stable_mosaic.version = 11 : i64} {
  func.func @_soft_q_kernel(%arg0: i32, %arg1: memref<400x256xf32, #tpu.memory_space<vmem>>, %arg2: memref<1024x400xbf16, #tpu.memory_space<vmem>>, %arg3: memref<1024x1xf32, #tpu.memory_space<vmem>>, %arg4: memref<128x1024xbf16, #tpu.memory_space<vmem>>, %arg5: memref<128x1xf32, #tpu.memory_space<vmem>>, %arg6: memref<8x128xbf16, #tpu.memory_space<vmem>>, %arg7: memref<8x1xf32, #tpu.memory_space<vmem>>, %arg8: memref<8x256xf32, #tpu.memory_space<vmem>>) attributes {dimension_semantics = [#tpu.dimension_semantics<parallel>], iteration_bounds = array<i64: 2>, scalar_prefetch = 0 : i64, scratch_operands = 0 : i64, tpu.core_type = #tpu.core_type<tc>, window_params = [{transform_indices = @transform_0, window_bounds = array<i64: 400, 256>}, {pipeline_mode = #tpu.pipeline_mode<synchronous>, transform_indices = @transform_1, window_bounds = array<i64: 1024, 400>}, {pipeline_mode = #tpu.pipeline_mode<synchronous>, transform_indices = @transform_2, window_bounds = array<i64: 1024, 1>}, {pipeline_mode = #tpu.pipeline_mode<synchronous>, transform_indices = @transform_3, window_bounds = array<i64: 128, 1024>}, {pipeline_mode = #tpu.pipeline_mode<synchronous>, transform_indices = @transform_4, window_bounds = array<i64: 128, 1>}, {pipeline_mode = #tpu.pipeline_mode<synchronous>, transform_indices = @transform_5, window_bounds = array<i64: 8, 128>}, {pipeline_mode = #tpu.pipeline_mode<synchronous>, transform_indices = @transform_6, window_bounds = array<i64: 8, 1>}, {transform_indices = @transform_7, window_bounds = array<i64: 8, 256>}]} {
    %c0 = arith.constant 0 : index
    %c0_0 = arith.constant 0 : index
    %0 = vector.load %arg1[%c0, %c0_0] : memref<400x256xf32, #tpu.memory_space<vmem>>, vector<400x256xf32>
    %1 = arith.truncf %0 : vector<400x256xf32> to vector<400x256xbf16>
    %c0_1 = arith.constant 0 : index
    %c0_2 = arith.constant 0 : index
    %2 = vector.load %arg2[%c0_1, %c0_2] : memref<1024x400xbf16, #tpu.memory_space<vmem>>, vector<1024x400xbf16>
    %cst = arith.constant dense<0.000000e+00> : vector<1024x256xf32>
    %3 = tpu.matmul %2, %1, %cst {dimension_numbers = #tpu.dot_dimension_numbers<[1], [0], [0], [1], [0, 0, 1, 1], [], []>} : vector<1024x400xbf16>, vector<400x256xbf16>, vector<1024x256xf32> -> vector<1024x256xf32>
    %c0_3 = arith.constant 0 : index
    %c0_4 = arith.constant 0 : index
    %4 = vector.load %arg3[%c0_3, %c0_4] : memref<1024x1xf32, #tpu.memory_space<vmem>>, vector<1024x1xf32>
    %5 = vector.broadcast %4 : vector<1024x1xf32> to vector<1024x256xf32>
    %6 = arith.addf %3, %5 : vector<1024x256xf32>
    %cst_5 = arith.constant 0.000000e+00 : f32
    %7 = vector.broadcast %cst_5 : f32 to vector<1024x256xf32>
    %8 = arith.maximumf %6, %7 : vector<1024x256xf32>
    %c0_6 = arith.constant 0 : index
    %c0_7 = arith.constant 0 : index
    %9 = vector.load %arg4[%c0_6, %c0_7] : memref<128x1024xbf16, #tpu.memory_space<vmem>>, vector<128x1024xbf16>
    %10 = arith.truncf %8 : vector<1024x256xf32> to vector<1024x256xbf16>
    %cst_8 = arith.constant dense<0.000000e+00> : vector<128x256xf32>
    %11 = tpu.matmul %9, %10, %cst_8 {dimension_numbers = #tpu.dot_dimension_numbers<[1], [0], [0], [1], [0, 0, 1, 1], [], []>} : vector<128x1024xbf16>, vector<1024x256xbf16>, vector<128x256xf32> -> vector<128x256xf32>
    %c0_9 = arith.constant 0 : index
    %c0_10 = arith.constant 0 : index
    %12 = vector.load %arg5[%c0_9, %c0_10] : memref<128x1xf32, #tpu.memory_space<vmem>>, vector<128x1xf32>
    %13 = vector.broadcast %12 : vector<128x1xf32> to vector<128x256xf32>
    %14 = arith.addf %11, %13 : vector<128x256xf32>
    %cst_11 = arith.constant 0.000000e+00 : f32
    %15 = vector.broadcast %cst_11 : f32 to vector<128x256xf32>
    %16 = arith.maximumf %14, %15 : vector<128x256xf32>
    %c0_12 = arith.constant 0 : index
    %c0_13 = arith.constant 0 : index
    %17 = vector.load %arg6[%c0_12, %c0_13] : memref<8x128xbf16, #tpu.memory_space<vmem>>, vector<8x128xbf16>
    %18 = arith.truncf %16 : vector<128x256xf32> to vector<128x256xbf16>
    %cst_14 = arith.constant dense<0.000000e+00> : vector<8x256xf32>
    %19 = tpu.matmul %17, %18, %cst_14 {dimension_numbers = #tpu.dot_dimension_numbers<[1], [0], [0], [1], [0, 0, 1, 1], [], []>} : vector<8x128xbf16>, vector<128x256xbf16>, vector<8x256xf32> -> vector<8x256xf32>
    %c0_15 = arith.constant 0 : index
    %c0_16 = arith.constant 0 : index
    %20 = vector.load %arg7[%c0_15, %c0_16] : memref<8x1xf32, #tpu.memory_space<vmem>>, vector<8x1xf32>
    %21 = vector.broadcast %20 : vector<8x1xf32> to vector<8x256xf32>
    %22 = arith.addf %19, %21 : vector<8x256xf32>
    %c0_17 = arith.constant 0 : index
    %c0_18 = arith.constant 0 : index
    %23 = vector.load %arg8[%c0_17, %c0_18] : memref<8x256xf32, #tpu.memory_space<vmem>>, vector<8x256xf32>
    tpu.vector_store %arg8[%c0_17, %c0_18], %22 {strides = array<i32>} : memref<8x256xf32, #tpu.memory_space<vmem>>, vector<8x256xf32>,
    return
  }
  func.func @transform_0(%arg0: i32) -> (i32, i32) {
    %c0_i32 = arith.constant 0 : i32
    %c0_i32_0 = arith.constant 0 : i32
    return %c0_i32, %arg0 : i32, i32
  }
  func.func @transform_1(%arg0: i32) -> (i32, i32) {
    %c0_i32 = arith.constant 0 : i32
    %c0_i32_0 = arith.constant 0 : i32
    %c0_i32_1 = arith.constant 0 : i32
    return %c0_i32, %c0_i32_0 : i32, i32
  }
  func.func @transform_2(%arg0: i32) -> (i32, i32) {
    %c0_i32 = arith.constant 0 : i32
    %c0_i32_0 = arith.constant 0 : i32
    %c0_i32_1 = arith.constant 0 : i32
    return %c0_i32, %c0_i32_0 : i32, i32
  }
  func.func @transform_3(%arg0: i32) -> (i32, i32) {
    %c0_i32 = arith.constant 0 : i32
    %c0_i32_0 = arith.constant 0 : i32
    %c0_i32_1 = arith.constant 0 : i32
    return %c0_i32, %c0_i32_0 : i32, i32
  }
  func.func @transform_4(%arg0: i32) -> (i32, i32) {
    %c0_i32 = arith.constant 0 : i32
    %c0_i32_0 = arith.constant 0 : i32
    %c0_i32_1 = arith.constant 0 : i32
    return %c0_i32, %c0_i32_0 : i32, i32
  }
  func.func @transform_5(%arg0: i32) -> (i32, i32) {
    %c0_i32 = arith.constant 0 : i32
    %c0_i32_0 = arith.constant 0 : i32
    %c0_i32_1 = arith.constant 0 : i32
    return %c0_i32, %c0_i32_0 : i32, i32
  }
  func.func @transform_6(%arg0: i32) -> (i32, i32) {
    %c0_i32 = arith.constant 0 : i32
    %c0_i32_0 = arith.constant 0 : i32
    %c0_i32_1 = arith.constant 0 : i32
    return %c0_i32, %c0_i32_0 : i32, i32
  }
  func.func @transform_7(%arg0: i32) -> (i32, i32) {
    %c0_i32 = arith.constant 0 : i32
    %c0_i32_0 = arith.constant 0 : i32
    return %c0_i32, %arg0 : i32, i32
  }
}

</mosaic_0001>

<bundles_post_ra>
// kernel: soft_q_forward.1
= control target key start
LH: loop header
LB: loop body
LE: loop exit
PB: predicated region body
PF: predicated region fallthrough
CT: control target
= control target key end

     0   :  { %s7437_s24 = smov 0   ;;  %s7439_s25 = smov 0   ;;  %s10345_s0 = inlined_call_operand.vmem [shape: f32[400,512], index: 0, kind: input, shape index: {}]   ;;  %s10346_s1 = inlined_call_operand.vmem [shape: bf16[1024,400], index: 1, kind: input, shape index: {}]   ;;  %s10347_s2 = inlined_call_operand.vmem [shape: f32[1024,1], index: 2, kind: input, shape index: {}]   ;;  %s10348_s3 = inlined_call_operand.vmem [shape: bf16[128,1024], index: 3, kind: input, shape index: {}]   ;;  %s10349_s4 = inlined_call_operand.vmem [shape: f32[128,1], index: 4, kind: input, shape index: {}]   ;;  %s10350_s5 = inlined_call_operand.vmem [shape: bf16[8,128], index: 5, kind: input, shape index: {}]   ;;  %s10351_s6 = inlined_call_operand.vmem [shape: f32[8,1], index: 6, kind: input, shape index: {}]   ;;  %s10352_s7 = inlined_call_operand.vmem [shape: f32[8,512], index: 7, kind: output, shape index: {}]  }
   0x1   :  { %s7441_s26 = smov 0  }
   0x2 LB: > { %s5905_s27 = sadd.s32 4294967295, %s7394_s26   ;;  %s7454_s28 = sadd.s32 1, %s7394_s26   ;;  %s7394_s26 = sphi %s7441_s26, %s10671_s26   ;;  %s7390_s25 = sphi %s7439_s25, %s10670_s25   ;;  %s7386_s24 = sphi %s7437_s24, %s10669_s24  }
   0x3   : > { %s21_s29 = ssub.s32 %s7394_s26, %s7454_s28  ;;  %s24_s30 = sadd.s32 1, %s7390_s25 }
   0x4   : > { %p22_p0 = scmp.eq.s32.totalorder %s21_s29, 0  ;;  %p31_p1 = scmp.ne.s32.totalorder %s7390_s25, %s7386_s24 }
   0x5   : > { %p32_p2 = scmp.eq.s32.totalorder %s7394_s26, 0  ;;  %p5908_p4 = scmp.ge.s32.totalorder %s7394_s26, 2 }
   0x6   : > { %s7463_s8 = scalar_select %p22_p0, %s7390_s25, %s24_s30  }
   0x7   : > { %p33_p3 = por %p32_p2, %p31_p1  ;;  %227 = sbr.rel (%p5908_p4) target bundleno = 68 (0x44), region = 40 }
   0xe   : > { %230 = sbr.rel (!%p33_p3) target bundleno = 68 (0x44), region = 44  ;;  %s232_s9 = sand.u32 (%p33_p3), 1, %s7390_s25  }
   0xf   : > { %s6300_s10 = sshll.u32 (%p33_p3), %s7394_s26, 4  ;;  %s6959_s11 = smul.u32 (%p33_p3), 800, %s232_s9 }
  0x10   : > { %s7471_s14 = scalar_lea.vmem (%p33_p3), %s10345_s0, %s6300_s10 }
  0x11   : > { %v250_v0 = vld [vmem:[%s7471_s14] sm:$0xff] (%p33_p3)  ;;  %v252_v1 = vld [vmem:[%s7471_s14 + $0x8] sm:$0xff] (%p33_p3)  ;;  %s7479_s15 = scalar_lea.vmem (%p33_p3), [#allocation2], %s6959_s11 }
  0x12   : > { %v254_v2 = vld [vmem:[%s7471_s14 + $0x20] sm:$0xff] (%p33_p3)  ;;  %v256_v3 = vld [vmem:[%s7471_s14 + $0x28] sm:$0xff] (%p33_p3)  ;;  %251 = vst [vmem:[%s7479_s15] sm:$0xff] (%p33_p3), %v250_v0  ;;  %253 = vst [vmem:[%s7479_s15 + $0x8] sm:$0xff] (%p33_p3), %v252_v1 }
  0x13   : > { %v258_v4 = vld [vmem:[%s7471_s14 + $0x40] sm:$0xff] (%p33_p3)  ;;  %v260_v5 = vld [vmem:[%s7471_s14 + $0x48] sm:$0xff] (%p33_p3)  ;;  %255 = vst [vmem:[%s7479_s15 + $0x10] sm:$0xff] (%p33_p3), %v254_v2  ;;  %257 = vst [vmem:[%s7479_s15 + $0x18] sm:$0xff] (%p33_p3), %v256_v3 }
  0x14   : > { %259 = vst [vmem:[%s7479_s15 + $0x20] sm:$0xff] (%p33_p3), %v258_v4  ;;  %261 = vst [vmem:[%s7479_s15 + $0x28] sm:$0xff] (%p33_p3), %v260_v5  ;;  %v262_v6 = vld [vmem:[%s7471_s14 + $0x60] sm:$0xff] (%p33_p3)  ;;  %v264_v7 = vld [vmem:[%s7471_s14 + $0x68] sm:$0xff] (%p33_p3) }
  0x15   : > { %v266_v8 = vld [vmem:[%s7471_s14 + $0x80] sm:$0xff]  ;;  %263 = vst [vmem:[%s7479_s15 + $0x30] sm:$0xff] %v262_v6  ;;  %265 = vst [vmem:[%s7479_s15 + $0x38] sm:$0xff] %v264_v7  ;;  %v268_v9 = vld [vmem:[%s7471_s14 + $0x88] sm:$0xff] }
  0x16   : > { %267 = vst [vmem:[%s7479_s15 + $0x40] sm:$0xff] %v266_v8  ;;  %v270_v10 = vld [vmem:[%s7471_s14 + $0xa0] sm:$0xff]  ;;  %v272_v11 = vld [vmem:[%s7471_s14 + $0xa8] sm:$0xff]  ;;  %269 = vst [vmem:[%s7479_s15 + $0x48] sm:$0xff] %v268_v9 }
  0x17   : > { %271 = vst [vmem:[%s7479_s15 + $0x50] sm:$0xff] %v270_v10  ;;  %273 = vst [vmem:[%s7479_s15 + $0x58] sm:$0xff] %v272_v11  ;;  %v274_v12 = vld [vmem:[%s7471_s14 + $0xc0] sm:$0xff]  ;;  %v276_v13 = vld [vmem:[%s7471_s14 + $0xc8] sm:$0xff] }
  0x18   : > { %v278_v14 = vld [vmem:[%s7471_s14 + $0xe0] sm:$0xff]  ;;  %275 = vst [vmem:[%s7479_s15 + $0x60] sm:$0xff] %v274_v12  ;;  %277 = vst [vmem:[%s7479_s15 + $0x68] sm:$0xff] %v276_v13  ;;  %v280_v15 = vld [vmem:[%s7471_s14 + $0xe8] sm:$0xff] }
  0x19   : > { %279 = vst [vmem:[%s7479_s15 + $0x70] sm:$0xff] %v278_v14  ;;  %v282_v16 = vld [vmem:[%s7471_s14 + $0x100] sm:$0xff]  ;;  %v284_v17 = vld [vmem:[%s7471_s14 + $0x108] sm:$0xff]  ;;  %281 = vst [vmem:[%s7479_s15 + $0x78] sm:$0xff] %v280_v15 }
  0x1a   : > { %283 = vst [vmem:[%s7479_s15 + $0x80] sm:$0xff] %v282_v16  ;;  %285 = vst [vmem:[%s7479_s15 + $0x88] sm:$0xff] %v284_v17  ;;  %v286_v18 = vld [vmem:[%s7471_s14 + $0x120] sm:$0xff]  ;;  %v288_v19 = vld [vmem:[%s7471_s14 + $0x128] sm:$0xff] }
  0x1b   : > { %v290_v20 = vld [vmem:[%s7471_s14 + $0x140] sm:$0xff]  ;;  %287 = vst [vmem:[%s7479_s15 + $0x90] sm:$0xff] %v286_v18  ;;  %289 = vst [vmem:[%s7479_s15 + $0x98] sm:$0xff] %v288_v19  ;;  %v292_v21 = vld [vmem:[%s7471_s14 + $0x148] sm:$0xff] }
  0x1c   : > { %291 = vst [vmem:[%s7479_s15 + $0xa0] sm:$0xff] %v290_v20  ;;  %v294_v22 = vld [vmem:[%s7471_s14 + $0x160] sm:$0xff]  ;;  %v296_v23 = vld [vmem:[%s7471_s14 + $0x168] sm:$0xff]  ;;  %293 = vst [vmem:[%s7479_s15 + $0xa8] sm:$0xff] %v292_v21 }
  0x1d   : > { %295 = vst [vmem:[%s7479_s15 + $0xb0] sm:$0xff] %v294_v22  ;;  %297 = vst [vmem:[%s7479_s15 + $0xb8] sm:$0xff] %v296_v23  ;;  %v298_v24 = vld [vmem:[%s7471_s14 + $0x180] sm:$0xff]  ;;  %v300_v25 = vld [vmem:[%s7471_s14 + $0x188] sm:$0xff] }
  0x1e   : > { %v302_v26 = vld [vmem:[%s7471_s14 + $0x1a0] sm:$0xff]  ;;  %299 = vst [vmem:[%s7479_s15 + $0xc0] sm:$0xff] %v298_v24  ;;  %301 = vst [vmem:[%s7479_s15 + $0xc8] sm:$0xff] %v300_v25  ;;  %v304_v27 = vld [vmem:[%s7471_s14 + $0x1a8] sm:$0xff] }
  0x1f   : > { %303 = vst [vmem:[%s7479_s15 + $0xd0] sm:$0xff] %v302_v26  ;;  %v306_v28 = vld [vmem:[%s7471_s14 + $0x1c0] sm:$0xff]  ;;  %v308_v29 = vld [vmem:[%s7471_s14 + $0x1c8] sm:$0xff]  ;;  %305 = vst [vmem:[%s7479_s15 + $0xd8] sm:$0xff] %v304_v27 }
  0x20   : > { %307 = vst [vmem:[%s7479_s15 + $0xe0] sm:$0xff] %v306_v28  ;;  %309 = vst [vmem:[%s7479_s15 + $0xe8] sm:$0xff] %v308_v29  ;;  %v310_v30 = vld [vmem:[%s7471_s14 + $0x1e0] sm:$0xff]  ;;  %v312_v31 = vld [vmem:[%s7471_s14 + $0x1e8] sm:$0xff] }
  0x21   : > { %v314_v32 = vld [vmem:[%s7471_s14 + $0x200] sm:$0xff]  ;;  %311 = vst [vmem:[%s7479_s15 + $0xf0] sm:$0xff] %v310_v30  ;;  %313 = vst [vmem:[%s7479_s15 + $0xf8] sm:$0xff] %v312_v31  ;;  %v316_v33 = vld [vmem:[%s7471_s14 + $0x208] sm:$0xff] }
  0x22   : > { %315 = vst [vmem:[%s7479_s15 + $0x100] sm:$0xff] %v314_v32  ;;  %v318_v34 = vld [vmem:[%s7471_s14 + $0x220] sm:$0xff]  ;;  %v320_v35 = vld [vmem:[%s7471_s14 + $0x228] sm:$0xff]  ;;  %317 = vst [vmem:[%s7479_s15 + $0x108] sm:$0xff] %v316_v33 }
  0x23   : > { %319 = vst [vmem:[%s7479_s15 + $0x110] sm:$0xff] %v318_v34  ;;  %321 = vst [vmem:[%s7479_s15 + $0x118] sm:$0xff] %v320_v35  ;;  %v322_v36 = vld [vmem:[%s7471_s14 + $0x240] sm:$0xff]  ;;  %v324_v37 = vld [vmem:[%s7471_s14 + $0x248] sm:$0xff] }
  0x24   : > { %v326_v38 = vld [vmem:[%s7471_s14 + $0x260] sm:$0xff]  ;;  %323 = vst [vmem:[%s7479_s15 + $0x120] sm:$0xff] %v322_v36  ;;  %325 = vst [vmem:[%s7479_s15 + $0x128] sm:$0xff] %v324_v37  ;;  %v328_v39 = vld [vmem:[%s7471_s14 + $0x268] sm:$0xff] }
  0x25   : > { %327 = vst [vmem:[%s7479_s15 + $0x130] sm:$0xff] %v326_v38  ;;  %v330_v40 = vld [vmem:[%s7471_s14 + $0x280] sm:$0xff]  ;;  %v332_v41 = vld [vmem:[%s7471_s14 + $0x288] sm:$0xff]  ;;  %329 = vst [vmem:[%s7479_s15 + $0x138] sm:$0xff] %v328_v39 }
  0x26   : > { %331 = vst [vmem:[%s7479_s15 + $0x140] sm:$0xff] %v330_v40  ;;  %333 = vst [vmem:[%s7479_s15 + $0x148] sm:$0xff] %v332_v41  ;;  %v334_v42 = vld [vmem:[%s7471_s14 + $0x2a0] sm:$0xff]  ;;  %v336_v43 = vld [vmem:[%s7471_s14 + $0x2a8] sm:$0xff] }
  0x27   : > { %v338_v44 = vld [vmem:[%s7471_s14 + $0x2c0] sm:$0xff]  ;;  %335 = vst [vmem:[%s7479_s15 + $0x150] sm:$0xff] %v334_v42  ;;  %337 = vst [vmem:[%s7479_s15 + $0x158] sm:$0xff] %v336_v43  ;;  %v340_v45 = vld [vmem:[%s7471_s14 + $0x2c8] sm:$0xff] }
  0x28   : > { %339 = vst [vmem:[%s7479_s15 + $0x160] sm:$0xff] %v338_v44  ;;  %v342_v46 = vld [vmem:[%s7471_s14 + $0x2e0] sm:$0xff]  ;;  %v344_v47 = vld [vmem:[%s7471_s14 + $0x2e8] sm:$0xff]  ;;  %341 = vst [vmem:[%s7479_s15 + $0x168] sm:$0xff] %v340_v45 }
  0x29   : > { %343 = vst [vmem:[%s7479_s15 + $0x170] sm:$0xff] %v342_v46  ;;  %345 = vst [vmem:[%s7479_s15 + $0x178] sm:$0xff] %v344_v47  ;;  %v346_v48 = vld [vmem:[%s7471_s14 + $0x300] sm:$0xff]  ;;  %v348_v49 = vld [vmem:[%s7471_s14 + $0x308] sm:$0xff] }
  0x2a   : > { %v350_v50 = vld [vmem:[%s7471_s14 + $0x320] sm:$0xff]  ;;  %347 = vst [vmem:[%s7479_s15 + $0x180] sm:$0xff] %v346_v48  ;;  %349 = vst [vmem:[%s7479_s15 + $0x188] sm:$0xff] %v348_v49  ;;  %v352_v51 = vld [vmem:[%s7471_s14 + $0x328] sm:$0xff] }
  0x2b   : > { %351 = vst [vmem:[%s7479_s15 + $0x190] sm:$0xff] %v350_v50  ;;  %v354_v52 = vld [vmem:[%s7471_s14 + $0x340] sm:$0xff]  ;;  %v356_v53 = vld [vmem:[%s7471_s14 + $0x348] sm:$0xff]  ;;  %353 = vst [vmem:[%s7479_s15 + $0x198] sm:$0xff] %v352_v51 }
  0x2c   : > { %355 = vst [vmem:[%s7479_s15 + $0x1a0] sm:$0xff] %v354_v52  ;;  %357 = vst [vmem:[%s7479_s15 + $0x1a8] sm:$0xff] %v356_v53  ;;  %v358_v54 = vld [vmem:[%s7471_s14 + $0x360] sm:$0xff]  ;;  %v360_v55 = vld [vmem:[%s7471_s14 + $0x368] sm:$0xff] }
  0x2d   : > { %v362_v56 = vld [vmem:[%s7471_s14 + $0x380] sm:$0xff]  ;;  %359 = vst [vmem:[%s7479_s15 + $0x1b0] sm:$0xff] %v358_v54  ;;  %361 = vst [vmem:[%s7479_s15 + $0x1b8] sm:$0xff] %v360_v55  ;;  %v364_v57 = vld [vmem:[%s7471_s14 + $0x388] sm:$0xff] }
  0x2e   : > { %363 = vst [vmem:[%s7479_s15 + $0x1c0] sm:$0xff] %v362_v56  ;;  %v366_v58 = vld [vmem:[%s7471_s14 + $0x3a0] sm:$0xff]  ;;  %v368_v59 = vld [vmem:[%s7471_s14 + $0x3a8] sm:$0xff]  ;;  %365 = vst [vmem:[%s7479_s15 + $0x1c8] sm:$0xff] %v364_v57 }
  0x2f   : > { %367 = vst [vmem:[%s7479_s15 + $0x1d0] sm:$0xff] %v366_v58  ;;  %369 = vst [vmem:[%s7479_s15 + $0x1d8] sm:$0xff] %v368_v59  ;;  %v370_v60 = vld [vmem:[%s7471_s14 + $0x3c0] sm:$0xff]  ;;  %v372_v61 = vld [vmem:[%s7471_s14 + $0x3c8] sm:$0xff] }
  0x30   : > { %v374_v62 = vld [vmem:[%s7471_s14 + $0x3e0] sm:$0xff]  ;;  %371 = vst [vmem:[%s7479_s15 + $0x1e0] sm:$0xff] %v370_v60  ;;  %373 = vst [vmem:[%s7479_s15 + $0x1e8] sm:$0xff] %v372_v61  ;;  %v376_v63 = vld [vmem:[%s7471_s14 + $0x3e8] sm:$0xff] }
  0x31   : > { %375 = vst [vmem:[%s7479_s15 + $0x1f0] sm:$0xff] %v374_v62  ;;  %v378_v0 = vld [vmem:[%s7471_s14 + $0x400] sm:$0xff]  ;;  %v380_v1 = vld [vmem:[%s7471_s14 + $0x408] sm:$0xff]  ;;  %377 = vst [vmem:[%s7479_s15 + $0x1f8] sm:$0xff] %v376_v63 }
  0x32   : > { %379 = vst [vmem:[%s7479_s15 + $0x200] sm:$0xff] %v378_v0  ;;  %381 = vst [vmem:[%s7479_s15 + $0x208] sm:$0xff] %v380_v1  ;;  %v382_v2 = vld [vmem:[%s7471_s14 + $0x420] sm:$0xff]  ;;  %v384_v3 = vld [vmem:[%s7471_s14 + $0x428] sm:$0xff] }
  0x33   : > { %v386_v4 = vld [vmem:[%s7471_s14 + $0x440] sm:$0xff]  ;;  %383 = vst [vmem:[%s7479_s15 + $0x210] sm:$0xff] %v382_v2  ;;  %385 = vst [vmem:[%s7479_s15 + $0x218] sm:$0xff] %v384_v3  ;;  %v388_v5 = vld [vmem:[%s7471_s14 + $0x448] sm:$0xff] }
  0x34   : > { %387 = vst [vmem:[%s7479_s15 + $0x220] sm:$0xff] %v386_v4  ;;  %v390_v6 = vld [vmem:[%s7471_s14 + $0x460] sm:$0xff]  ;;  %v392_v7 = vld [vmem:[%s7471_s14 + $0x468] sm:$0xff]  ;;  %389 = vst [vmem:[%s7479_s15 + $0x228] sm:$0xff] %v388_v5 }
  0x35   : > { %391 = vst [vmem:[%s7479_s15 + $0x230] sm:$0xff] %v390_v6  ;;  %393 = vst [vmem:[%s7479_s15 + $0x238] sm:$0xff] %v392_v7  ;;  %v394_v8 = vld [vmem:[%s7471_s14 + $0x480] sm:$0xff]  ;;  %v396_v9 = vld [vmem:[%s7471_s14 + $0x488] sm:$0xff] }
  0x36   : > { %v398_v10 = vld [vmem:[%s7471_s14 + $0x4a0] sm:$0xff]  ;;  %395 = vst [vmem:[%s7479_s15 + $0x240] sm:$0xff] %v394_v8  ;;  %397 = vst [vmem:[%s7479_s15 + $0x248] sm:$0xff] %v396_v9  ;;  %v400_v11 = vld [vmem:[%s7471_s14 + $0x4a8] sm:$0xff] }
  0x37   : > { %399 = vst [vmem:[%s7479_s15 + $0x250] sm:$0xff] %v398_v10  ;;  %v402_v12 = vld [vmem:[%s7471_s14 + $0x4c0] sm:$0xff]  ;;  %v404_v13 = vld [vmem:[%s7471_s14 + $0x4c8] sm:$0xff]  ;;  %401 = vst [vmem:[%s7479_s15 + $0x258] sm:$0xff] %v400_v11 }
  0x38   : > { %403 = vst [vmem:[%s7479_s15 + $0x260] sm:$0xff] %v402_v12  ;;  %405 = vst [vmem:[%s7479_s15 + $0x268] sm:$0xff] %v404_v13  ;;  %v406_v14 = vld [vmem:[%s7471_s14 + $0x4e0] sm:$0xff]  ;;  %v408_v15 = vld [vmem:[%s7471_s14 + $0x4e8] sm:$0xff] }
  0x39   : > { %v410_v16 = vld [vmem:[%s7471_s14 + $0x500] sm:$0xff]  ;;  %407 = vst [vmem:[%s7479_s15 + $0x270] sm:$0xff] %v406_v14  ;;  %409 = vst [vmem:[%s7479_s15 + $0x278] sm:$0xff] %v408_v15  ;;  %v412_v17 = vld [vmem:[%s7471_s14 + $0x508] sm:$0xff] }
  0x3a   : > { %411 = vst [vmem:[%s7479_s15 + $0x280] sm:$0xff] %v410_v16  ;;  %v414_v18 = vld [vmem:[%s7471_s14 + $0x520] sm:$0xff]  ;;  %v416_v19 = vld [vmem:[%s7471_s14 + $0x528] sm:$0xff]  ;;  %413 = vst [vmem:[%s7479_s15 + $0x288] sm:$0xff] %v412_v17 }
  0x3b   : > { %415 = vst [vmem:[%s7479_s15 + $0x290] sm:$0xff] %v414_v18  ;;  %417 = vst [vmem:[%s7479_s15 + $0x298] sm:$0xff] %v416_v19  ;;  %v418_v20 = vld [vmem:[%s7471_s14 + $0x540] sm:$0xff]  ;;  %v420_v21 = vld [vmem:[%s7471_s14 + $0x548] sm:$0xff] }
  0x3c   : > { %v422_v22 = vld [vmem:[%s7471_s14 + $0x560] sm:$0xff]  ;;  %419 = vst [vmem:[%s7479_s15 + $0x2a0] sm:$0xff] %v418_v20  ;;  %421 = vst [vmem:[%s7479_s15 + $0x2a8] sm:$0xff] %v420_v21  ;;  %v424_v23 = vld [vmem:[%s7471_s14 + $0x568] sm:$0xff] }
  0x3d   : > { %423 = vst [vmem:[%s7479_s15 + $0x2b0] sm:$0xff] %v422_v22  ;;  %v426_v24 = vld [vmem:[%s7471_s14 + $0x580] sm:$0xff]  ;;  %v428_v25 = vld [vmem:[%s7471_s14 + $0x588] sm:$0xff]  ;;  %425 = vst [vmem:[%s7479_s15 + $0x2b8] sm:$0xff] %v424_v23 }
  0x3e   : > { %427 = vst [vmem:[%s7479_s15 + $0x2c0] sm:$0xff] %v426_v24  ;;  %429 = vst [vmem:[%s7479_s15 + $0x2c8] sm:$0xff] %v428_v25  ;;  %v430_v26 = vld [vmem:[%s7471_s14 + $0x5a0] sm:$0xff]  ;;  %v432_v27 = vld [vmem:[%s7471_s14 + $0x5a8] sm:$0xff] }
  0x3f   : > { %v434_v28 = vld [vmem:[%s7471_s14 + $0x5c0] sm:$0xff]  ;;  %431 = vst [vmem:[%s7479_s15 + $0x2d0] sm:$0xff] %v430_v26  ;;  %433 = vst [vmem:[%s7479_s15 + $0x2d8] sm:$0xff] %v432_v27  ;;  %v436_v29 = vld [vmem:[%s7471_s14 + $0x5c8] sm:$0xff] }
  0x40   : > { %435 = vst [vmem:[%s7479_s15 + $0x2e0] sm:$0xff] %v434_v28  ;;  %v438_v30 = vld [vmem:[%s7471_s14 + $0x5e0] sm:$0xff]  ;;  %v440_v31 = vld [vmem:[%s7471_s14 + $0x5e8] sm:$0xff]  ;;  %437 = vst [vmem:[%s7479_s15 + $0x2e8] sm:$0xff] %v436_v29 }
  0x41   : > { %439 = vst [vmem:[%s7479_s15 + $0x2f0] sm:$0xff] %v438_v30  ;;  %441 = vst [vmem:[%s7479_s15 + $0x2f8] sm:$0xff] %v440_v31  ;;  %v442_v32 = vld [vmem:[%s7471_s14 + $0x600] sm:$0xff]  ;;  %v444_v33 = vld [vmem:[%s7471_s14 + $0x608] sm:$0xff] }
  0x42   : > { %v446_v34 = vld [vmem:[%s7471_s14 + $0x620] sm:$0xff]  ;;  %443 = vst [vmem:[%s7479_s15 + $0x300] sm:$0xff] %v442_v32  ;;  %445 = vst [vmem:[%s7479_s15 + $0x308] sm:$0xff] %v444_v33  ;;  %v448_v35 = vld [vmem:[%s7471_s14 + $0x628] sm:$0xff] }
  0x43   : > { %447 = vst [vmem:[%s7479_s15 + $0x310] sm:$0xff] %v446_v34  ;;  %449 = vst [vmem:[%s7479_s15 + $0x318] sm:$0xff] %v448_v35 }
  0x44 PF: > { %p5911_p5 = scmp.ge.s32.totalorder %s7394_s26, 1  ;;  %p454_p6 = scmp.lt.s32.totalorder %s7394_s26, 3 }
  0x46   : > { %p455_p7 = pnand %p5911_p5, %p454_p6 }
  0x48   : > { %458 = sbr.rel (%p455_p7) target bundleno = 1692 (0x69c), region = 67 }
  0x4f   : > { %s461_s16 = sand.u32 1, %s7386_s24   ;;  %v6990_v36 = vld [vmem:[%s10346_s1 + $0x4] ss:$16 sps:$4 sm:$0xff]   ;;  %vm2890_vm0 = vcmask 130048   ;;  %s5912_s15 = sshll.u32 %s5905_s27, 1 }
  0x50   : > { %s6960_s17 = smul.u32 800, %s461_s16  ;;  %3115 = vmatprep.mubr.bf16.mxu0 %v6990_v36  ;;  %p494_p8 = scmp.lt.s32.totalorder %s5912_s15, 3 }
  0x52   : > { %s7681_s20 = scalar_lea.vmem [#allocation2], %s6960_s17  ;;  %s10673_s15 = smov (!%p494_p8, %s5912_s15), 3 }
  0x53   : > { %v501_v37 = vld [vmem:[%s7681_s20 + $0x8] sm:$0xff]  ;;  %v503_v38 = vld [vmem:[%s7681_s20 + $0x18] sm:$0xff]  ;;  %v500_v39 = vld [vmem:[%s7681_s20] sm:$0xff]  ;;  %s5913_s16 = sshll.u32 %s10673_s15, 3 }
  0x54   : > { %v601_v40 = vpack.c.bf16 %v503_v38, %v501_v37  ;;  %v502_v41 = vld [vmem:[%s7681_s20 + $0x10] sm:$0xff]  ;;  %v505_v42 = vld [vmem:[%s7681_s20 + $0x28] sm:$0xff]  ;;  %v507_v43 = vld [vmem:[%s7681_s20 + $0x38] sm:$0xff]  ;;  %s497_s19 = scalar_lea.vmem %s10352_s7, %s5913_s16 }
  0x55   : > { %v600_v44 = vpack.c.bf16 %v502_v41, %v500_v39  ;;  %v603_v45 = vpack.c.bf16 %v507_v43, %v505_v42  ;;  %v504_v46 = vld [vmem:[%s7681_s20 + $0x20] sm:$0xff]  ;;  %v506_v47 = vld [vmem:[%s7681_s20 + $0x30] sm:$0xff]  ;;  %v509_v48 = vld [vmem:[%s7681_s20 + $0x48] sm:$0xff] }
  0x56   : > { %3083 = vmatprep.subr.bf16.mxu0 %v601_v40  ;;  %v511_v49 = vld [vmem:[%s7681_s20 + $0x58] sm:$0xff]  ;;  %v602_v50 = vpack.c.bf16 %v506_v47, %v504_v46  ;;  %v508_v52 = vld [vmem:[%s7681_s20 + $0x40] sm:$0xff]  ;;  %v510_v53 = vld [vmem:[%s7681_s20 + $0x50] sm:$0xff] }
  0x57   : > { %3084 = vmatpush1.bf16.msra.mxu0 %v600_v44  ;;  %v605_v51 = vpack.c.bf16 %v511_v49, %v509_v48  ;;  %v513_v54 = vld [vmem:[%s7681_s20 + $0x68] sm:$0xff]  ;;  %v515_v55 = vld [vmem:[%s7681_s20 + $0x78] sm:$0xff]  ;;  %v604_v56 = vpack.c.bf16 %v510_v53, %v508_v52  ;;  %v512_v58 = vld [vmem:[%s7681_s20 + $0x60] sm:$0xff] }
  0x58   : > { %3085 = vmatprep.subr.bf16.mxu0 %v603_v45  ;;  %v607_v57 = vpack.c.bf16 %v515_v55, %v513_v54  ;;  %v514_v59 = vld [vmem:[%s7681_s20 + $0x70] sm:$0xff]  ;;  %v517_v60 = vld [vmem:[%s7681_s20 + $0x88] sm:$0xff]  ;;  %v519_v61 = vld [vmem:[%s7681_s20 + $0x98] sm:$0xff] }
  0x59   : > { %v606_v62 = vpack.c.bf16 %v514_v59, %v512_v58  ;;  %v609_v63 = vpack.c.bf16 %v519_v61, %v517_v60  ;;  %v516_v0 = vld [vmem:[%s7681_s20 + $0x80] sm:$0xff]  ;;  %v518_v1 = vld [vmem:[%s7681_s20 + $0x90] sm:$0xff]  ;;  %v521_v2 = vld [vmem:[%s7681_s20 + $0xa8] sm:$0xff] }
  0x5a   : > { %v523_v3 = vld [vmem:[%s7681_s20 + $0xb8] sm:$0xff]  ;;  %v608_v4 = vpack.c.bf16 %v518_v1, %v516_v0  ;;  %v520_v6 = vld [vmem:[%s7681_s20 + $0xa0] sm:$0xff]  ;;  %v522_v7 = vld [vmem:[%s7681_s20 + $0xb0] sm:$0xff] }
  0x5b   : > { %3086 = vmatpush1.bf16.msra.mxu0 %v602_v50  ;;  %v611_v5 = vpack.c.bf16 %v523_v3, %v521_v2  ;;  %v525_v8 = vld [vmem:[%s7681_s20 + $0xc8] sm:$0xff]  ;;  %v527_v9 = vld [vmem:[%s7681_s20 + $0xd8] sm:$0xff]  ;;  %v610_v10 = vpack.c.bf16 %v522_v7, %v520_v6  ;;  %v524_v11 = vld [vmem:[%s7681_s20 + $0xc0] sm:$0xff] }
  0x5c   : > { %3087 = vmatprep.subr.bf16.mxu0 %v605_v51  ;;  %v613_v12 = vpack.c.bf16 %v527_v9, %v525_v8  ;;  %v526_v13 = vld [vmem:[%s7681_s20 + $0xd0] sm:$0xff]  ;;  %v529_v14 = vld [vmem:[%s7681_s20 + $0xe8] sm:$0xff]  ;;  %v531_v15 = vld [vmem:[%s7681_s20 + $0xf8] sm:$0xff] }
  0x5d   : > { %v612_v16 = vpack.c.bf16 %v526_v13, %v524_v11  ;;  %v528_v17 = vld [vmem:[%s7681_s20 + $0xe0] sm:$0xff]  ;;  %v615_v18 = vpack.c.bf16 %v531_v15, %v529_v14  ;;  %v530_v19 = vld [vmem:[%s7681_s20 + $0xf0] sm:$0xff]  ;;  %v533_v20 = vld [vmem:[%s7681_s20 + $0x108] sm:$0xff] }
  0x5e   : > { %v535_v21 = vld [vmem:[%s7681_s20 + $0x118] sm:$0xff]  ;;  %v614_v22 = vpack.c.bf16 %v530_v19, %v528_v17  ;;  %v532_v23 = vld [vmem:[%s7681_s20 + $0x100] sm:$0xff]  ;;  %v534_v25 = vld [vmem:[%s7681_s20 + $0x110] sm:$0xff] }
  0x5f   : > { %3088 = vmatpush1.bf16.msra.mxu0 %v604_v56  ;;  %v617_v24 = vpack.c.bf16 %v535_v21, %v533_v20  ;;  %v537_v26 = vld [vmem:[%s7681_s20 + $0x128] sm:$0xff]  ;;  %v539_v27 = vld [vmem:[%s7681_s20 + $0x138] sm:$0xff]  ;;  %v536_v28 = vld [vmem:[%s7681_s20 + $0x120] sm:$0xff]  ;;  %v616_v30 = vpack.c.bf16 %v534_v25, %v532_v23 }
  0x60   : > { %3089 = vmatprep.subr.bf16.mxu0 %v607_v57  ;;  %v538_v29 = vld [vmem:[%s7681_s20 + $0x130] sm:$0xff]  ;;  %v565_v31 = vld [vmem:[%s7681_s20 + $0x208] sm:$0xff]  ;;  %v567_v32 = vld [vmem:[%s7681_s20 + $0x218] sm:$0xff]  ;;  %v619_v33 = vpack.c.bf16 %v539_v27, %v537_v26 }
  0x61   : > { %v541_v34 = vld [vmem:[%s7681_s20 + $0x148] sm:$0xff]  ;;  %v7726_v35 = vpack.c.bf16 %v567_v32, %v565_v31  ;;  %v564_v36 = vld [vmem:[%s7681_s20 + $0x200] sm:$0xff]  ;;  %v543_v37 = vld [vmem:[%s7681_s20 + $0x158] sm:$0xff]  ;;  %v618_v45 = vpack.c.bf16 %v538_v29, %v536_v28 }
  0x62   : > { %v566_v38 = vld [vmem:[%s7681_s20 + $0x210] sm:$0xff]  ;;  %v569_v39 = vld [vmem:[%s7681_s20 + $0x228] sm:$0xff]  ;;  %v540_v40 = vld [vmem:[%s7681_s20 + $0x140] sm:$0xff]  ;;  %v621_v49 = vpack.c.bf16 %v543_v37, %v541_v34 }
  0x63   : > { %3090 = vmatpush1.bf16.msra.mxu0 %v606_v62  ;;  %6301 = vmatprep.subr.bf16.mxu1 %v7726_v35  ;;  %v7734_v41 = vpack.c.bf16 %v566_v38, %v564_v36  ;;  %v571_v42 = vld [vmem:[%s7681_s20 + $0x238] sm:$0xff]  ;;  %v568_v43 = vld [vmem:[%s7681_s20 + $0x220] sm:$0xff]  ;;  %v570_v44 = vld [vmem:[%s7681_s20 + $0x230] sm:$0xff] }
  0x64   : > { %3091 = vmatprep.subr.bf16.mxu0 %v609_v63  ;;  %v7739_v46 = vpack.c.bf16 %v571_v42, %v569_v39  ;;  %v573_v47 = vld [vmem:[%s7681_s20 + $0x248] sm:$0xff]  ;;  %v575_v48 = vld [vmem:[%s7681_s20 + $0x258] sm:$0xff]  ;;  %v542_v50 = vld [vmem:[%s7681_s20 + $0x150] sm:$0xff]  ;;  %v7746_v52 = vpack.c.bf16 %v570_v44, %v568_v43 }
  0x65   : > { %v545_v51 = vld [vmem:[%s7681_s20 + $0x168] sm:$0xff]  ;;  %6310 = vmatpush1.bf16.msra.mxu1 %v7734_v41  ;;  %v547_v53 = vld [vmem:[%s7681_s20 + $0x178] sm:$0xff]  ;;  %v7750_v54 = vpack.c.bf16 %v575_v48, %v573_v47  ;;  %v572_v55 = vld [vmem:[%s7681_s20 + $0x240] sm:$0xff]  ;;  %v620_v59 = vpack.c.bf16 %v542_v50, %v540_v40 }
  0x66   : > { %6302 = vmatprep.subr.bf16.mxu1 %v7739_v46  ;;  %v574_v56 = vld [vmem:[%s7681_s20 + $0x250] sm:$0xff]  ;;  %v577_v57 = vld [vmem:[%s7681_s20 + $0x268] sm:$0xff]  ;;  %v579_v58 = vld [vmem:[%s7681_s20 + $0x278] sm:$0xff]  ;;  %v623_v61 = vpack.c.bf16 %v547_v53, %v545_v51 }
  0x67   : > { %3092 = vmatpush1.bf16.msra.mxu0 %v608_v4  ;;  %v544_v60 = vld [vmem:[%s7681_s20 + $0x160] sm:$0xff]  ;;  %v546_v62 = vld [vmem:[%s7681_s20 + $0x170] sm:$0xff]  ;;  %v549_v63 = vld [vmem:[%s7681_s20 + $0x188] sm:$0xff]  ;;  %v7760_v0 = vpack.c.bf16 %v574_v56, %v572_v55  ;;  %v7764_v2 = vpack.c.bf16 %v579_v58, %v577_v57 }
  0x68   : > { %3093 = vmatprep.subr.bf16.mxu0 %v611_v5  ;;  %v551_v1 = vld [vmem:[%s7681_s20 + $0x198] sm:$0xff]  ;;  %v576_v3 = vld [vmem:[%s7681_s20 + $0x260] sm:$0xff]  ;;  %v578_v4 = vld [vmem:[%s7681_s20 + $0x270] sm:$0xff]  ;;  %v622_v9 = vpack.c.bf16 %v546_v62, %v544_v60 }
  0x69   : > { %6311 = vmatpush1.bf16.msra.mxu1 %v7746_v52  ;;  %v548_v5 = vld [vmem:[%s7681_s20 + $0x180] sm:$0xff]  ;;  %v550_v6 = vld [vmem:[%s7681_s20 + $0x190] sm:$0xff]  ;;  %v581_v7 = vld [vmem:[%s7681_s20 + $0x288] sm:$0xff]  ;;  %v7775_v13 = vpack.c.bf16 %v578_v4, %v576_v3 }
  0x6a   : > { %6303 = vmatprep.subr.bf16.mxu1 %v7750_v54  ;;  %v583_v8 = vld [vmem:[%s7681_s20 + $0x298] sm:$0xff]  ;;  %v580_v14 = vld [vmem:[%s7681_s20 + $0x280] sm:$0xff]  ;;  %v582_v15 = vld [vmem:[%s7681_s20 + $0x290] sm:$0xff]  ;;  %v624_v21 = vpack.c.bf16 %v550_v6, %v548_v5 }
  0x6b   : > { %3094 = vmatpush1.bf16.msra.mxu0 %v610_v10  ;;  %v553_v10 = vld [vmem:[%s7681_s20 + $0x1a8] sm:$0xff]  ;;  %v555_v11 = vld [vmem:[%s7681_s20 + $0x1b8] sm:$0xff]  ;;  %v552_v19 = vld [vmem:[%s7681_s20 + $0x1a0] sm:$0xff]  ;;  %v7789_v25 = vpack.c.bf16 %v582_v15, %v580_v14 }
  0x6c   : > { %3095 = vmatprep.subr.bf16.mxu0 %v613_v12  ;;  %v625_v12 = vpack.c.bf16 %v551_v1, %v549_v63  ;;  %v585_v17 = vld [vmem:[%s7681_s20 + $0x2a8] sm:$0xff]  ;;  %v554_v20 = vld [vmem:[%s7681_s20 + $0x1b0] sm:$0xff]  ;;  %v559_v23 = vld [vmem:[%s7681_s20 + $0x1d8] sm:$0xff] }
  0x6d   : > { %6312 = vmatpush1.bf16.msra.mxu1 %v7760_v0  ;;  %v584_v27 = vld [vmem:[%s7681_s20 + $0x2a0] sm:$0xff]  ;;  %v586_v28 = vld [vmem:[%s7681_s20 + $0x2b0] sm:$0xff]  ;;  %v589_v31 = vld [vmem:[%s7681_s20 + $0x2c8] sm:$0xff] }
  0x6e   : > { %6304 = vmatprep.subr.bf16.mxu1 %v7764_v2  ;;  %v556_v29 = vld [vmem:[%s7681_s20 + $0x1c0] sm:$0xff]  ;;  %v591_v32 = vld [vmem:[%s7681_s20 + $0x2d8] sm:$0xff]  ;;  %v561_v34 = vld [vmem:[%s7681_s20 + $0x1e8] sm:$0xff]  ;;  %v7805_v40 = vpack.c.bf16 %v586_v28, %v584_v27 }
  0x6f   : > { %3096 = vmatpush1.bf16.msra.mxu0 %v612_v16  ;;  %v7780_v16 = vpack.c.bf16 %v583_v8, %v581_v7  ;;  %v563_v36 = vld [vmem:[%s7681_s20 + $0x1f8] sm:$0xff]  ;;  %v588_v37 = vld [vmem:[%s7681_s20 + $0x2c0] sm:$0xff]  ;;  %v590_v38 = vld [vmem:[%s7681_s20 + $0x2d0] sm:$0xff]  ;;  %v7810_v44 = vpack.c.bf16 %v591_v32, %v589_v31  ;;  %v10353_v8 = vmov 0  }
  0x70   : > { %3097 = vmatprep.subr.bf16.mxu0 %v615_v18  ;;  %v587_v18 = vld [vmem:[%s7681_s20 + $0x2b8] sm:$0xff]  ;;  %v593_v42 = vld [vmem:[%s7681_s20 + $0x2e8] sm:$0xff]  ;;  %v562_v47 = vld [vmem:[%s7681_s20 + $0x1f0] sm:$0xff]  ;;  %v631_v51 = vpack.c.bf16 %v563_v36, %v561_v34  ;;  %v7817_v53 = vpack.c.bf16 %v590_v38, %v588_v37  ;;  %6986 = vset.pattern.permute.xlu0 %v10353_v8 }
  0x71   : > { %6313 = vmatpush1.bf16.msra.mxu1 %v7775_v13  ;;  %v7792_v26 = vpack.c.bf16 %v587_v18, %v585_v17  ;;  %v595_v43 = vld [vmem:[%s7681_s20 + $0x2f8] sm:$0xff]  ;;  %v594_v50 = vld [vmem:[%s7681_s20 + $0x2f0] sm:$0xff]  ;;  %v597_v57 = vld [vmem:[%s7681_s20 + $0x308] sm:$0xff]  ;;  %6987 = vset.pattern.permute.xlu1 %v10353_v8 }
  0x72   : > { %6305 = vmatprep.subr.bf16.mxu1 %v7780_v16  ;;  %v7820_v55 = vpack.c.bf16 %v595_v43, %v593_v42  ;;  %v7038_v56 = vld [vmem:[%s10346_s1 + $0x1ec] ss:$16 sps:$4 sm:$0xff]   ;;  %v596_v60 = vld [vmem:[%s7681_s20 + $0x300] sm:$0xff]  ;;  %v7036_v5 = vld [vmem:[%s10346_s1 + $0x1e8] ss:$16 sps:$4 sm:$0xff]  }
  0x73   : > { %3098 = vmatpush1.bf16.msra.mxu0 %v614_v22  ;;  %v557_v22 = vld [vmem:[%s7681_s20 + $0x1c8] sm:$0xff]  ;;  %v599_v58 = vld [vmem:[%s7681_s20 + $0x318] sm:$0xff]  ;;  %6185 = vmatprep.mubr.msk.bf16.mxu1 %vm2890_vm0, %v7038_v56  ;;  %v6988_v62 = vld [vmem:[%s10346_s1] ss:$16 sps:$4 sm:$0xff]  }
  0x74   : > { %3099 = vmatprep.subr.bf16.mxu0 %v617_v24  ;;  %v627_v24 = vpack.c.bf16 %v555_v11, %v553_v10  ;;  %v629_v39 = vpack.c.bf16 %v559_v23, %v557_v22  ;;  %v6991_v1 = vld [vmem:[%s10346_s1 + $0x24] ss:$16 sps:$4 sm:$0xff]   ;;  %v7840_v3 = vpack.c.bf16 %v599_v58, %v597_v57  ;;  %v7042_v6 = vld [vmem:[%s10346_s1 + $0x20c] ss:$16 sps:$4 sm:$0xff]   ;;  %v6993_v7 = vld [vmem:[%s10346_s1 + $0x20] ss:$16 sps:$4 sm:$0xff]  }
  0x75   : > { %6314 = vmatpush1.bf16.msra.mxu1 %v7789_v25  ;;  %v908_v10 = vld [vmem:[%s10347_s2 + $0x10] sm:$0xff]  ;;  %v907_v11 = vld [vmem:[%s10347_s2 + $0x8] sm:$0xff]  ;;  %v910_v14 = vld [vmem:[%s10347_s2 + $0x20] sm:$0xff] }
  0x76   : > { %6306 = vmatprep.subr.bf16.mxu1 %v7792_v26  ;;  %1046 = vperm.xlu1 %6987, %v908_v10   ;;  %v7000_v15 = vld [vmem:[%s10346_s1 + $0x84] ss:$16 sps:$4 sm:$0xff]   ;;  %v7056_v18 = vld [vmem:[%s10346_s1 + $0x248] ss:$16 sps:$4 sm:$0xff]   ;;  %v7066_v27 = vld [vmem:[%s10346_s1 + $0x28c] ss:$16 sps:$4 sm:$0xff]  }
  0x77   : > { %3100 = vmatpush1.bf16.msra.mxu0 %v616_v30  ;;  %v558_v30 = vld [vmem:[%s7681_s20 + $0x1d0] sm:$0xff]  ;;  %v914_v22 = vld [vmem:[%s10347_s2 + $0x40] sm:$0xff]  ;;  %v917_v28 = vld [vmem:[%s10347_s2 + $0x58] sm:$0xff] }
  0x78   : > { %3101 = vmatprep.subr.bf16.mxu0 %v619_v33  ;;  %v626_v33 = vpack.c.bf16 %v554_v20, %v552_v19  ;;  %v628_v48 = vpack.c.bf16 %v558_v30, %v556_v29  ;;  %v912_v17 = vld [vmem:[%s10347_s2 + $0x30] sm:$0xff]  ;;  %v7060_v19 = vld [vmem:[%s10346_s1 + $0x26c] ss:$16 sps:$4 sm:$0xff]   ;;  %v918_v30 = vld [vmem:[%s10347_s2 + $0x60] sm:$0xff] }
  0x79   : > { %6315 = vmatpush1.bf16.msra.mxu1 %v7805_v40  ;;  %v913_v20 = vld [vmem:[%s10347_s2 + $0x38] sm:$0xff]  ;;  %v7003_v23 = vld [vmem:[%s10346_s1 + $0xa4] ss:$16 sps:$4 sm:$0xff]   ;;  %v7005_v29 = vld [vmem:[%s10346_s1 + $0xa0] ss:$16 sps:$4 sm:$0xff]  }
  0x7a   : > { %6307 = vmatprep.subr.bf16.mxu1 %v7810_v44  ;;  %v7006_v31 = vld [vmem:[%s10346_s1 + $0xc4] ss:$16 sps:$4 sm:$0xff]   ;;  %v919_v32 = vld [vmem:[%s10347_s2 + $0x68] sm:$0xff]  ;;  %v921_v37 = vld [vmem:[%s10347_s2 + $0x78] sm:$0xff] }
  0x7b   : > { %3102 = vmatpush1.bf16.msra.mxu0 %v618_v45  ;;  %v560_v45 = vld [vmem:[%s7681_s20 + $0x1e0] sm:$0xff]  ;;  %v7068_v34 = vld [vmem:[%s10346_s1 + $0x288] ss:$16 sps:$4 sm:$0xff]   ;;  %v7072_v36 = vld [vmem:[%s10346_s1 + $0x2ac] ss:$16 sps:$4 sm:$0xff]  }
  0x7c   : > { %3103 = vmatprep.subr.bf16.mxu0 %v621_v49  ;;  %v592_v49 = vld [vmem:[%s7681_s20 + $0x2e0] sm:$0xff]  ;;  %v923_v42 = vld [vmem:[%s10347_s2 + $0x88] sm:$0xff]  ;;  %v924_v43 = vld [vmem:[%s10347_s2 + $0x90] sm:$0xff] }
  0x7d   : > { %6316 = vmatpush1.bf16.msra.mxu1 %v7817_v53  ;;  %v7834_v63 = vpack.c.bf16 %v594_v50, %v592_v49  ;;  %v7008_v38 = vld [vmem:[%s10346_s1 + $0xc0] ss:$16 sps:$4 sm:$0xff]   ;;  %v7012_v50 = vld [vmem:[%s10346_s1 + $0x104] ss:$16 sps:$4 sm:$0xff]   ;;  %v7084_v56 = vld [vmem:[%s10346_s1 + $0x2ec] ss:$16 sps:$4 sm:$0xff]  }
  0x7e   : > { %6308 = vmatprep.subr.bf16.mxu1 %v7820_v55  ;;  %v926_v49 = vld [vmem:[%s10347_s2 + $0xa0] sm:$0xff]  ;;  %v929_v57 = vld [vmem:[%s10347_s2 + $0xb8] sm:$0xff] }
  0x7f   : > { %3104 = vmatpush1.bf16.msra.mxu0 %v620_v59  ;;  %v630_v59 = vpack.c.bf16 %v562_v47, %v560_v45  ;;  %v7078_v45 = vld [vmem:[%s10346_s1 + $0x2cc] ss:$16 sps:$4 sm:$0xff]   ;;  %v7014_v58 = vld [vmem:[%s10346_s1 + $0x100] ss:$16 sps:$4 sm:$0xff]  }
  0x80   : > { %3105 = vmatprep.subr.bf16.mxu0 %v623_v61  ;;  %v598_v61 = vld [vmem:[%s7681_s20 + $0x310] sm:$0xff]  ;;  %v925_v47 = vld [vmem:[%s10347_s2 + $0x98] sm:$0xff]  ;;  %v938_v10 = vld [vmem:[%s10347_s2 + $0x100] sm:$0xff] }
  0x81   : > { %6317 = vmatpush1.bf16.msra.mxu1 %v7834_v63  ;;  %v7843_v4 = vpack.c.bf16 %v598_v61, %v596_v60  ;;  %v7015_v60 = vld [vmem:[%s10346_s1 + $0x124] ss:$16 sps:$4 sm:$0xff]   ;;  %v931_v61 = vld [vmem:[%s10347_s2 + $0xc8] sm:$0xff] }
  0x82   : > { %6309 = vmatprep.subr.bf16.mxu1 %v7840_v3 }
  0x83   : > { %3106 = vmatpush1.bf16.msra.mxu0 %v622_v9  ;;  %v6997_v9 = vld [vmem:[%s10346_s1 + $0x64] ss:$16 sps:$4 sm:$0xff]  }
  0x84   : > { %3107 = vmatprep.subr.bf16.mxu0 %v625_v12  ;;  %v909_v12 = vld [vmem:[%s10347_s2 + $0x18] sm:$0xff] }
  0x85   : > { %6318 = vmatpush1.bf16.msra.mxu1 %v7843_v4  ;;  %1051 = vperm.xlu1 %6987, %v909_v12   ;;  %v7023_v12 = vld [vmem:[%s10346_s1 + $0x160] ss:$16 sps:$4 sm:$0xff]  }
  0x87   : > { %3108 = vmatpush1.bf16.msra.mxu0 %v624_v21  ;;  %v7002_v21 = vld [vmem:[%s10346_s1 + $0x80] ss:$16 sps:$4 sm:$0xff]  }
  0x88   : > { %3109 = vmatprep.subr.bf16.mxu0 %v627_v24  ;;  %3939 = vmatmul.mubr.bf16.vlgmr.msra.gmra.mrb[0].mxu1 %v7036_v5  ;;  %v915_v24 = vld [vmem:[%s10347_s2 + $0x48] sm:$0xff]  ;;  %v934_v5 = vld [vmem:[%s10347_s2 + $0xe0] sm:$0xff] }
  0x89   : > { %6186 = vmatprep.mubr.msk.bf16.mxu1 %vm2890_vm0, %v7042_v6  ;;  %v7018_v6 = vld [vmem:[%s10346_s1 + $0x144] ss:$16 sps:$4 sm:$0xff]  }
  0x8b   : > { %3110 = vmatpush1.bf16.msra.mxu0 %v626_v33  ;;  %v920_v33 = vld [vmem:[%s10347_s2 + $0x70] sm:$0xff] }
  0x8c   : > { %3111 = vmatprep.subr.bf16.mxu0 %v629_v39  ;;  %v922_v39 = vld [vmem:[%s10347_s2 + $0x80] sm:$0xff] }
  0x8f   : > { %3112 = vmatpush1.bf16.msra.mxu0 %v628_v48  ;;  %v7011_v48 = vld [vmem:[%s10346_s1 + $0xe0] ss:$16 sps:$4 sm:$0xff]  }
  0x90   : > { %3113 = vmatprep.subr.bf16.mxu0 %v631_v51  ;;  %v927_v51 = vld [vmem:[%s10347_s2 + $0xa8] sm:$0xff] }
  0x93   : > { %3114 = vmatpush1.bf16.msra.mxu0 %v630_v59  ;;  %v930_v59 = vld [vmem:[%s10347_s2 + $0xc0] sm:$0xff] }
  0x94   : > { %3756 = vmatprep.subr.bf16.mxu0 %v7726_v35  ;;  %v6994_v35 = vld [vmem:[%s10346_s1 + $0x44] ss:$16 sps:$4 sm:$0xff]  }
  0x96   : > { %3116 = vmatmul.mubr.bf16.vlgmr.msra.gmra.mrb[0].mxu0 %v6988_v62  ;;  %v932_v62 = vld [vmem:[%s10347_s2 + $0xd0] sm:$0xff] }
  0x97   : > { %3125 = vmatprep.mubr.bf16.mxu0 %v6991_v1  ;;  %3757 = vmatpush1.bf16.msra.mxu0 %v7734_v41  ;;  %v7044_v41 = vld [vmem:[%s10346_s1 + $0x208] ss:$16 sps:$4 sm:$0xff]   ;;  %v7090_v1 = vld [vmem:[%s10346_s1 + $0x30c] ss:$16 sps:$4 sm:$0xff]  }
  0x98   : > { %3758 = vmatprep.subr.bf16.mxu0 %v7739_v46  ;;  %v7048_v46 = vld [vmem:[%s10346_s1 + $0x22c] ss:$16 sps:$4 sm:$0xff]   ;;  %3949 = vmatmul.mubr.bf16.gmra.mrb[4].mxu1 %v7044_v41  ;;  %v7092_v41 = vld [vmem:[%s10346_s1 + $0x308] ss:$16 sps:$4 sm:$0xff]  }
  0x99   : > { %6187 = vmatprep.mubr.msk.bf16.mxu1 %vm2890_vm0, %v7048_v46  ;;  %v7096_v46 = vld [vmem:[%s10346_s1 + $0x32c] ss:$16 sps:$4 sm:$0xff]  }
  0x9b   : > { %3759 = vmatpush1.bf16.msra.mxu0 %v7746_v52  ;;  %v906_v52 = vld [vmem:[%s10347_s2] sm:$0xff] }
  0x9c   : > { %3760 = vmatprep.subr.bf16.mxu0 %v7750_v54  ;;  %v6996_v54 = vld [vmem:[%s10346_s1 + $0x40] ss:$16 sps:$4 sm:$0xff]   ;;  %1036 = vperm.xlu0 %6986, %v906_v52   ;;  %v937_v52 = vld [vmem:[%s10347_s2 + $0xf8] sm:$0xff] }
  0x9e   : > { %3126 = vmatmul.mubr.bf16.gmra.mrb[4].mxu0 %v6993_v7  ;;  %v935_v7 = vld [vmem:[%s10347_s2 + $0xe8] sm:$0xff] }
  0x9f   : > { %3135 = vmatprep.mubr.bf16.mxu0 %v6994_v35  ;;  %3761 = vmatpush1.bf16.msra.mxu0 %v7760_v0  ;;  %v7050_v0 = vld [vmem:[%s10346_s1 + $0x228] ss:$16 sps:$4 sm:$0xff]   ;;  %v936_v35 = vld [vmem:[%s10347_s2 + $0xf0] sm:$0xff] }
  0xa0   : > { %3762 = vmatprep.subr.bf16.mxu0 %v7764_v2  ;;  %v7054_v2 = vld [vmem:[%s10346_s1 + $0x24c] ss:$16 sps:$4 sm:$0xff]   ;;  %1041 = vperm.xlu0 %6986, %v907_v11  }
  0xa1   : > { %3959 = vmatmul.mubr.bf16.gmra.mrb[8].mxu1 %v7050_v0  ;;  %v939_v11 = vld [vmem:[%s10347_s2 + $0x108] sm:$0xff] }
  0xa2   : > { %6188 = vmatprep.mubr.msk.bf16.mxu1 %vm2890_vm0, %v7054_v2  ;;  %v7098_v0 = vld [vmem:[%s10346_s1 + $0x328] ss:$16 sps:$4 sm:$0xff]   ;;  %v7102_v2 = vld [vmem:[%s10346_s1 + $0x34c] ss:$16 sps:$4 sm:$0xff]  }
  0xa3   : > { %3763 = vmatpush1.bf16.msra.mxu0 %v7775_v13  ;;  %v6999_v13 = vld [vmem:[%s10346_s1 + $0x60] ss:$16 sps:$4 sm:$0xff]  }
  0xa4   : > { %3764 = vmatprep.subr.bf16.mxu0 %v7780_v16  ;;  %1056 = vperm.xlu0 %6986, %v910_v14   ;;  %v911_v16 = vld [vmem:[%s10347_s2 + $0x28] sm:$0xff]  ;;  %v940_v14 = vld [vmem:[%s10347_s2 + $0x110] sm:$0xff] }
  0xa5   : > { %1061 = vperm.xlu1 %6987, %v911_v16   ;;  %v7104_v16 = vld [vmem:[%s10346_s1 + $0x348] ss:$16 sps:$4 sm:$0xff]  }
  0xa6   : > { %3136 = vmatmul.mubr.bf16.gmra.mrb[8].mxu0 %v6996_v54  ;;  %v7020_v54 = vld [vmem:[%s10346_s1 + $0x140] ss:$16 sps:$4 sm:$0xff]  }
  0xa7   : > { %3145 = vmatprep.mubr.bf16.mxu0 %v6997_v9  ;;  %3765 = vmatpush1.bf16.msra.mxu0 %v7789_v25  ;;  %v916_v25 = vld [vmem:[%s10347_s2 + $0x50] sm:$0xff] }
  0xa8   : > { %3766 = vmatprep.subr.bf16.mxu0 %v7792_v26  ;;  %1066 = vperm.xlu0 %6986, %v912_v17   ;;  %v7062_v26 = vld [vmem:[%s10346_s1 + $0x268] ss:$16 sps:$4 sm:$0xff]   ;;  %v7021_v9 = vld [vmem:[%s10346_s1 + $0x164] ss:$16 sps:$4 sm:$0xff]   ;;  %v7108_v17 = vld [vmem:[%s10346_s1 + $0x36c] ss:$16 sps:$4 sm:$0xff]  }
  0xa9   : > { %3969 = vmatmul.mubr.bf16.gmra.mrb[12].mxu1 %v7056_v18  ;;  %1071 = vperm.xlu1 %6987, %v913_v20   ;;  %v7026_v18 = vld [vmem:[%s10346_s1 + $0x180] ss:$16 sps:$4 sm:$0xff]  }
  0xaa   : > { %6189 = vmatprep.mubr.msk.bf16.mxu1 %vm2890_vm0, %v7060_v19  ;;  %v7027_v19 = vld [vmem:[%s10346_s1 + $0x1a4] ss:$16 sps:$4 sm:$0xff]  }
  0xab   : > { %3767 = vmatpush1.bf16.msra.mxu0 %v7805_v40  ;;  %v7009_v40 = vld [vmem:[%s10346_s1 + $0xe4] ss:$16 sps:$4 sm:$0xff]  }
  0xac   : > { %3768 = vmatprep.subr.bf16.mxu0 %v7810_v44  ;;  %1076 = vperm.xlu0 %6986, %v914_v22   ;;  %v7074_v44 = vld [vmem:[%s10346_s1 + $0x2a8] ss:$16 sps:$4 sm:$0xff]   ;;  %v942_v20 = vld [vmem:[%s10347_s2 + $0x120] sm:$0xff] }
  0xad   : > { %1081 = vperm.xlu1 %6987, %v915_v24   ;;  %v7110_v22 = vld [vmem:[%s10346_s1 + $0x368] ss:$16 sps:$4 sm:$0xff]   ;;  %v7029_v24 = vld [vmem:[%s10346_s1 + $0x1a0] ss:$16 sps:$4 sm:$0xff]  }
  0xae   : > { %3146 = vmatmul.mubr.bf16.gmra.mrb[12].mxu0 %v6999_v13  ;;  %v7024_v13 = vld [vmem:[%s10346_s1 + $0x184] ss:$16 sps:$4 sm:$0xff]  }
  0xaf   : > { %3155 = vmatprep.mubr.bf16.mxu0 %v7000_v15  ;;  %3769 = vmatpush1.bf16.msra.mxu0 %v7817_v53  ;;  %v928_v53 = vld [vmem:[%s10347_s2 + $0xb0] sm:$0xff]  ;;  %v941_v15 = vld [vmem:[%s10347_s2 + $0x118] sm:$0xff] }
  0xb0   : > { %3770 = vmatprep.subr.bf16.mxu0 %v7820_v55  ;;  %1086 = vperm.xlu0 %6986, %v916_v25   ;;  %v7080_v55 = vld [vmem:[%s10346_s1 + $0x2c8] ss:$16 sps:$4 sm:$0xff]   ;;  %v7030_v25 = vld [vmem:[%s10346_s1 + $0x1c4] ss:$16 sps:$4 sm:$0xff]  }
  0xb1   : > { %3979 = vmatmul.mubr.bf16.gmra.mrb[16].mxu1 %v7062_v26  ;;  %1091 = vperm.xlu1 %6987, %v917_v28   ;;  %v944_v26 = vld [vmem:[%s10347_s2 + $0x130] sm:$0xff]  ;;  %v7116_v28 = vld [vmem:[%s10346_s1 + $0x388] ss:$16 sps:$4 sm:$0xff]  }
  0xb2   : > { %6190 = vmatprep.mubr.msk.bf16.mxu1 %vm2890_vm0, %v7066_v27  ;;  %v945_v27 = vld [vmem:[%s10347_s2 + $0x138] sm:$0xff] }
  0xb3   : > { %3771 = vmatpush1.bf16.msra.mxu0 %v7834_v63  ;;  %v7086_v63 = vld [vmem:[%s10346_s1 + $0x2e8] ss:$16 sps:$4 sm:$0xff]  }
  0xb4   : > { %3772 = vmatprep.subr.bf16.mxu0 %v7840_v3  ;;  %1096 = vperm.xlu0 %6986, %v918_v30   ;;  %v933_v3 = vld [vmem:[%s10347_s2 + $0xd8] sm:$0xff]  ;;  %v7032_v30 = vld [vmem:[%s10346_s1 + $0x1c0] ss:$16 sps:$4 sm:$0xff]  }
  0xb5   : > { %1101 = vperm.xlu1 %6987, %v919_v32   ;;  %v946_v32 = vld [vmem:[%s10347_s2 + $0x140] sm:$0xff] }
  0xb6   : > { %3156 = vmatmul.mubr.bf16.gmra.mrb[16].mxu0 %v7002_v21  ;;  %v943_v21 = vld [vmem:[%s10347_s2 + $0x128] sm:$0xff] }
  0xb7   : > { %3165 = vmatprep.mubr.bf16.mxu0 %v7003_v23  ;;  %3773 = vmatpush1.bf16.msra.mxu0 %v7843_v4  ;;  %v7017_v4 = vld [vmem:[%s10346_s1 + $0x120] ss:$16 sps:$4 sm:$0xff]   ;;  %v7114_v23 = vld [vmem:[%s10346_s1 + $0x38c] ss:$16 sps:$4 sm:$0xff]  }
  0xb8   : > { %1106 = vperm.xlu0 %6986, %v920_v33   ;;  %v947_v33 = vld [vmem:[%s10347_s2 + $0x148] sm:$0xff] }
  0xb9   : > { %3989 = vmatmul.mubr.bf16.gmra.mrb[20].mxu1 %v7068_v34  ;;  %1111 = vperm.xlu1 %6987, %v921_v37   ;;  %v7122_v34 = vld [vmem:[%s10346_s1 + $0x3a8] ss:$16 sps:$4 sm:$0xff]   ;;  %v7035_v37 = vld [vmem:[%s10346_s1 + $0x1e0] ss:$16 sps:$4 sm:$0xff]  }
  0xba   : > { %6191 = vmatprep.mubr.msk.bf16.mxu1 %vm2890_vm0, %v7072_v36  ;;  %v7126_v36 = vld [vmem:[%s10346_s1 + $0x3cc] ss:$16 sps:$4 sm:$0xff]  }
  0xbc   : > { %1116 = vperm.xlu0 %6986, %v922_v39   ;;  %v948_v39 = vld [vmem:[%s10347_s2 + $0x150] sm:$0xff] }
  0xbd   : > { %1121 = vperm.xlu1 %6987, %v923_v42   ;;  %v7128_v42 = vld [vmem:[%s10346_s1 + $0x3c8] ss:$16 sps:$4 sm:$0xff]  }
  0xbe   : > { %3166 = vmatmul.mubr.bf16.gmra.mrb[20].mxu0 %v7005_v29  ;;  %v7120_v29 = vld [vmem:[%s10346_s1 + $0x3ac] ss:$16 sps:$4 sm:$0xff]  }
  0xbf   : > { %3175 = vmatprep.mubr.bf16.mxu0 %v7006_v31  ;;  %v7033_v31 = vld [vmem:[%s10346_s1 + $0x1e4] ss:$16 sps:$4 sm:$0xff]  }
  0xc0   : > { %1126 = vperm.xlu0 %6986, %v924_v43   ;;  %v7132_v43 = vld [vmem:[%s10346_s1 + $0x3ec] ss:$16 sps:$4 sm:$0xff]  }
  0xc1   : > { %3999 = vmatmul.mubr.bf16.gmra.mrb[24].mxu1 %v7074_v44  ;;  %1131 = vperm.xlu1 %6987, %v925_v47   ;;  %v7041_v44 = vld [vmem:[%s10346_s1 + $0x200] ss:$16 sps:$4 sm:$0xff]  }
  0xc2   : > { %6192 = vmatprep.mubr.msk.bf16.mxu1 %vm2890_vm0, %v7078_v45  ;;  %v7045_v45 = vld [vmem:[%s10346_s1 + $0x224] ss:$16 sps:$4 sm:$0xff]  }
  0xc3   : > { %v950_v47 = vld [vmem:[%s10347_s2 + $0x160] sm:$0xff] }
  0xc4   : > { %1136 = vperm.xlu0 %6986, %v926_v49   ;;  %v7134_v49 = vld [vmem:[%s10346_s1 + $0x3e8] ss:$16 sps:$4 sm:$0xff]  }
  0xc5   : > { %1141 = vperm.xlu1 %6987, %v927_v51   ;;  %v7047_v51 = vld [vmem:[%s10346_s1 + $0x220] ss:$16 sps:$4 sm:$0xff]  }
  0xc6   : > { %3176 = vmatmul.mubr.bf16.gmra.mrb[24].mxu0 %v7008_v38  ;;  %v7039_v38 = vld [vmem:[%s10346_s1 + $0x204] ss:$16 sps:$4 sm:$0xff]  }
  0xc7   : > { %3185 = vmatprep.mubr.bf16.mxu0 %v7009_v40  ;;  %v949_v40 = vld [vmem:[%s10347_s2 + $0x158] sm:$0xff] }
  0xc8   : > { %1146 = vperm.xlu0 %6986, %v928_v53   ;;  %v7051_v53 = vld [vmem:[%s10346_s1 + $0x244] ss:$16 sps:$4 sm:$0xff]  }
  0xc9   : > { %4009 = vmatmul.mubr.bf16.gmra.mrb[28].mxu1 %v7080_v55  ;;  %1151 = vperm.xlu1 %6987, %v929_v57   ;;  %v952_v55 = vld [vmem:[%s10347_s2 + $0x170] sm:$0xff]  ;;  %v7140_v57 = vld [vmem:[%s10346_s1 + $0x408] ss:$16 sps:$4 sm:$0xff]  }
  0xca   : > { %6193 = vmatprep.mubr.msk.bf16.mxu1 %vm2890_vm0, %v7084_v56  ;;  %v953_v56 = vld [vmem:[%s10347_s2 + $0x178] sm:$0xff] }
  0xcc   : > { %1156 = vperm.xlu0 %6986, %v930_v59   ;;  %v7053_v59 = vld [vmem:[%s10346_s1 + $0x240] ss:$16 sps:$4 sm:$0xff]  }
  0xcd   : > { %1161 = vperm.xlu1 %6987, %v931_v61   ;;  %v954_v61 = vld [vmem:[%s10347_s2 + $0x180] sm:$0xff] }
  0xce   : > { %3186 = vmatmul.mubr.bf16.gmra.mrb[28].mxu0 %v7011_v48  ;;  %v951_v48 = vld [vmem:[%s10347_s2 + $0x168] sm:$0xff] }
  0xcf   : > { %3195 = vmatprep.mubr.bf16.mxu0 %v7012_v50  ;;  %v7138_v50 = vld [vmem:[%s10346_s1 + $0x40c] ss:$16 sps:$4 sm:$0xff]  }
  0xd0   : > { %1166 = vperm.xlu0 %6986, %v932_v62   ;;  %v955_v62 = vld [vmem:[%s10347_s2 + $0x188] sm:$0xff] }
  0xd1   : > { %4019 = vmatmul.mubr.bf16.gmra.mrb[32].mxu1 %v7086_v63  ;;  %1171 = vperm.xlu1 %6987, %v933_v3   ;;  %v7146_v63 = vld [vmem:[%s10346_s1 + $0x428] ss:$16 sps:$4 sm:$0xff]   ;;  %v7059_v3 = vld [vmem:[%s10346_s1 + $0x260] ss:$16 sps:$4 sm:$0xff]  }
  0xd2   : > { %6194 = vmatprep.mubr.msk.bf16.mxu1 %vm2890_vm0, %v7090_v1  ;;  %v7150_v1 = vld [vmem:[%s10346_s1 + $0x44c] ss:$16 sps:$4 sm:$0xff]  }
  0xd4   : > { %1176 = vperm.xlu0 %6986, %v934_v5   ;;  %v956_v5 = vld [vmem:[%s10347_s2 + $0x190] sm:$0xff] }
  0xd5   : > { %1181 = vperm.xlu1 %6987, %v935_v7   ;;  %v7152_v7 = vld [vmem:[%s10346_s1 + $0x448] ss:$16 sps:$4 sm:$0xff]  }
  0xd6   : > { %3196 = vmatmul.mubr.bf16.gmra.mrb[32].mxu0 %v7014_v58  ;;  %v7144_v58 = vld [vmem:[%s10346_s1 + $0x42c] ss:$16 sps:$4 sm:$0xff]  }
  0xd7   : > { %3205 = vmatprep.mubr.bf16.mxu0 %v7015_v60  ;;  %v7057_v60 = vld [vmem:[%s10346_s1 + $0x264] ss:$16 sps:$4 sm:$0xff]  }
  0xd8   : > { %1186 = vperm.xlu0 %6986, %v936_v35   ;;  %v7156_v35 = vld [vmem:[%s10346_s1 + $0x46c] ss:$16 sps:$4 sm:$0xff]  }
  0xd9   : > { %4029 = vmatmul.mubr.bf16.gmra.mrb[36].mxu1 %v7092_v41  ;;  %1191 = vperm.xlu1 %6987, %v937_v52   ;;  %v7065_v41 = vld [vmem:[%s10346_s1 + $0x280] ss:$16 sps:$4 sm:$0xff]  }
  0xda   : > { %6195 = vmatprep.mubr.msk.bf16.mxu1 %vm2890_vm0, %v7096_v46  ;;  %v7069_v46 = vld [vmem:[%s10346_s1 + $0x2a4] ss:$16 sps:$4 sm:$0xff]  }
  0xdb   : > { %v958_v52 = vld [vmem:[%s10347_s2 + $0x1a0] sm:$0xff] }
  0xdc   : > { %1196 = vperm.xlu0 %6986, %v938_v10   ;;  %v7162_v10 = vld [vmem:[%s10346_s1 + $0x48c] ss:$16 sps:$4 sm:$0xff]  }
  0xdd   : > { %1201 = vperm.xlu1 %6987, %v939_v11   ;;  %v7071_v11 = vld [vmem:[%s10346_s1 + $0x2a0] ss:$16 sps:$4 sm:$0xff]  }
  0xde   : > { %3206 = vmatmul.mubr.bf16.gmra.mrb[36].mxu0 %v7017_v4  ;;  %v7063_v4 = vld [vmem:[%s10346_s1 + $0x284] ss:$16 sps:$4 sm:$0xff]  }
  0xdf   : > { %3215 = vmatprep.mubr.bf16.mxu0 %v7018_v6  ;;  %v957_v6 = vld [vmem:[%s10347_s2 + $0x198] sm:$0xff] }
  0xe0   : > { %1206 = vperm.xlu0 %6986, %v940_v14   ;;  %v7168_v14 = vld [vmem:[%s10346_s1 + $0x4ac] ss:$16 sps:$4 sm:$0xff]  }
  0xe1   : > { %4039 = vmatmul.mubr.bf16.gmra.mrb[40].mxu1 %v7098_v0  ;;  %1211 = vperm.xlu1 %6987, %v941_v15   ;;  %v7075_v0 = vld [vmem:[%s10346_s1 + $0x2c4] ss:$16 sps:$4 sm:$0xff]   ;;  %v7077_v15 = vld [vmem:[%s10346_s1 + $0x2c0] ss:$16 sps:$4 sm:$0xff]  }
  0xe2   : > { %6196 = vmatprep.mubr.msk.bf16.mxu1 %vm2890_vm0, %v7102_v2  ;;  %v960_v2 = vld [vmem:[%s10347_s2 + $0x1b0] sm:$0xff] }
  0xe4   : > { %1216 = vperm.xlu0 %6986, %v942_v20   ;;  %v7174_v20 = vld [vmem:[%s10346_s1 + $0x4cc] ss:$16 sps:$4 sm:$0xff]  }
  0xe5   : > { %1221 = vperm.xlu1 %6987, %v943_v21   ;;  %v7083_v21 = vld [vmem:[%s10346_s1 + $0x2e0] ss:$16 sps:$4 sm:$0xff]  }
  0xe6   : > { %3216 = vmatmul.mubr.bf16.gmra.mrb[40].mxu0 %v7020_v54  ;;  %v959_v54 = vld [vmem:[%s10347_s2 + $0x1a8] sm:$0xff] }
  0xe7   : > { %3225 = vmatprep.mubr.bf16.mxu0 %v7021_v9  ;;  %v7158_v9 = vld [vmem:[%s10346_s1 + $0x468] ss:$16 sps:$4 sm:$0xff]  }
  0xe8   : > { %1226 = vperm.xlu0 %6986, %v944_v26   ;;  %v7180_v26 = vld [vmem:[%s10346_s1 + $0x4ec] ss:$16 sps:$4 sm:$0xff]  }
  0xe9   : > { %4049 = vmatmul.mubr.bf16.gmra.mrb[44].mxu1 %v7104_v16  ;;  %1231 = vperm.xlu1 %6987, %v945_v27   ;;  %v7081_v16 = vld [vmem:[%s10346_s1 + $0x2e4] ss:$16 sps:$4 sm:$0xff]   ;;  %v7089_v27 = vld [vmem:[%s10346_s1 + $0x300] ss:$16 sps:$4 sm:$0xff]  }
  0xea   : > { %6197 = vmatprep.mubr.msk.bf16.mxu1 %vm2890_vm0, %v7108_v17  ;;  %v962_v17 = vld [vmem:[%s10347_s2 + $0x1c0] sm:$0xff] }
  0xec   : > { %1236 = vperm.xlu0 %6986, %v946_v32   ;;  %v7186_v32 = vld [vmem:[%s10346_s1 + $0x50c] ss:$16 sps:$4 sm:$0xff]  }
  0xed   : > { %1241 = vperm.xlu1 %6987, %v947_v33   ;;  %v7095_v33 = vld [vmem:[%s10346_s1 + $0x320] ss:$16 sps:$4 sm:$0xff]  }
  0xee   : > { %3226 = vmatmul.mubr.bf16.gmra.mrb[44].mxu0 %v7023_v12  ;;  %v961_v12 = vld [vmem:[%s10347_s2 + $0x1b8] sm:$0xff] }
  0xef   : > { %3235 = vmatprep.mubr.bf16.mxu0 %v7024_v13  ;;  %v7164_v13 = vld [vmem:[%s10346_s1 + $0x488] ss:$16 sps:$4 sm:$0xff]  }
  0xf0   : > { %1246 = vperm.xlu0 %6986, %v948_v39   ;;  %v7101_v39 = vld [vmem:[%s10346_s1 + $0x340] ss:$16 sps:$4 sm:$0xff]  }
  0xf1   : > { %4059 = vmatmul.mubr.bf16.gmra.mrb[48].mxu1 %v7110_v22  ;;  %1251 = vperm.xlu1 %6987, %v949_v40   ;;  %v7087_v22 = vld [vmem:[%s10346_s1 + $0x304] ss:$16 sps:$4 sm:$0xff]  }
  0xf2   : > { %6198 = vmatprep.mubr.msk.bf16.mxu1 %vm2890_vm0, %v7114_v23  ;;  %v964_v23 = vld [vmem:[%s10347_s2 + $0x1d0] sm:$0xff] }
  0xf3   : > { %v7105_v40 = vld [vmem:[%s10346_s1 + $0x364] ss:$16 sps:$4 sm:$0xff]  }
  0xf4   : > { %1256 = vperm.xlu0 %6986, %v950_v47   ;;  %v7107_v47 = vld [vmem:[%s10346_s1 + $0x360] ss:$16 sps:$4 sm:$0xff]  }
  0xf5   : > { %1261 = vperm.xlu1 %6987, %v951_v48   ;;  %v7111_v48 = vld [vmem:[%s10346_s1 + $0x384] ss:$16 sps:$4 sm:$0xff]  }
  0xf6   : > { %3236 = vmatmul.mubr.bf16.gmra.mrb[48].mxu0 %v7026_v18  ;;  %v963_v18 = vld [vmem:[%s10347_s2 + $0x1c8] sm:$0xff] }
  0xf7   : > { %3245 = vmatprep.mubr.bf16.mxu0 %v7027_v19  ;;  %v7170_v19 = vld [vmem:[%s10346_s1 + $0x4a8] ss:$16 sps:$4 sm:$0xff]  }
  0xf8   : > { %1266 = vperm.xlu0 %6986, %v952_v55  }
  0xf9   : > { %4069 = vmatmul.mubr.bf16.gmra.mrb[52].mxu1 %v7116_v28  ;;  %1271 = vperm.xlu1 %6987, %v953_v56   ;;  %v7093_v28 = vld [vmem:[%s10346_s1 + $0x324] ss:$16 sps:$4 sm:$0xff]   ;;  %v7204_v56 = vld [vmem:[%s10346_s1 + $0x56c] ss:$16 sps:$4 sm:$0xff]  }
  0xfa   : > { %6199 = vmatprep.mubr.msk.bf16.mxu1 %vm2890_vm0, %v7120_v29  ;;  %v966_v29 = vld [vmem:[%s10347_s2 + $0x1e0] sm:$0xff] }
  0xfc   : > { %1276 = vperm.xlu0 %6986, %v954_v61   ;;  %v973_v61 = vld [vmem:[%s10347_s2 + $0x218] sm:$0xff] }
  0xfd   : > { %1281 = vperm.xlu1 %6987, %v955_v62  }
  0xfe   : > { %3246 = vmatmul.mubr.bf16.gmra.mrb[52].mxu0 %v7029_v24  ;;  %v965_v24 = vld [vmem:[%s10347_s2 + $0x1d8] sm:$0xff] }
  0xff   : > { %3255 = vmatprep.mubr.bf16.mxu0 %v7030_v25  ;;  %v7176_v25 = vld [vmem:[%s10346_s1 + $0x4c8] ss:$16 sps:$4 sm:$0xff]  }
 0x100   : > { %1286 = vperm.xlu0 %6986, %v956_v5  }
 0x101   : > { %4079 = vmatmul.mubr.bf16.gmra.mrb[56].mxu1 %v7122_v34  ;;  %1291 = vperm.xlu1 %6987, %v957_v6   ;;  %v7099_v34 = vld [vmem:[%s10346_s1 + $0x344] ss:$16 sps:$4 sm:$0xff]  }
 0x102   : > { %6200 = vmatprep.mubr.msk.bf16.mxu1 %vm2890_vm0, %v7126_v36  ;;  %v7188_v36 = vld [vmem:[%s10346_s1 + $0x508] ss:$16 sps:$4 sm:$0xff]   ;;  %v974_v6 = vld [vmem:[%s10347_s2 + $0x220] sm:$0xff] }
 0x104   : > { %1296 = vperm.xlu0 %6986, %v958_v52  }
 0x105   : > { %1301 = vperm.xlu1 %6987, %v959_v54   ;;  %v7212_v54 = vld [vmem:[%s10346_s1 + $0x588] ss:$16 sps:$4 sm:$0xff]  }
 0x106   : > { %3256 = vmatmul.mubr.bf16.gmra.mrb[56].mxu0 %v7032_v30  ;;  %v967_v30 = vld [vmem:[%s10347_s2 + $0x1e8] sm:$0xff] }
 0x107   : > { %3265 = vmatprep.mubr.bf16.mxu0 %v7033_v31  ;;  %v7182_v31 = vld [vmem:[%s10346_s1 + $0x4e8] ss:$16 sps:$4 sm:$0xff]  }
 0x108   : > { %1306 = vperm.xlu0 %6986, %v960_v2   ;;  %v7125_v2 = vld [vmem:[%s10346_s1 + $0x3c0] ss:$16 sps:$4 sm:$0xff]  }
 0x109   : > { %4089 = vmatmul.mubr.bf16.gmra.mrb[60].mxu1 %v7128_v42  ;;  %1311 = vperm.xlu1 %6987, %v961_v12   ;;  %v969_v42 = vld [vmem:[%s10347_s2 + $0x1f8] sm:$0xff]  ;;  %v7129_v12 = vld [vmem:[%s10346_s1 + $0x3e4] ss:$16 sps:$4 sm:$0xff]  }
 0x10a   : > { %6201 = vmatprep.mubr.msk.bf16.mxu1 %vm2890_vm0, %v7132_v43  ;;  %v7194_v43 = vld [vmem:[%s10346_s1 + $0x528] ss:$16 sps:$4 sm:$0xff]  }
 0x10c   : > { %1316 = vperm.xlu0 %6986, %v962_v17  }
 0x10d   : > { %1321 = vperm.xlu1 %6987, %v963_v18   ;;  %v7218_v18 = vld [vmem:[%s10346_s1 + $0x5a8] ss:$16 sps:$4 sm:$0xff]  }
 0x10e   : > { %3266 = vmatmul.mubr.bf16.gmra.mrb[60].mxu0 %v7035_v37  ;;  %v7192_v37 = vld [vmem:[%s10346_s1 + $0x52c] ss:$16 sps:$4 sm:$0xff]  }
 0x10f   : > { %3275 = vmatprep.mubr.bf16.mxu0 %v7039_v38  ;;  %v968_v38 = vld [vmem:[%s10347_s2 + $0x1f0] sm:$0xff] }
 0x110   : > { %1326 = vperm.xlu0 %6986, %v964_v23   ;;  %v7131_v23 = vld [vmem:[%s10346_s1 + $0x3e0] ss:$16 sps:$4 sm:$0xff]  }
 0x111   : > { %4099 = vmatmul.mubr.bf16.gmra.mrb[64].mxu1 %v7134_v49  ;;  %1331 = vperm.xlu1 %6987, %v965_v24   ;;  %v971_v49 = vld [vmem:[%s10347_s2 + $0x208] sm:$0xff]  ;;  %v7135_v24 = vld [vmem:[%s10346_s1 + $0x404] ss:$16 sps:$4 sm:$0xff]  }
 0x112   : > { %6202 = vmatprep.mubr.msk.bf16.mxu1 %vm2890_vm0, %v7138_v50 }
 0x114   : > { %1336 = vperm.xlu0 %6986, %v966_v29  }
 0x115   : > { %1341 = vperm.xlu1 %6987, %v967_v30   ;;  %v7224_v30 = vld [vmem:[%s10346_s1 + $0x5c8] ss:$16 sps:$4 sm:$0xff]  }
 0x116   : > { %3276 = vmatmul.mubr.bf16.gmra.mrb[64].mxu0 %v7041_v44  ;;  %v7198_v44 = vld [vmem:[%s10346_s1 + $0x54c] ss:$16 sps:$4 sm:$0xff]  }
 0x117   : > { %3285 = vmatprep.mubr.bf16.mxu0 %v7045_v45  ;;  %v970_v45 = vld [vmem:[%s10347_s2 + $0x200] sm:$0xff] }
 0x118   : > { %1346 = vperm.xlu0 %6986, %v968_v38  }
 0x119   : > { %4109 = vmatmul.mubr.bf16.gmra.mrb[68].mxu1 %v7140_v57  ;;  %1351 = vperm.xlu1 %6987, %v969_v42  }
 0x11a   : > { %6203 = vmatprep.mubr.msk.bf16.mxu1 %vm2890_vm0, %v7144_v58  ;;  %v972_v58 = vld [vmem:[%s10347_s2 + $0x210] sm:$0xff] }
 0x11c   : > { %1356 = vperm.xlu0 %6986, %v970_v45   ;;  %v7230_v45 = vld [vmem:[%s10346_s1 + $0x5e8] ss:$16 sps:$4 sm:$0xff]  }
 0x11d   : > { %1361 = vperm.xlu1 %6987, %v971_v49   ;;  %v7234_v49 = vld [vmem:[%s10346_s1 + $0x60c] ss:$16 sps:$4 sm:$0xff]  }
 0x11e   : > { %3286 = vmatmul.mubr.bf16.gmra.mrb[68].mxu0 %v7047_v51 }
 0x11f   : > { %3295 = vmatprep.mubr.bf16.mxu0 %v7051_v53  ;;  %v7200_v53 = vld [vmem:[%s10346_s1 + $0x548] ss:$16 sps:$4 sm:$0xff]  }
 0x120   : > { %1366 = vperm.xlu0 %6986, %v972_v58   ;;  %v7143_v58 = vld [vmem:[%s10346_s1 + $0x420] ss:$16 sps:$4 sm:$0xff]  }
 0x121   : > { %4119 = vmatmul.mubr.bf16.gmra.mrb[72].mxu1 %v7146_v63  ;;  %1371 = vperm.xlu1 %6987, %v973_v61  }
 0x122   : > { %6204 = vmatprep.mubr.msk.bf16.mxu1 %vm2890_vm0, %v7150_v1  ;;  %v7206_v1 = vld [vmem:[%s10346_s1 + $0x568] ss:$16 sps:$4 sm:$0xff]  }
 0x124   : > { %1376 = vperm.xlu0 %6986, %v974_v6  }
 0x126   : > { %3296 = vmatmul.mubr.bf16.gmra.mrb[72].mxu0 %v7053_v59  ;;  %v7113_v59 = vld [vmem:[%s10346_s1 + $0x380] ss:$16 sps:$4 sm:$0xff]  }
 0x127   : > { %3305 = vmatprep.mubr.bf16.mxu0 %v7057_v60  ;;  %v7117_v60 = vld [vmem:[%s10346_s1 + $0x3a4] ss:$16 sps:$4 sm:$0xff]  }
 0x129   : > { %4129 = vmatmul.mubr.bf16.gmra.mrb[76].mxu1 %v7152_v7  ;;  %v7119_v7 = vld [vmem:[%s10346_s1 + $0x3a0] ss:$16 sps:$4 sm:$0xff]  }
 0x12a   : > { %6205 = vmatprep.mubr.msk.bf16.mxu1 %vm2890_vm0, %v7156_v35  ;;  %v7123_v35 = vld [vmem:[%s10346_s1 + $0x3c4] ss:$16 sps:$4 sm:$0xff]  }
 0x12e   : > { %3306 = vmatmul.mubr.bf16.gmra.mrb[76].mxu0 %v7059_v3 }
 0x12f   : > { %3315 = vmatprep.mubr.bf16.mxu0 %v7063_v4  ;;  %v7210_v4 = vld [vmem:[%s10346_s1 + $0x58c] ss:$16 sps:$4 sm:$0xff]  }
 0x131   : > { %4139 = vmatmul.mubr.bf16.gmra.mrb[80].mxu1 %v7158_v9 }
 0x132   : > { %6206 = vmatprep.mubr.msk.bf16.mxu1 %vm2890_vm0, %v7162_v10  ;;  %v7216_v10 = vld [vmem:[%s10346_s1 + $0x5ac] ss:$16 sps:$4 sm:$0xff]  }
 0x136   : > { %3316 = vmatmul.mubr.bf16.gmra.mrb[80].mxu0 %v7065_v41  ;;  %v975_v41 = vld [vmem:[%s10347_s2 + $0x228] sm:$0xff] }
 0x137   : > { %3325 = vmatprep.mubr.bf16.mxu0 %v7069_v46  ;;  %1381 = vperm.xlu1 %6987, %v975_v41   ;;  %v7240_v41 = vld [vmem:[%s10346_s1 + $0x62c] ss:$16 sps:$4 sm:$0xff]  }
 0x139   : > { %4149 = vmatmul.mubr.bf16.gmra.mrb[84].mxu1 %v7164_v13  ;;  %v977_v13 = vld [vmem:[%s10347_s2 + $0x238] sm:$0xff] }
 0x13a   : > { %6207 = vmatprep.mubr.msk.bf16.mxu1 %vm2890_vm0, %v7168_v14  ;;  %v8497_v14 = vpop.permute.xlu0 %1036 }
 0x13b   : > { %1391 = vperm.xlu1 %6987, %v977_v13   ;;  %10384 = vst [vmem:[#allocation3_spill] sm:$0xff] %v8497_v14  ;;  %v985_v13 = vld [vmem:[%s10347_s2 + $0x278] sm:$0xff] }
 0x13e   : > { %3326 = vmatmul.mubr.bf16.gmra.mrb[84].mxu0 %v7071_v11 }
 0x13f   : > { %3335 = vmatprep.mubr.bf16.mxu0 %v7075_v0  ;;  %v976_v0 = vld [vmem:[%s10347_s2 + $0x230] sm:$0xff] }
 0x140   : > { %1386 = vperm.xlu0 %6986, %v976_v0   ;;  %v7149_v0 = vld [vmem:[%s10346_s1 + $0x440] ss:$16 sps:$4 sm:$0xff]  }
 0x141   : > { %4159 = vmatmul.mubr.bf16.gmra.mrb[88].mxu1 %v7170_v19 }
 0x142   : > { %6208 = vmatprep.mubr.msk.bf16.mxu1 %vm2890_vm0, %v7174_v20  ;;  %v7222_v20 = vld [vmem:[%s10346_s1 + $0x5cc] ss:$16 sps:$4 sm:$0xff]  }
 0x146   : > { %3336 = vmatmul.mubr.bf16.gmra.mrb[88].mxu0 %v7077_v15  ;;  %v8499_v15 = vpop.permute.xlu1 %1046 }
 0x147   : > { %3345 = vmatprep.mubr.bf16.mxu0 %v7081_v16  ;;  %10385 = vst [vmem:[#allocation4_spill] sm:$0xff] %v8499_v15  ;;  %v7282_v15 = vld [vmem:[%s10346_s1 + $0x70c] ss:$16 sps:$4 sm:$0xff]  }
 0x149   : > { %4169 = vmatmul.mubr.bf16.gmra.mrb[92].mxu1 %v7176_v25  ;;  %v8524_v25 = vpop.permute.xlu0 %1041 }
 0x14a   : > { %6209 = vmatprep.mubr.msk.bf16.mxu1 %vm2890_vm0, %v7180_v26  ;;  %10386 = vst [vmem:[#allocation5_spill] sm:$0xff] %v8524_v25  ;;  %v979_v26 = vld [vmem:[%s10347_s2 + $0x248] sm:$0xff]  ;;  %v7195_v25 = vld [vmem:[%s10346_s1 + $0x544] ss:$16 sps:$4 sm:$0xff]  }
 0x14b   : > { %1401 = vperm.xlu1 %6987, %v979_v26   ;;  %v7246_v26 = vld [vmem:[%s10346_s1 + $0x64c] ss:$16 sps:$4 sm:$0xff]  }
 0x14e   : > { %3346 = vmatmul.mubr.bf16.gmra.mrb[92].mxu0 %v7083_v21 }
 0x14f   : > { %3355 = vmatprep.mubr.bf16.mxu0 %v7087_v22  ;;  %v978_v22 = vld [vmem:[%s10347_s2 + $0x240] sm:$0xff] }
 0x150   : > { %1396 = vperm.xlu0 %6986, %v978_v22  }
 0x151   : > { %4179 = vmatmul.mubr.bf16.gmra.mrb[96].mxu1 %v7182_v31 }
 0x152   : > { %6210 = vmatprep.mubr.msk.bf16.mxu1 %vm2890_vm0, %v7186_v32  ;;  %v7228_v32 = vld [vmem:[%s10346_s1 + $0x5ec] ss:$16 sps:$4 sm:$0xff]  }
 0x156   : > { %3356 = vmatmul.mubr.bf16.gmra.mrb[96].mxu0 %v7089_v27  ;;  %v8529_v27 = vpop.permute.xlu1 %1051 }
 0x157   : > { %3365 = vmatprep.mubr.bf16.mxu0 %v7093_v28  ;;  %10387 = vst [vmem:[#allocation6_spill] sm:$0xff] %v8529_v27 }
 0x159   : > { %4189 = vmatmul.mubr.bf16.gmra.mrb[100].mxu1 %v7188_v36  ;;  %v980_v36 = vld [vmem:[%s10347_s2 + $0x250] sm:$0xff] }
 0x15a   : > { %6211 = vmatprep.mubr.msk.bf16.mxu1 %vm2890_vm0, %v7192_v37  ;;  %v7137_v37 = vld [vmem:[%s10346_s1 + $0x400] ss:$16 sps:$4 sm:$0xff]   ;;  %v8554_v38 = vpop.permute.xlu1 %1061  ;;  %1406 = vperm.xlu0 %6986, %v980_v36  }
 0x15b   : > { %v8416_v50 = vpop.f32.mrb[0].mxu1  ;;  %10389 = vst [vmem:[#allocation8_spill] sm:$0xff] %v8554_v38  ;;  %v986_v36 = vld [vmem:[%s10347_s2 + $0x280] sm:$0xff]  ;;  %v997_v38 = vld [vmem:[%s10347_s2 + $0x2d8] sm:$0xff] }
 0x15c   : > { %v8418_v51 = vpop.f32.mrb[1].mxu1 }
 0x15d   : > { %v8423_v55 = vpop.f32.mrb[2].mxu1 }
 0x15e   : > { %3366 = vmatmul.mubr.bf16.gmra.mrb[100].mxu0 %v7095_v33  ;;  %v8428_v57 = vpop.f32.mrb[3].mxu1  ;;  %v8544_v33 = vpop.permute.xlu0 %1056 }
 0x15f   : > { %3375 = vmatprep.mubr.bf16.mxu0 %v7099_v34  ;;  %10388 = vst [vmem:[#allocation7_spill] sm:$0xff] %v8544_v33 }
 0x161   : > { %4199 = vmatmul.mubr.bf16.gmra.mrb[104].mxu1 %v7194_v43 }
 0x162   : > { %6212 = vmatprep.mubr.msk.bf16.mxu1 %vm2890_vm0, %v7198_v44  ;;  %v8565_v43 = vpop.permute.xlu0 %1066 }
 0x163   : > { %10390 = vst [vmem:[#allocation9_spill] sm:$0xff] %v8565_v43 }
 0x166   : > { %3376 = vmatmul.mubr.bf16.gmra.mrb[104].mxu0 %v7101_v39  ;;  %v7141_v39 = vld [vmem:[%s10346_s1 + $0x424] ss:$16 sps:$4 sm:$0xff]   ;;  %v8594_v61 = vpop.permute.xlu0 %1076 }
 0x167   : > { %3385 = vmatprep.mubr.bf16.mxu0 %v7105_v40  ;;  %v981_v40 = vld [vmem:[%s10347_s2 + $0x258] sm:$0xff]  ;;  %10392 = vst [vmem:[#allocation11_spill] sm:$0xff] %v8594_v61 }
 0x168   : > { %1411 = vperm.xlu1 %6987, %v981_v40   ;;  %v7159_v40 = vld [vmem:[%s10346_s1 + $0x484] ss:$16 sps:$4 sm:$0xff]  }
 0x169   : > { %4209 = vmatmul.mubr.bf16.gmra.mrb[108].mxu1 %v7200_v53 }
 0x16a   : > { %6213 = vmatprep.mubr.msk.bf16.mxu1 %vm2890_vm0, %v7204_v56  ;;  %v982_v56 = vld [vmem:[%s10347_s2 + $0x260] sm:$0xff] }
 0x16b   : > { %v8443_v62 = vpop.f32.mrb[4].mxu1  ;;  %1416 = vperm.xlu0 %6986, %v982_v56  }
 0x16c   : > { %v8445_v63 = vpop.f32.mrb[5].mxu1 }
 0x16d   : > { %v8450_v3 = vpop.f32.mrb[6].mxu1 }
 0x16e   : > { %3386 = vmatmul.mubr.bf16.gmra.mrb[108].mxu0 %v7107_v47  ;;  %v8455_v5 = vpop.f32.mrb[7].mxu1  ;;  %v8572_v47 = vpop.permute.xlu1 %1071 }
 0x16f   : > { %3395 = vmatprep.mubr.bf16.mxu0 %v7111_v48  ;;  %10391 = vst [vmem:[#allocation10_spill] sm:$0xff] %v8572_v47 }
 0x171   : > { %4219 = vmatmul.mubr.bf16.gmra.mrb[112].mxu1 %v7206_v1 }
 0x172   : > { %6214 = vmatprep.mubr.msk.bf16.mxu1 %vm2890_vm0, %v7210_v4  ;;  %v8596_v1 = vpop.permute.xlu1 %1081 }
 0x173   : > { %10393 = vst [vmem:[#allocation12_spill] sm:$0xff] %v8596_v1 }
 0x174   : > { %v8470_v46 = vpop.f32.mrb[8].mxu1 }
 0x175   : > { %v8472_v52 = vpop.f32.mrb[9].mxu1 }
 0x176   : > { %3396 = vmatmul.mubr.bf16.gmra.mrb[112].mxu0 %v7113_v59  ;;  %v8477_v9 = vpop.f32.mrb[10].mxu1  ;;  %v7147_v59 = vld [vmem:[%s10346_s1 + $0x444] ss:$16 sps:$4 sm:$0xff]  }
 0x177   : > { %3405 = vmatprep.mubr.bf16.mxu0 %v7117_v60  ;;  %v8482_v11 = vpop.f32.mrb[11].mxu1  ;;  %v983_v60 = vld [vmem:[%s10347_s2 + $0x268] sm:$0xff] }
 0x178   : > { %1421 = vperm.xlu1 %6987, %v983_v60  }
 0x179   : > { %4229 = vmatmul.mubr.bf16.gmra.mrb[116].mxu1 %v7212_v54 }
 0x17a   : > { %6215 = vmatprep.mubr.msk.bf16.mxu1 %vm2890_vm0, %v7216_v10  ;;  %v984_v10 = vld [vmem:[%s10347_s2 + $0x270] sm:$0xff] }
 0x17b   : > { %1426 = vperm.xlu0 %6986, %v984_v10  }
 0x17c   : > { %v8501_v16 = vpop.f32.mrb[12].mxu1  ;;  %1431 = vperm.xlu1 %6987, %v985_v13   ;;  %v7165_v13 = vld [vmem:[%s10346_s1 + $0x4a4] ss:$16 sps:$4 sm:$0xff]  }
 0x17d   : > { %v8503_v17 = vpop.f32.mrb[13].mxu1 }
 0x17e   : > { %3406 = vmatmul.mubr.bf16.gmra.mrb[116].mxu0 %v7119_v7  ;;  %v8508_v19 = vpop.f32.mrb[14].mxu1  ;;  %v7236_v7 = vld [vmem:[%s10346_s1 + $0x608] ss:$16 sps:$4 sm:$0xff]  }
 0x17f   : > { %3415 = vmatprep.mubr.bf16.mxu0 %v7123_v35  ;;  %v8513_v21 = vpop.f32.mrb[15].mxu1  ;;  %1436 = vperm.xlu0 %6986, %v986_v36  }
 0x181   : > { %4239 = vmatmul.mubr.bf16.gmra.mrb[120].mxu1 %v7218_v18  ;;  %v8626_v18 = vpop.permute.xlu1 %1091 }
 0x182   : > { %6216 = vmatprep.mubr.msk.bf16.mxu1 %vm2890_vm0, %v7222_v20  ;;  %10395 = vst [vmem:[#allocation14_spill] sm:$0xff] %v8626_v18 }
 0x184   : > { %v8532_v28 = vpop.f32.mrb[16].mxu1 }
 0x185   : > { %v8534_v29 = vpop.f32.mrb[17].mxu1 }
 0x186   : > { %3416 = vmatmul.mubr.bf16.gmra.mrb[120].mxu0 %v7125_v2  ;;  %v8539_v31 = vpop.f32.mrb[18].mxu1  ;;  %v7153_v2 = vld [vmem:[%s10346_s1 + $0x464] ss:$16 sps:$4 sm:$0xff]  }
 0x187   : > { %3425 = vmatprep.mubr.bf16.mxu0 %v7129_v12  ;;  %v8546_v34 = vpop.f32.mrb[19].mxu1  ;;  %v8621_v12 = vpop.permute.xlu0 %1086 }
 0x188   : > { %10394 = vst [vmem:[#allocation13_spill] sm:$0xff] %v8621_v12 }
 0x189   : > { %4249 = vmatmul.mubr.bf16.gmra.mrb[124].mxu1 %v7224_v30 }
 0x18a   : > { %6217 = vmatprep.mubr.msk.bf16.mxu1 %vm2890_vm0, %v7228_v32 }
 0x18b   : > { %v8641_v30 = vpop.permute.xlu0 %1096 }
 0x18c   : > { %v8563_v42 = vpop.f32.mrb[20].mxu1  ;;  %10396 = vst [vmem:[#allocation15_spill] sm:$0xff] %v8641_v30 }
 0x18d   : > { %v8567_v44 = vpop.f32.mrb[21].mxu1 }
 0x18e   : > { %3426 = vmatmul.mubr.bf16.gmra.mrb[124].mxu0 %v7131_v23  ;;  %v8574_v48 = vpop.f32.mrb[22].mxu1  ;;  %v7242_v23 = vld [vmem:[%s10346_s1 + $0x628] ss:$16 sps:$4 sm:$0xff]  }
 0x18f   : > { %3435 = vmatprep.mubr.bf16.mxu0 %v7135_v24  ;;  %v8579_v53 = vpop.f32.mrb[23].mxu1  ;;  %v8662_v56 = vpop.permute.xlu0 %1106 }
 0x190   : > { %10398 = vst [vmem:[#allocation17_spill] sm:$0xff] %v8662_v56  ;;  %v7264_v56 = vld [vmem:[%s10346_s1 + $0x6ac] ss:$16 sps:$4 sm:$0xff]  }
 0x191   : > { %4259 = vmatmul.mubr.bf16.gmra.mrb[128].mxu1 %v7230_v45  ;;  %v987_v45 = vld [vmem:[%s10347_s2 + $0x288] sm:$0xff] }
 0x192   : > { %6218 = vmatprep.mubr.msk.bf16.mxu1 %vm2890_vm0, %v7234_v49  ;;  %1441 = vperm.xlu1 %6987, %v987_v45   ;;  %v7254_v45 = vld [vmem:[%s10346_s1 + $0x668] ss:$16 sps:$4 sm:$0xff]  }
 0x194   : > { %v8598_v4 = vpop.f32.mrb[24].mxu1 }
 0x195   : > { %v8600_v6 = vpop.f32.mrb[25].mxu1 }
 0x196   : > { %3436 = vmatmul.mubr.bf16.gmra.mrb[128].mxu0 %v7137_v37  ;;  %v8605_v35 = vpop.f32.mrb[26].mxu1  ;;  %v7155_v37 = vld [vmem:[%s10346_s1 + $0x460] ss:$16 sps:$4 sm:$0xff]  }
 0x197   : > { %3445 = vmatprep.mubr.bf16.mxu0 %v7141_v39  ;;  %v8610_v54 = vpop.f32.mrb[27].mxu1  ;;  %v8651_v39 = vpop.permute.xlu1 %1101 }
 0x198   : > { %10397 = vst [vmem:[#allocation16_spill] sm:$0xff] %v8651_v39  ;;  %v7177_v39 = vld [vmem:[%s10346_s1 + $0x4e4] ss:$16 sps:$4 sm:$0xff]  }
 0x199   : > { %4269 = vmatmul.mubr.bf16.gmra.mrb[132].mxu1 %v7236_v7 }
 0x19a   : > { %6219 = vmatprep.mubr.msk.bf16.mxu1 %vm2890_vm0, %v7240_v41  ;;  %v7252_v41 = vld [vmem:[%s10346_s1 + $0x66c] ss:$16 sps:$4 sm:$0xff]  }
 0x19b   : > { %v8669_v60 = vpop.permute.xlu1 %1111 }
 0x19c   : > { %v8629_v20 = vpop.f32.mrb[28].mxu1  ;;  %10399 = vst [vmem:[#allocation18_spill] sm:$0xff] %v8669_v60 }
 0x19d   : > { %v8631_v22 = vpop.f32.mrb[29].mxu1 }
 0x19e   : > { %3446 = vmatmul.mubr.bf16.gmra.mrb[132].mxu0 %v7143_v58  ;;  %v8636_v24 = vpop.f32.mrb[30].mxu1 }
 0x19f   : > { %3455 = vmatprep.mubr.bf16.mxu0 %v7147_v59  ;;  %v8643_v32 = vpop.f32.mrb[31].mxu1  ;;  %v7248_v59 = vld [vmem:[%s10346_s1 + $0x648] ss:$16 sps:$4 sm:$0xff]   ;;  %v8693_v36 = vpop.permute.xlu1 %1121 }
 0x1a0   : > { %10401 = vst [vmem:[#allocation20_spill] sm:$0xff] %v8693_v36  ;;  %v991_v36 = vld [vmem:[%s10347_s2 + $0x2a8] sm:$0xff] }
 0x1a1   : > { %4279 = vmatmul.mubr.bf16.gmra.mrb[136].mxu1 %v7242_v23  ;;  %v989_v23 = vld [vmem:[%s10347_s2 + $0x298] sm:$0xff] }
 0x1a2   : > { %6220 = vmatprep.mubr.msk.bf16.mxu1 %vm2890_vm0, %v7246_v26  ;;  %1451 = vperm.xlu1 %6987, %v989_v23   ;;  %v8691_v26 = vpop.permute.xlu0 %1116  ;;  %v7171_v23 = vld [vmem:[%s10346_s1 + $0x4c4] ss:$16 sps:$4 sm:$0xff]  }
 0x1a3   : > { %10400 = vst [vmem:[#allocation19_spill] sm:$0xff] %v8691_v26  ;;  %v8723_v26 = vpop.permute.xlu1 %1131 }
 0x1a4   : > { %v8660_v49 = vpop.f32.mrb[32].mxu1  ;;  %10403 = vst [vmem:[#allocation22_spill] sm:$0xff] %v8723_v26 }
 0x1a5   : > { %v8664_v58 = vpop.f32.mrb[33].mxu1 }
 0x1a6   : > { %3456 = vmatmul.mubr.bf16.gmra.mrb[136].mxu0 %v7149_v0  ;;  %v8671_v7 = vpop.f32.mrb[34].mxu1  ;;  %v988_v0 = vld [vmem:[%s10347_s2 + $0x290] sm:$0xff]  ;;  %v8718_v8 = vpop.permute.xlu0 %1126  ;;  %1461 = vperm.xlu1 %6987, %v991_v36  }
 0x1a7   : > { %3465 = vmatprep.mubr.bf16.mxu0 %v7153_v2  ;;  %v8676_v10 = vpop.f32.mrb[35].mxu1  ;;  %v7161_v2 = vld [vmem:[%s10346_s1 + $0x480] ss:$16 sps:$4 sm:$0xff]   ;;  %1446 = vperm.xlu0 %6986, %v988_v0   ;;  %10402 = vst [vmem:[#allocation21_spill] sm:$0xff] %v8718_v8  ;;  %v7260_v8 = vld [vmem:[%s10346_s1 + $0x688] ss:$16 sps:$4 sm:$0xff]  }
 0x1a8   : > { %v992_v36 = vld [vmem:[%s10347_s2 + $0x2b0] sm:$0xff] }
 0x1a9   : > { %4289 = vmatmul.mubr.bf16.gmra.mrb[140].mxu1 %v7248_v59 }
 0x1aa   : > { %6221 = vmatprep.mubr.msk.bf16.mxu1 %vm2890_vm0, %v7252_v41  ;;  %v7258_v41 = vld [vmem:[%s10346_s1 + $0x68c] ss:$16 sps:$4 sm:$0xff]   ;;  %v8738_v26 = vpop.permute.xlu0 %1136 }
 0x1ab   : > { %10404 = vst [vmem:[#allocation23_spill] sm:$0xff] %v8738_v26  ;;  %v993_v26 = vld [vmem:[%s10347_s2 + $0x2b8] sm:$0xff] }
 0x1ac   : > { %1471 = vperm.xlu1 %6987, %v993_v26  }
 0x1ae   : > { %3466 = vmatmul.mubr.bf16.gmra.mrb[140].mxu0 %v7155_v37  ;;  %v8695_v37 = vpop.f32.mrb[36].mxu1  ;;  %v8759_v18 = vpop.permute.xlu0 %1146 }
 0x1af   : > { %3475 = vmatprep.mubr.bf16.mxu0 %v7159_v40  ;;  %v8697_v40 = vpop.f32.mrb[37].mxu1  ;;  %10406 = vst [vmem:[#allocation25_spill] sm:$0xff] %v8759_v18  ;;  %v995_v18 = vld [vmem:[%s10347_s2 + $0x2c8] sm:$0xff] }
 0x1b0   : > { %v8702_v59 = vpop.f32.mrb[38].mxu1  ;;  %1481 = vperm.xlu1 %6987, %v995_v18   ;;  %v7276_v18 = vld [vmem:[%s10346_s1 + $0x6ec] ss:$16 sps:$4 sm:$0xff]  }
 0x1b1   : > { %v8707_v0 = vpop.f32.mrb[39].mxu1  ;;  %4299 = vmatmul.mubr.bf16.gmra.mrb[144].mxu1 %v7254_v45 }
 0x1b2   : > { %6222 = vmatprep.mubr.msk.bf16.mxu1 %vm2890_vm0, %v7258_v41  ;;  %v8788_v1 = vpop.permute.xlu0 %1156 }
 0x1b3   : > { %10410 = vst [vmem:[#allocation29_spill] sm:$0xff] %v8788_v1  ;;  %v7189_v1 = vld [vmem:[%s10346_s1 + $0x524] ss:$16 sps:$4 sm:$0xff]  }
 0x1b4   : > { %v8726_v60 = vpop.f32.mrb[40].mxu1  ;;  %1491 = vperm.xlu1 %6987, %v997_v38   ;;  %v998_v38 = vld [vmem:[%s10347_s2 + $0x2e0] sm:$0xff] }
 0x1b6   : > { %3476 = vmatmul.mubr.bf16.gmra.mrb[144].mxu0 %v7161_v2  ;;  %v990_v2 = vld [vmem:[%s10347_s2 + $0x2a0] sm:$0xff] }
 0x1b7   : > { %3485 = vmatprep.mubr.bf16.mxu0 %v7165_v13  ;;  %v7167_v13 = vld [vmem:[%s10346_s1 + $0x4a0] ss:$16 sps:$4 sm:$0xff]   ;;  %1456 = vperm.xlu0 %6986, %v990_v2   ;;  %v8728_v2 = vpop.f32.mrb[41].mxu1 }
 0x1b8   : > { %v8733_v45 = vpop.f32.mrb[42].mxu1 }
 0x1b9   : > { %v8740_v41 = vpop.f32.mrb[43].mxu1  ;;  %4309 = vmatmul.mubr.bf16.gmra.mrb[148].mxu1 %v7260_v8 }
 0x1ba   : > { %6223 = vmatprep.mubr.msk.bf16.mxu1 %vm2890_vm0, %v7264_v56  ;;  %v7270_v56 = vld [vmem:[%s10346_s1 + $0x6cc] ss:$16 sps:$4 sm:$0xff]  }
 0x1bb   : > { %1466 = vperm.xlu0 %6986, %v992_v36   ;;  %v7266_v36 = vld [vmem:[%s10346_s1 + $0x6a8] ss:$16 sps:$4 sm:$0xff]  }
 0x1bc   : > { %v8757_v30 = vpop.f32.mrb[44].mxu1 }
 0x1be   : > { %3486 = vmatmul.mubr.bf16.gmra.mrb[148].mxu0 %v7167_v13  ;;  %v7173_v13 = vld [vmem:[%s10346_s1 + $0x4c0] ss:$16 sps:$4 sm:$0xff]  }
 0x1bf   : > { %3495 = vmatprep.mubr.bf16.mxu0 %v7171_v23  ;;  %v8748_v23 = vpop.permute.xlu1 %1141 }
 0x1c0   : > { %10405 = vst [vmem:[#allocation24_spill] sm:$0xff] %v8748_v23  ;;  %v8761_v23 = vpop.f32.mrb[45].mxu1 }
 0x1c1   : > { %v8768_v12 = vpop.f32.mrb[46].mxu1  ;;  %4319 = vmatmul.mubr.bf16.gmra.mrb[152].mxu1 %v7266_v36  ;;  %v7272_v36 = vld [vmem:[%s10346_s1 + $0x6c8] ss:$16 sps:$4 sm:$0xff]  }
 0x1c2   : > { %10408 = vst [vmem:[#allocation27_spill] sm:$0xff] %v8768_v12  ;;  %v8773_v26 = vpop.f32.mrb[47].mxu1  ;;  %6224 = vmatprep.mubr.msk.bf16.mxu1 %vm2890_vm0, %v7270_v56 }
 0x1c3   : > { %v8766_v8 = vpop.permute.xlu1 %1151  ;;  %10409 = vst [vmem:[#allocation28_spill] sm:$0xff] %v8773_v26 }
 0x1c4   : > { %10407 = vst [vmem:[#allocation26_spill] sm:$0xff] %v8766_v8  ;;  %v7183_v8 = vld [vmem:[%s10346_s1 + $0x504] ss:$16 sps:$4 sm:$0xff]   ;;  %v8792_v47 = vpop.f32.mrb[48].mxu1 }
 0x1c5   : > { %10412 = vst [vmem:[#allocation31_spill] sm:$0xff] %v8792_v47 }
 0x1c6   : > { %3496 = vmatmul.mubr.bf16.gmra.mrb[152].mxu0 %v7173_v13  ;;  %v7179_v13 = vld [vmem:[%s10346_s1 + $0x4e0] ss:$16 sps:$4 sm:$0xff]  }
 0x1c7   : > { %3505 = vmatprep.mubr.bf16.mxu0 %v7177_v39  ;;  %v994_v39 = vld [vmem:[%s10347_s2 + $0x2c0] sm:$0xff]  ;;  %v8790_v61 = vpop.permute.xlu1 %1161 }
 0x1c8   : > { %1476 = vperm.xlu0 %6986, %v994_v39   ;;  %10411 = vst [vmem:[#allocation30_spill] sm:$0xff] %v8790_v61  ;;  %v8794_v39 = vpop.f32.mrb[49].mxu1  ;;  %v8812_v61 = vpop.permute.xlu0 %1166 }
 0x1c9   : > { %10413 = vst [vmem:[#allocation32_spill] sm:$0xff] %v8794_v39  ;;  %v8799_v43 = vpop.f32.mrb[50].mxu1  ;;  %10416 = vst [vmem:[#allocation35_spill] sm:$0xff] %v8812_v61  ;;  %4329 = vmatmul.mubr.bf16.gmra.mrb[156].mxu1 %v7272_v36  ;;  %v7278_v61 = vld [vmem:[%s10346_s1 + $0x6e8] ss:$16 sps:$4 sm:$0xff]  }
 0x1ca   : > { %10414 = vst [vmem:[#allocation33_spill] sm:$0xff] %v8799_v43  ;;  %v8804_v56 = vpop.f32.mrb[51].mxu1  ;;  %6225 = vmatprep.mubr.msk.bf16.mxu1 %vm2890_vm0, %v7276_v18 }
 0x1cb   : > { %10415 = vst [vmem:[#allocation34_spill] sm:$0xff] %v8804_v56  ;;  %v8820_v33 = vpop.permute.xlu1 %1171  ;;  %v7201_v56 = vld [vmem:[%s10346_s1 + $0x564] ss:$16 sps:$4 sm:$0xff]  }
 0x1cc   : > { %10417 = vst [vmem:[#allocation36_spill] sm:$0xff] %v8820_v33  ;;  %v8823_v27 = vpop.f32.mrb[52].mxu1  ;;  %v8835_v33 = vpop.permute.xlu0 %1176 }
 0x1cd   : > { %10418 = vst [vmem:[#allocation37_spill] sm:$0xff] %v8823_v27  ;;  %10421 = vst [vmem:[#allocation40_spill] sm:$0xff] %v8835_v33  ;;  %v999_v33 = vld [vmem:[%s10347_s2 + $0x2e8] sm:$0xff] }
 0x1ce   : > { %3506 = vmatmul.mubr.bf16.gmra.mrb[156].mxu0 %v7179_v13  ;;  %v996_v13 = vld [vmem:[%s10347_s2 + $0x2d0] sm:$0xff]  ;;  %1501 = vperm.xlu1 %6987, %v999_v33  }
 0x1cf   : > { %3515 = vmatprep.mubr.bf16.mxu0 %v7183_v8  ;;  %v7185_v8 = vld [vmem:[%s10346_s1 + $0x500] ss:$16 sps:$4 sm:$0xff]   ;;  %1486 = vperm.xlu0 %6986, %v996_v13   ;;  %v8825_v13 = vpop.f32.mrb[53].mxu1 }
 0x1d0   : > { %10419 = vst [vmem:[#allocation38_spill] sm:$0xff] %v8825_v13  ;;  %v8830_v36 = vpop.f32.mrb[54].mxu1  ;;  %v7288_v13 = vld [vmem:[%s10346_s1 + $0x72c] ss:$16 sps:$4 sm:$0xff]  }
 0x1d1   : > { %10420 = vst [vmem:[#allocation39_spill] sm:$0xff] %v8830_v36  ;;  %v8837_v18 = vpop.f32.mrb[55].mxu1  ;;  %4339 = vmatmul.mubr.bf16.gmra.mrb[160].mxu1 %v7278_v61 }
 0x1d2   : > { %10422 = vst [vmem:[#allocation41_spill] sm:$0xff] %v8837_v18  ;;  %6226 = vmatprep.mubr.msk.bf16.mxu1 %vm2890_vm0, %v7282_v15  ;;  %v1187_v18 = vpop.permute.xlu0 %1186 }
 0x1d3   : > { %1496 = vperm.xlu0 %6986, %v998_v38   ;;  %v7284_v38 = vld [vmem:[%s10346_s1 + $0x708] ss:$16 sps:$4 sm:$0xff]  }
 0x1d4   : > { %v8854_v14 = vpop.f32.mrb[56].mxu1 }
 0x1d5   : > { %10424 = vst [vmem:[#allocation43_spill] sm:$0xff] %v8854_v14  ;;  %v8856_v36 = vpop.f32.mrb[57].mxu1  ;;  %v7197_v14 = vld [vmem:[%s10346_s1 + $0x540] ss:$16 sps:$4 sm:$0xff]  }
 0x1d6   : > { %3516 = vmatmul.mubr.bf16.gmra.mrb[160].mxu0 %v7185_v8  ;;  %v8845_v8 = vpop.permute.xlu1 %1181  ;;  %10425 = vst [vmem:[#allocation44_spill] sm:$0xff] %v8856_v36  ;;  %v8861_v61 = vpop.f32.mrb[58].mxu1 }
 0x1d7   : > { %3525 = vmatprep.mubr.bf16.mxu0 %v7189_v1  ;;  %v7191_v1 = vld [vmem:[%s10346_s1 + $0x520] ss:$16 sps:$4 sm:$0xff]   ;;  %10423 = vst [vmem:[#allocation42_spill] sm:$0xff] %v8845_v8  ;;  %10426 = vst [vmem:[#allocation45_spill] sm:$0xff] %v8861_v61  ;;  %v8866_v33 = vpop.f32.mrb[59].mxu1  ;;  %v1197_v26 = vpop.permute.xlu0 %1196 }
 0x1d8   : > { %10427 = vst [vmem:[#allocation46_spill] sm:$0xff] %v8866_v33  ;;  %v1001_v33 = vld [vmem:[%s10347_s2 + $0x2f8] sm:$0xff] }
 0x1d9   : > { %4349 = vmatmul.mubr.bf16.gmra.mrb[164].mxu1 %v7284_v38  ;;  %1511 = vperm.xlu1 %6987, %v1001_v33  }
 0x1da   : > { %v1192_v8 = vpop.permute.xlu1 %1191  ;;  %6227 = vmatprep.mubr.msk.bf16.mxu1 %vm2890_vm0, %v7288_v13 }
 0x1de   : > { %3526 = vmatmul.mubr.bf16.gmra.mrb[164].mxu0 %v7191_v1 }
 0x1df   : > { %3535 = vmatprep.mubr.bf16.mxu0 %v7195_v25  ;;  %v1000_v25 = vld [vmem:[%s10347_s2 + $0x2f0] sm:$0xff] }
 0x1e0   : > { %1506 = vperm.xlu0 %6986, %v1000_v25   ;;  %v8884_v25 = vpop.f32.mrb[60].mxu1 }
 0x1e1   : > { %v3267_v15 = vpop.f32.mrb[60].mxu0  ;;  %v8887_v12 = vpop.f32.mrb[61].mxu1 }
 0x1e2   : > { %v3268_v1 = vadd.f32 %v3267_v15, %v1187_v18  ;;  %v3269_v36 = vpop.f32.mrb[61].mxu0 }
 0x1e3   : > { %v3270_v27 = vadd.f32 %v3269_v36, %v1187_v18  ;;  %v3271_v61 = vpop.f32.mrb[62].mxu0 }
 0x1e4   : > { %v3272_v43 = vadd.f32 %v3271_v61, %v1192_v8  ;;  %v3941_v15 = vadd.f32 %v8416_v50, %v3268_v1  ;;  %v3273_v39 = vpop.f32.mrb[63].mxu0  ;;  %v7290_v50 = vld [vmem:[%s10346_s1 + $0x728] ss:$16 sps:$4 sm:$0xff]   ;;  %v7203_v1 = vld [vmem:[%s10346_s1 + $0x560] ss:$16 sps:$4 sm:$0xff]  }
 0x1e5   : > { %v3274_v47 = vadd.f32 %v3273_v39, %v1192_v8  ;;  %v3943_v36 = vadd.f32 %v8418_v51, %v3270_v27  ;;  %v1202_v39 = vpop.permute.xlu1 %1201  ;;  %v8892_v8 = vpop.f32.mrb[62].mxu1  ;;  %v7294_v51 = vld [vmem:[%s10346_s1 + $0x74c] ss:$16 sps:$4 sm:$0xff]   ;;  %4359 = vmatmul.mubr.bf16.gmra.mrb[168].mxu1 %v7290_v50 }
 0x1e6   : > { %v3945_v18 = vadd.f32 %v8423_v55, %v3272_v43  ;;  %3536 = vmatmul.mubr.bf16.gmra.mrb[168].mxu0 %v7197_v14  ;;  %v4489_v13 = vmax.f32 %v3941_v15, 0.0  ;;  %v8897_v27 = vpop.f32.mrb[63].mxu1  ;;  %v1002_v43 = vld [vmem:[%s10347_s2 + $0x300] sm:$0xff]  ;;  %6228 = vmatprep.mubr.msk.bf16.mxu1 %vm2890_vm0, %v7294_v51 }
 0x1e7   : > { %v3947_v38 = vadd.f32 %v8428_v57, %v3274_v47  ;;  %3545 = vmatprep.mubr.bf16.mxu0 %v7201_v56  ;;  %v4490_v55 = vmax.f32 %v3943_v36, 0.0  ;;  %1516 = vperm.xlu0 %6986, %v1002_v43   ;;  %v8919_v43 = vpop.f32.mrb[64].mxu1 }
 0x1e8   : > { %v4491_v61 = vmax.f32 %v3945_v18, 0.0 }
 0x1e9   : > { %v4492_v14 = vmax.f32 %v3947_v38, 0.0  ;;  %v3277_v57 = vpop.f32.mrb[64].mxu0  ;;  %v7207_v38 = vld [vmem:[%s10346_s1 + $0x584] ss:$16 sps:$4 sm:$0xff]  }
 0x1ea   : > { %v8902_v47 = vpack.c.bf16 %v4491_v61, %v4489_v13  ;;  %v3278_v56 = vadd.f32 %v3277_v57, %v1197_v26  ;;  %v3279_v33 = vpop.f32.mrb[65].mxu0  ;;  %v1003_v13 = vld [vmem:[%s10347_s2 + $0x308] sm:$0xff] }
 0x1eb   : > { %v8907_v15 = vpack.c.bf16 %v4492_v14, %v4490_v55  ;;  %v3280_v36 = vadd.f32 %v3279_v33, %v1197_v26  ;;  %v3281_v18 = vpop.f32.mrb[66].mxu0  ;;  %1521 = vperm.xlu1 %6987, %v1003_v13   ;;  %v1207_v33 = vpop.permute.xlu0 %1206 }
 0x1ec   : > { %10428 = vst [vmem:[#allocation47_spill] sm:$0xff] %v8902_v47  ;;  %v3282_v61 = vadd.f32 %v3281_v18, %v1202_v39  ;;  %v3951_v57 = vadd.f32 %v8443_v62, %v3278_v56  ;;  %v3283_v47 = vpop.f32.mrb[67].mxu0  ;;  %v7296_v62 = vld [vmem:[%s10346_s1 + $0x748] ss:$16 sps:$4 sm:$0xff]   ;;  %v1004_v18 = vld [vmem:[%s10347_s2 + $0x310] sm:$0xff] }
 0x1ed   : > { %10429 = vst [vmem:[#allocation48_spill] sm:$0xff] %v8907_v15  ;;  %v3284_v55 = vadd.f32 %v3283_v47, %v1202_v39  ;;  %v3953_v26 = vadd.f32 %v8445_v63, %v3280_v36  ;;  %v8922_v15 = vpop.f32.mrb[65].mxu1  ;;  %v1212_v39 = vpop.permute.xlu1 %1211  ;;  %v7300_v63 = vld [vmem:[%s10346_s1 + $0x76c] ss:$16 sps:$4 sm:$0xff]   ;;  %1526 = vperm.xlu0 %6986, %v1004_v18   ;;  %4369 = vmatmul.mubr.bf16.gmra.mrb[172].mxu1 %v7296_v62 }
 0x1ee   : > { %v3955_v14 = vadd.f32 %v8450_v3, %v3282_v61  ;;  %3546 = vmatmul.mubr.bf16.gmra.mrb[172].mxu0 %v7203_v1  ;;  %v4493_v51 = vmax.f32 %v3951_v57, 0.0  ;;  %v8927_v47 = vpop.f32.mrb[66].mxu1  ;;  %v7209_v57 = vld [vmem:[%s10346_s1 + $0x580] ss:$16 sps:$4 sm:$0xff]   ;;  %6229 = vmatprep.mubr.msk.bf16.mxu1 %vm2890_vm0, %v7300_v63 }
 0x1ef   : > { %v3957_v50 = vadd.f32 %v8455_v5, %v3284_v55  ;;  %3555 = vmatprep.mubr.bf16.mxu0 %v7207_v38  ;;  %v4494_v3 = vmax.f32 %v3953_v26, 0.0  ;;  %v8932_v36 = vpop.f32.mrb[67].mxu1 }
 0x1f0   : > { %v4495_v56 = vmax.f32 %v3955_v14, 0.0  ;;  %v8954_v18 = vpop.f32.mrb[68].mxu1 }
 0x1f1   : > { %v4496_v1 = vmax.f32 %v3957_v50, 0.0  ;;  %v3287_v5 = vpop.f32.mrb[68].mxu0  ;;  %v7213_v50 = vld [vmem:[%s10346_s1 + $0x5a4] ss:$16 sps:$4 sm:$0xff]  }
 0x1f2   : > { %v8937_v38 = vpack.c.bf16 %v4495_v56, %v4493_v51  ;;  %v3288_v13 = vadd.f32 %v3287_v5, %v1207_v33  ;;  %v3289_v61 = vpop.f32.mrb[69].mxu0  ;;  %v1005_v51 = vld [vmem:[%s10347_s2 + $0x318] sm:$0xff] }
 0x1f3   : > { %v8942_v55 = vpack.c.bf16 %v4496_v1, %v4494_v3  ;;  %v3290_v26 = vadd.f32 %v3289_v61, %v1207_v33  ;;  %v3291_v14 = vpop.f32.mrb[70].mxu0  ;;  %1531 = vperm.xlu1 %6987, %v1005_v51   ;;  %v1217_v61 = vpop.permute.xlu0 %1216 }
 0x1f4   : > { %10430 = vst [vmem:[#allocation49_spill] sm:$0xff] %v8937_v38  ;;  %v3292_v56 = vadd.f32 %v3291_v14, %v1212_v39  ;;  %v3961_v5 = vadd.f32 %v8470_v46, %v3288_v13  ;;  %v3293_v38 = vpop.f32.mrb[71].mxu0  ;;  %v7302_v46 = vld [vmem:[%s10346_s1 + $0x768] ss:$16 sps:$4 sm:$0xff]   ;;  %v1006_v14 = vld [vmem:[%s10347_s2 + $0x320] sm:$0xff] }
 0x1f5   : > { %10431 = vst [vmem:[#allocation50_spill] sm:$0xff] %v8942_v55  ;;  %v3294_v3 = vadd.f32 %v3293_v38, %v1212_v39  ;;  %v3963_v33 = vadd.f32 %v8472_v52, %v3290_v26  ;;  %v8957_v55 = vpop.f32.mrb[69].mxu1  ;;  %v1222_v39 = vpop.permute.xlu1 %1221  ;;  %v7306_v52 = vld [vmem:[%s10346_s1 + $0x78c] ss:$16 sps:$4 sm:$0xff]   ;;  %1536 = vperm.xlu0 %6986, %v1006_v14   ;;  %4379 = vmatmul.mubr.bf16.gmra.mrb[176].mxu1 %v7302_v46 }
 0x1f6   : > { %v3965_v1 = vadd.f32 %v8477_v9, %v3292_v56  ;;  %3556 = vmatmul.mubr.bf16.gmra.mrb[176].mxu0 %v7209_v57  ;;  %v4497_v63 = vmax.f32 %v3961_v5, 0.0  ;;  %v8962_v38 = vpop.f32.mrb[70].mxu1  ;;  %v7215_v5 = vld [vmem:[%s10346_s1 + $0x5a0] ss:$16 sps:$4 sm:$0xff]   ;;  %6230 = vmatprep.mubr.msk.bf16.mxu1 %vm2890_vm0, %v7306_v52 }
 0x1f7   : > { %v3967_v62 = vadd.f32 %v8482_v11, %v3294_v3  ;;  %3565 = vmatprep.mubr.bf16.mxu0 %v7213_v50  ;;  %v4498_v9 = vmax.f32 %v3963_v33, 0.0  ;;  %v8967_v26 = vpop.f32.mrb[71].mxu1 }
 0x1f8   : > { %v4499_v13 = vmax.f32 %v3965_v1, 0.0  ;;  %v8989_v14 = vpop.f32.mrb[72].mxu1 }
 0x1f9   : > { %v4500_v57 = vmax.f32 %v3967_v62, 0.0  ;;  %v3297_v11 = vpop.f32.mrb[72].mxu0  ;;  %v7219_v62 = vld [vmem:[%s10346_s1 + $0x5c4] ss:$16 sps:$4 sm:$0xff]  }
 0x1fa   : > { %v8972_v50 = vpack.c.bf16 %v4499_v13, %v4497_v63  ;;  %v3298_v51 = vadd.f32 %v3297_v11, %v1217_v61  ;;  %v3299_v56 = vpop.f32.mrb[73].mxu0  ;;  %v1007_v63 = vld [vmem:[%s10347_s2 + $0x328] sm:$0xff] }
 0x1fb   : > { %v8977_v3 = vpack.c.bf16 %v4500_v57, %v4498_v9  ;;  %v3300_v33 = vadd.f32 %v3299_v56, %v1217_v61  ;;  %v3301_v1 = vpop.f32.mrb[74].mxu0  ;;  %1541 = vperm.xlu1 %6987, %v1007_v63   ;;  %v1227_v56 = vpop.permute.xlu0 %1226 }
 0x1fc   : > { %10432 = vst [vmem:[#allocation51_spill] sm:$0xff] %v8972_v50  ;;  %v3302_v13 = vadd.f32 %v3301_v1, %v1222_v39  ;;  %v3971_v11 = vadd.f32 %v8501_v16, %v3298_v51  ;;  %v3303_v50 = vpop.f32.mrb[75].mxu0  ;;  %v7308_v16 = vld [vmem:[%s10346_s1 + $0x788] ss:$16 sps:$4 sm:$0xff]   ;;  %v1008_v1 = vld [vmem:[%s10347_s2 + $0x330] sm:$0xff] }
 0x1fd   : > { %10433 = vst [vmem:[#allocation52_spill] sm:$0xff] %v8977_v3  ;;  %v3304_v9 = vadd.f32 %v3303_v50, %v1222_v39  ;;  %v3973_v61 = vadd.f32 %v8503_v17, %v3300_v33  ;;  %v8992_v3 = vpop.f32.mrb[73].mxu1  ;;  %v1232_v39 = vpop.permute.xlu1 %1231  ;;  %v7312_v17 = vld [vmem:[%s10346_s1 + $0x7ac] ss:$16 sps:$4 sm:$0xff]   ;;  %1546 = vperm.xlu0 %6986, %v1008_v1   ;;  %4389 = vmatmul.mubr.bf16.gmra.mrb[180].mxu1 %v7308_v16 }
 0x1fe   : > { %v3975_v57 = vadd.f32 %v8508_v19, %v3302_v13  ;;  %3566 = vmatmul.mubr.bf16.gmra.mrb[180].mxu0 %v7215_v5  ;;  %v4501_v52 = vmax.f32 %v3971_v11, 0.0  ;;  %v8997_v50 = vpop.f32.mrb[74].mxu1  ;;  %v7221_v11 = vld [vmem:[%s10346_s1 + $0x5c0] ss:$16 sps:$4 sm:$0xff]   ;;  %6231 = vmatprep.mubr.msk.bf16.mxu1 %vm2890_vm0, %v7312_v17 }
 0x1ff   : > { %v3977_v46 = vadd.f32 %v8513_v21, %v3304_v9  ;;  %3575 = vmatprep.mubr.bf16.mxu0 %v7219_v62  ;;  %v4502_v19 = vmax.f32 %v3973_v61, 0.0  ;;  %v9002_v33 = vpop.f32.mrb[75].mxu1 }
 0x200   : > { %v4503_v51 = vmax.f32 %v3975_v57, 0.0  ;;  %v9024_v1 = vpop.f32.mrb[76].mxu1 }
 0x201   : > { %v4504_v5 = vmax.f32 %v3977_v46, 0.0  ;;  %v3307_v21 = vpop.f32.mrb[76].mxu0  ;;  %v7225_v46 = vld [vmem:[%s10346_s1 + $0x5e4] ss:$16 sps:$4 sm:$0xff]  }
 0x202   : > { %v9007_v62 = vpack.c.bf16 %v4503_v51, %v4501_v52  ;;  %v3308_v63 = vadd.f32 %v3307_v21, %v1227_v56  ;;  %v3309_v13 = vpop.f32.mrb[77].mxu0  ;;  %v1009_v52 = vld [vmem:[%s10347_s2 + $0x338] sm:$0xff] }
 0x203   : > { %v9012_v9 = vpack.c.bf16 %v4504_v5, %v4502_v19  ;;  %v3310_v61 = vadd.f32 %v3309_v13, %v1227_v56  ;;  %v3311_v57 = vpop.f32.mrb[78].mxu0  ;;  %1551 = vperm.xlu1 %6987, %v1009_v52   ;;  %v1237_v13 = vpop.permute.xlu0 %1236 }
 0x204   : > { %10434 = vst [vmem:[#allocation53_spill] sm:$0xff] %v9007_v62  ;;  %v3312_v51 = vadd.f32 %v3311_v57, %v1232_v39  ;;  %v3981_v21 = vadd.f32 %v8532_v28, %v3308_v63  ;;  %v3313_v62 = vpop.f32.mrb[79].mxu0  ;;  %v7314_v28 = vld [vmem:[%s10346_s1 + $0x7a8] ss:$16 sps:$4 sm:$0xff]   ;;  %v1010_v57 = vld [vmem:[%s10347_s2 + $0x340] sm:$0xff] }
 0x205   : > { %10435 = vst [vmem:[#allocation54_spill] sm:$0xff] %v9012_v9  ;;  %v3314_v19 = vadd.f32 %v3313_v62, %v1232_v39  ;;  %v3983_v56 = vadd.f32 %v8534_v29, %v3310_v61  ;;  %v9027_v9 = vpop.f32.mrb[77].mxu1  ;;  %v1242_v39 = vpop.permute.xlu1 %1241  ;;  %v7318_v29 = vld [vmem:[%s10346_s1 + $0x7cc] ss:$16 sps:$4 sm:$0xff]   ;;  %1556 = vperm.xlu0 %6986, %v1010_v57   ;;  %4399 = vmatmul.mubr.bf16.gmra.mrb[184].mxu1 %v7314_v28 }
 0x206   : > { %v3985_v5 = vadd.f32 %v8539_v31, %v3312_v51  ;;  %3576 = vmatmul.mubr.bf16.gmra.mrb[184].mxu0 %v7221_v11  ;;  %v4505_v17 = vmax.f32 %v3981_v21, 0.0  ;;  %v9032_v62 = vpop.f32.mrb[78].mxu1  ;;  %v7227_v21 = vld [vmem:[%s10346_s1 + $0x5e0] ss:$16 sps:$4 sm:$0xff]   ;;  %6232 = vmatprep.mubr.msk.bf16.mxu1 %vm2890_vm0, %v7318_v29 }
 0x207   : > { %v3987_v16 = vadd.f32 %v8546_v34, %v3314_v19  ;;  %3585 = vmatprep.mubr.bf16.mxu0 %v7225_v46  ;;  %v4506_v31 = vmax.f32 %v3983_v56, 0.0  ;;  %v9037_v61 = vpop.f32.mrb[79].mxu1 }
 0x208   : > { %v4507_v63 = vmax.f32 %v3985_v5, 0.0  ;;  %v9059_v57 = vpop.f32.mrb[80].mxu1 }
 0x209   : > { %v4508_v11 = vmax.f32 %v3987_v16, 0.0  ;;  %v3317_v34 = vpop.f32.mrb[80].mxu0  ;;  %v7231_v16 = vld [vmem:[%s10346_s1 + $0x604] ss:$16 sps:$4 sm:$0xff]  }
 0x20a   : > { %v9042_v46 = vpack.c.bf16 %v4507_v63, %v4505_v17  ;;  %v3318_v52 = vadd.f32 %v3317_v34, %v1237_v13  ;;  %v3319_v51 = vpop.f32.mrb[81].mxu0  ;;  %v1011_v17 = vld [vmem:[%s10347_s2 + $0x348] sm:$0xff] }
 0x20b   : > { %v9047_v19 = vpack.c.bf16 %v4508_v11, %v4506_v31  ;;  %v3320_v56 = vadd.f32 %v3319_v51, %v1237_v13  ;;  %v3321_v5 = vpop.f32.mrb[82].mxu0  ;;  %1561 = vperm.xlu1 %6987, %v1011_v17   ;;  %v1247_v51 = vpop.permute.xlu0 %1246 }
 0x20c   : > { %10436 = vst [vmem:[#allocation55_spill] sm:$0xff] %v9042_v46  ;;  %v3322_v63 = vadd.f32 %v3321_v5, %v1242_v39  ;;  %v3991_v34 = vadd.f32 %v8563_v42, %v3318_v52  ;;  %v3323_v46 = vpop.f32.mrb[83].mxu0  ;;  %v7320_v42 = vld [vmem:[%s10346_s1 + $0x7c8] ss:$16 sps:$4 sm:$0xff]   ;;  %v1012_v5 = vld [vmem:[%s10347_s2 + $0x350] sm:$0xff] }
 0x20d   : > { %10437 = vst [vmem:[#allocation56_spill] sm:$0xff] %v9047_v19  ;;  %v3324_v31 = vadd.f32 %v3323_v46, %v1242_v39  ;;  %v3993_v13 = vadd.f32 %v8567_v44, %v3320_v56  ;;  %v9062_v19 = vpop.f32.mrb[81].mxu1  ;;  %v1252_v39 = vpop.permute.xlu1 %1251  ;;  %v7324_v44 = vld [vmem:[%s10346_s1 + $0x7ec] ss:$16 sps:$4 sm:$0xff]   ;;  %1566 = vperm.xlu0 %6986, %v1012_v5   ;;  %4409 = vmatmul.mubr.bf16.gmra.mrb[188].mxu1 %v7320_v42 }
 0x20e   : > { %v3995_v11 = vadd.f32 %v8574_v48, %v3322_v63  ;;  %3586 = vmatmul.mubr.bf16.gmra.mrb[188].mxu0 %v7227_v21  ;;  %v4509_v29 = vmax.f32 %v3991_v34, 0.0  ;;  %v9067_v46 = vpop.f32.mrb[82].mxu1  ;;  %v7233_v34 = vld [vmem:[%s10346_s1 + $0x600] ss:$16 sps:$4 sm:$0xff]   ;;  %6233 = vmatprep.mubr.msk.bf16.mxu1 %vm2890_vm0, %v7324_v44 }
 0x20f   : > { %v3997_v28 = vadd.f32 %v8579_v53, %v3324_v31  ;;  %3595 = vmatprep.mubr.bf16.mxu0 %v7231_v16  ;;  %v4510_v48 = vmax.f32 %v3993_v13, 0.0  ;;  %v9072_v56 = vpop.f32.mrb[83].mxu1 }
 0x210   : > { %v4511_v52 = vmax.f32 %v3995_v11, 0.0  ;;  %v9094_v5 = vpop.f32.mrb[84].mxu1 }
 0x211   : > { %v4512_v21 = vmax.f32 %v3997_v28, 0.0  ;;  %v3327_v53 = vpop.f32.mrb[84].mxu0  ;;  %v7237_v28 = vld [vmem:[%s10346_s1 + $0x624] ss:$16 sps:$4 sm:$0xff]  }
 0x212   : > { %v9077_v16 = vpack.c.bf16 %v4511_v52, %v4509_v29  ;;  %v3328_v17 = vadd.f32 %v3327_v53, %v1247_v51  ;;  %v3329_v63 = vpop.f32.mrb[85].mxu0  ;;  %v1013_v29 = vld [vmem:[%s10347_s2 + $0x358] sm:$0xff] }
 0x213   : > { %v9082_v31 = vpack.c.bf16 %v4512_v21, %v4510_v48  ;;  %v3330_v13 = vadd.f32 %v3329_v63, %v1247_v51  ;;  %v3331_v11 = vpop.f32.mrb[86].mxu0  ;;  %1571 = vperm.xlu1 %6987, %v1013_v29   ;;  %v1257_v63 = vpop.permute.xlu0 %1256 }
 0x214   : > { %10438 = vst [vmem:[#allocation57_spill] sm:$0xff] %v9077_v16  ;;  %v3332_v52 = vadd.f32 %v3331_v11, %v1252_v39  ;;  %v4001_v53 = vadd.f32 %v8598_v4, %v3328_v17  ;;  %v3333_v16 = vpop.f32.mrb[87].mxu0  ;;  %v7326_v4 = vld [vmem:[%s10346_s1 + $0x7e8] ss:$16 sps:$4 sm:$0xff]  }
 0x215   : > { %10439 = vst [vmem:[#allocation58_spill] sm:$0xff] %v9082_v31  ;;  %v3334_v48 = vadd.f32 %v3333_v16, %v1252_v39  ;;  %v4003_v51 = vadd.f32 %v8600_v6, %v3330_v13  ;;  %v9097_v31 = vpop.f32.mrb[85].mxu1  ;;  %v1262_v39 = vpop.permute.xlu1 %1261  ;;  %4419 = vmatmul.mubr.bf16.gmra.mrb[192].mxu1 %v7326_v4 }
 0x216   : > { %v4005_v21 = vadd.f32 %v8605_v35, %v3332_v52  ;;  %3596 = vmatmul.mubr.bf16.gmra.mrb[192].mxu0 %v7233_v34  ;;  %v4513_v44 = vmax.f32 %v4001_v53, 0.0  ;;  %v9102_v16 = vpop.f32.mrb[86].mxu1  ;;  %v7239_v52 = vld [vmem:[%s10346_s1 + $0x620] ss:$16 sps:$4 sm:$0xff]  }
 0x217   : > { %v4007_v42 = vadd.f32 %v8610_v54, %v3334_v48  ;;  %3605 = vmatprep.mubr.bf16.mxu0 %v7237_v28  ;;  %v4514_v6 = vmax.f32 %v4003_v51, 0.0  ;;  %v9104_v13 = vpop.f32.mrb[87].mxu1  ;;  %v1014_v54 = vld [vmem:[%s10347_s2 + $0x360] sm:$0xff]  ;;  %v1267_v4 = vpop.permute.xlu0 %1266 }
 0x218   : > { %v4515_v17 = vmax.f32 %v4005_v21, 0.0  ;;  %10440 = vst [vmem:[#allocation59_spill] sm:$0xff] %v9104_v13  ;;  %1576 = vperm.xlu0 %6986, %v1014_v54   ;;  %v7243_v21 = vld [vmem:[%s10346_s1 + $0x644] ss:$16 sps:$4 sm:$0xff]  }
 0x219   : > { %v4516_v35 = vmax.f32 %v4007_v42, 0.0  ;;  %v3337_v34 = vpop.f32.mrb[88].mxu0  ;;  %v1015_v42 = vld [vmem:[%s10347_s2 + $0x368] sm:$0xff]  ;;  %v1272_v13 = vpop.permute.xlu1 %1271 }
 0x21a   : > { %v9109_v11 = vpack.c.bf16 %v4515_v17, %v4513_v44  ;;  %v3338_v28 = vadd.f32 %v3337_v34, %v1257_v63  ;;  %v3339_v29 = vpop.f32.mrb[89].mxu0  ;;  %1581 = vperm.xlu1 %6987, %v1015_v42  }
 0x21b   : > { %v9114_v53 = vpack.c.bf16 %v4516_v35, %v4514_v6  ;;  %v3340_v48 = vadd.f32 %v3339_v29, %v1257_v63  ;;  %v3341_v51 = vpop.f32.mrb[90].mxu0  ;;  %v9125_v35 = vpop.f32.mrb[88].mxu1 }
 0x21c   : > { %10441 = vst [vmem:[#allocation60_spill] sm:$0xff] %v9109_v11  ;;  %v3342_v44 = vadd.f32 %v3341_v51, %v1262_v39  ;;  %v4011_v17 = vadd.f32 %v8629_v20, %v3338_v28  ;;  %v3343_v34 = vpop.f32.mrb[91].mxu0  ;;  %v9128_v29 = vpop.f32.mrb[89].mxu1 }
 0x21d   : > { %10442 = vst [vmem:[#allocation61_spill] sm:$0xff] %v9114_v53  ;;  %v3344_v11 = vadd.f32 %v3343_v34, %v1262_v39  ;;  %v4013_v6 = vadd.f32 %v8631_v22, %v3340_v48  ;;  %v9130_v20 = vpop.f32.mrb[90].mxu1  ;;  %v7245_v48 = vld [vmem:[%s10346_s1 + $0x640] ss:$16 sps:$4 sm:$0xff]   ;;  %v7249_v34 = vld [vmem:[%s10346_s1 + $0x664] ss:$16 sps:$4 sm:$0xff]  }
 0x21e   : > { %v4015_v63 = vadd.f32 %v8636_v24, %v3342_v44  ;;  %3606 = vmatmul.mubr.bf16.gmra.mrb[196].mxu0 %v7239_v52  ;;  %v4517_v53 = vmax.f32 %v4011_v17, 0.0  ;;  %v9132_v22 = vpop.f32.mrb[91].mxu1  ;;  %v1016_v24 = vld [vmem:[%s10347_s2 + $0x370] sm:$0xff] }
 0x21f   : > { %v4017_v54 = vadd.f32 %v8643_v32, %v3344_v11  ;;  %3615 = vmatprep.mubr.bf16.mxu0 %v7243_v21  ;;  %v4518_v28 = vmax.f32 %v4013_v6, 0.0  ;;  %1586 = vperm.xlu0 %6986, %v1016_v24   ;;  %v1277_v24 = vpop.permute.xlu0 %1276 }
 0x220   : > { %v4519_v51 = vmax.f32 %v4015_v63, 0.0 }
 0x221   : > { %v4520_v39 = vmax.f32 %v4017_v54, 0.0  ;;  %v3347_v42 = vpop.f32.mrb[92].mxu0 }
 0x222   : > { %v9137_v52 = vpack.c.bf16 %v4519_v51, %v4517_v53  ;;  %v3348_v32 = vadd.f32 %v3347_v42, %v1267_v4  ;;  %v3349_v11 = vpop.f32.mrb[93].mxu0  ;;  %v1017_v53 = vld [vmem:[%s10347_s2 + $0x378] sm:$0xff] }
 0x223   : > { %v9142_v21 = vpack.c.bf16 %v4520_v39, %v4518_v28  ;;  %v3350_v44 = vadd.f32 %v3349_v11, %v1267_v4  ;;  %v3351_v17 = vpop.f32.mrb[94].mxu0  ;;  %1591 = vperm.xlu1 %6987, %v1017_v53   ;;  %v9153_v4 = vpop.f32.mrb[92].mxu1 }
 0x224   : > { %10443 = vst [vmem:[#allocation62_spill] sm:$0xff] %v9137_v52  ;;  %v3352_v6 = vadd.f32 %v3351_v17, %v1272_v13  ;;  %v4021_v63 = vadd.f32 %v8660_v49, %v3348_v32  ;;  %v3353_v54 = vpop.f32.mrb[95].mxu0  ;;  %v9156_v11 = vpop.f32.mrb[93].mxu1 }
 0x225   : > { %10444 = vst [vmem:[#allocation63_spill] sm:$0xff] %v9142_v21  ;;  %v3354_v51 = vadd.f32 %v3353_v54, %v1272_v13  ;;  %v4023_v42 = vadd.f32 %v8664_v58, %v3350_v44  ;;  %v1282_v21 = vpop.permute.xlu1 %1281  ;;  %v9158_v49 = vpop.f32.mrb[94].mxu1 }
 0x226   : > { %v4025_v28 = vadd.f32 %v8671_v7, %v3352_v6  ;;  %3616 = vmatmul.mubr.bf16.gmra.mrb[200].mxu0 %v7245_v48  ;;  %v4521_v52 = vmax.f32 %v4021_v63, 0.0  ;;  %v9160_v58 = vpop.f32.mrb[95].mxu1  ;;  %v1018_v7 = vld [vmem:[%s10347_s2 + $0x380] sm:$0xff] }
 0x227   : > { %v4027_v39 = vadd.f32 %v8676_v10, %v3354_v51  ;;  %3625 = vmatprep.mubr.bf16.mxu0 %v7249_v34  ;;  %v4522_v32 = vmax.f32 %v4023_v42, 0.0  ;;  %v7251_v34 = vld [vmem:[%s10346_s1 + $0x660] ss:$16 sps:$4 sm:$0xff]   ;;  %1596 = vperm.xlu0 %6986, %v1018_v7   ;;  %v7255_v51 = vld [vmem:[%s10346_s1 + $0x684] ss:$16 sps:$4 sm:$0xff]   ;;  %v1287_v7 = vpop.permute.xlu0 %1286 }
 0x228   : > { %v4523_v17 = vmax.f32 %v4025_v28, 0.0 }
 0x229   : > { %v4524_v13 = vmax.f32 %v4027_v39, 0.0  ;;  %v3357_v53 = vpop.f32.mrb[96].mxu0 }
 0x22a   : > { %v9165_v48 = vpack.c.bf16 %v4523_v17, %v4521_v52  ;;  %v3358_v10 = vadd.f32 %v3357_v53, %v1277_v24  ;;  %v3359_v44 = vpop.f32.mrb[97].mxu0  ;;  %v1019_v52 = vld [vmem:[%s10347_s2 + $0x388] sm:$0xff] }
 0x22b   : > { %v9170_v6 = vpack.c.bf16 %v4524_v13, %v4522_v32  ;;  %v3360_v63 = vadd.f32 %v3359_v44, %v1277_v24  ;;  %v3361_v54 = vpop.f32.mrb[98].mxu0  ;;  %1601 = vperm.xlu1 %6987, %v1019_v52   ;;  %v9181_v24 = vpop.f32.mrb[96].mxu1 }
 0x22c   : > { %10445 = vst [vmem:[#allocation64_spill] sm:$0xff] %v9165_v48  ;;  %v3362_v42 = vadd.f32 %v3361_v54, %v1282_v21  ;;  %v4031_v28 = vadd.f32 %v8695_v37, %v3358_v10  ;;  %v3363_v39 = vpop.f32.mrb[99].mxu0  ;;  %v9184_v44 = vpop.f32.mrb[97].mxu1  ;;  %v1020_v37 = vld [vmem:[%s10347_s2 + $0x390] sm:$0xff] }
 0x22d   : > { %10446 = vst [vmem:[#allocation65_spill] sm:$0xff] %v9170_v6  ;;  %v3364_v17 = vadd.f32 %v3363_v39, %v1282_v21  ;;  %v4033_v53 = vadd.f32 %v8697_v40, %v3360_v63  ;;  %v1292_v21 = vpop.permute.xlu1 %1291  ;;  %v9189_v52 = vpop.f32.mrb[98].mxu1  ;;  %1606 = vperm.xlu0 %6986, %v1020_v37   ;;  %v7257_v39 = vld [vmem:[%s10346_s1 + $0x680] ss:$16 sps:$4 sm:$0xff]   ;;  %v1021_v37 = vld [vmem:[%s10347_s2 + $0x398] sm:$0xff] }
 0x22e   : > { %v4035_v32 = vadd.f32 %v8702_v59, %v3362_v42  ;;  %3626 = vmatmul.mubr.bf16.gmra.mrb[204].mxu0 %v7251_v34  ;;  %v4525_v10 = vmax.f32 %v4031_v28, 0.0  ;;  %v9191_v63 = vpop.f32.mrb[99].mxu1 }
 0x22f   : > { %v4037_v13 = vadd.f32 %v8707_v0, %v3364_v17  ;;  %3635 = vmatprep.mubr.bf16.mxu0 %v7255_v51  ;;  %v4526_v40 = vmax.f32 %v4033_v53, 0.0  ;;  %v7261_v53 = vld [vmem:[%s10346_s1 + $0x6a4] ss:$16 sps:$4 sm:$0xff]   ;;  %1611 = vperm.xlu1 %6987, %v1021_v37  }
 0x230   : > { %v4527_v54 = vmax.f32 %v4035_v32, 0.0 }
 0x231   : > { %v4528_v59 = vmax.f32 %v4037_v13, 0.0  ;;  %v3367_v34 = vpop.f32.mrb[100].mxu0  ;;  %v1022_v13 = vld [vmem:[%s10347_s2 + $0x3a0] sm:$0xff] }
 0x232   : > { %v9193_v0 = vpack.c.bf16 %v4527_v54, %v4525_v10  ;;  %v3368_v51 = vadd.f32 %v3367_v34, %v1287_v7  ;;  %v3369_v42 = vpop.f32.mrb[101].mxu0  ;;  %1616 = vperm.xlu0 %6986, %v1022_v13  }
 0x233   : > { %v9198_v17 = vpack.c.bf16 %v4528_v59, %v4526_v40  ;;  %v3370_v28 = vadd.f32 %v3369_v42, %v1287_v7  ;;  %v3371_v32 = vpop.f32.mrb[102].mxu0  ;;  %v9212_v42 = vpop.f32.mrb[100].mxu1 }
 0x234   : > { %10447 = vst [vmem:[#allocation66_spill] sm:$0xff] %v9193_v0  ;;  %v3372_v10 = vadd.f32 %v3371_v32, %v1292_v21  ;;  %v4041_v54 = vadd.f32 %v8726_v60, %v3368_v51  ;;  %v3373_v34 = vpop.f32.mrb[103].mxu0  ;;  %v9215_v48 = vpop.f32.mrb[101].mxu1  ;;  %v1024_v60 = vld [vmem:[%s10347_s2 + $0x3b0] sm:$0xff] }
 0x235   : > { %10448 = vst [vmem:[#allocation67_spill] sm:$0xff] %v9198_v17  ;;  %v3374_v7 = vadd.f32 %v3373_v34, %v1292_v21  ;;  %v4043_v40 = vadd.f32 %v8728_v2, %v3370_v28  ;;  %v1297_v17 = vpop.permute.xlu0 %1296  ;;  %v1302_v21 = vpop.permute.xlu1 %1301 }
 0x236   : > { %v4045_v59 = vadd.f32 %v8733_v45, %v3372_v10  ;;  %3636 = vmatmul.mubr.bf16.gmra.mrb[208].mxu0 %v7257_v39  ;;  %v4529_v51 = vmax.f32 %v4041_v54, 0.0  ;;  %v9220_v13 = vpop.f32.mrb[102].mxu1  ;;  %1626 = vperm.xlu0 %6986, %v1024_v60   ;;  %v7263_v10 = vld [vmem:[%s10346_s1 + $0x6a0] ss:$16 sps:$4 sm:$0xff]  }
 0x237   : > { %v4047_v0 = vadd.f32 %v8740_v41, %v3374_v7  ;;  %3645 = vmatprep.mubr.bf16.mxu0 %v7261_v53  ;;  %v4530_v2 = vmax.f32 %v4043_v40, 0.0  ;;  %v9222_v28 = vpop.f32.mrb[103].mxu1  ;;  %v7267_v40 = vld [vmem:[%s10346_s1 + $0x6c4] ss:$16 sps:$4 sm:$0xff]  }
 0x238   : > { %v4531_v32 = vmax.f32 %v4045_v59, 0.0  ;;  %10449 = vst [vmem:[#allocation68_spill] sm:$0xff] %v9222_v28  ;;  %v1023_v59 = vld [vmem:[%s10347_s2 + $0x3a8] sm:$0xff] }
 0x239   : > { %v4532_v45 = vmax.f32 %v4047_v0, 0.0  ;;  %v3377_v39 = vpop.f32.mrb[104].mxu0  ;;  %v1026_v0 = vld [vmem:[%s10347_s2 + $0x3c0] sm:$0xff]  ;;  %1621 = vperm.xlu1 %6987, %v1023_v59   ;;  %v1307_v6 = vpop.permute.xlu0 %1306 }
 0x23a   : > { %v9224_v41 = vpack.c.bf16 %v4531_v32, %v4529_v51  ;;  %v3378_v53 = vadd.f32 %v3377_v39, %v1297_v17  ;;  %v3379_v37 = vpop.f32.mrb[105].mxu0  ;;  %1636 = vperm.xlu0 %6986, %v1026_v0  }
 0x23b   : > { %v9229_v34 = vpack.c.bf16 %v4532_v45, %v4530_v2  ;;  %v3380_v54 = vadd.f32 %v3379_v37, %v1297_v17  ;;  %v3381_v7 = vpop.f32.mrb[106].mxu0  ;;  %v10452_v45 = vld [vmem:[#allocation27_spill] sm:$0xff]  ;;  %v9243_v37 = vpop.f32.mrb[104].mxu1 }
 0x23c   : > { %10450 = vst [vmem:[#allocation69_spill] sm:$0xff] %v9224_v41  ;;  %v3382_v60 = vadd.f32 %v3381_v7, %v1302_v21  ;;  %v4051_v51 = vadd.f32 %v8757_v30, %v3378_v53  ;;  %v3383_v32 = vpop.f32.mrb[107].mxu0  ;;  %10453 = vst [vmem:[#allocation27_spill] sm:$0xff] %v9243_v37  ;;  %v10454_v41 = vld [vmem:[#allocation28_spill] sm:$0xff]  ;;  %v9246_v28 = vpop.f32.mrb[105].mxu1  ;;  %v1028_v30 = vld [vmem:[%s10347_s2 + $0x3d0] sm:$0xff] }
 0x23d   : > { %10451 = vst [vmem:[#allocation70_spill] sm:$0xff] %v9229_v34  ;;  %v3384_v17 = vadd.f32 %v3383_v32, %v1302_v21  ;;  %v4053_v2 = vadd.f32 %v8761_v23, %v3380_v54  ;;  %10455 = vst [vmem:[#allocation28_spill] sm:$0xff] %v9246_v28  ;;  %v1312_v21 = vpop.permute.xlu1 %1311  ;;  %v9251_v0 = vpop.f32.mrb[106].mxu1  ;;  %v7269_v32 = vld [vmem:[%s10346_s1 + $0x6c0] ss:$16 sps:$4 sm:$0xff]  }
 0x23e   : > { %v4055_v39 = vadd.f32 %v10452_v45, %v3382_v60  ;;  %3646 = vmatmul.mubr.bf16.gmra.mrb[212].mxu0 %v7263_v10  ;;  %v4533_v53 = vmax.f32 %v4051_v51, 0.0  ;;  %10456 = vst [vmem:[#allocation71_spill] sm:$0xff] %v9251_v0  ;;  %1646 = vperm.xlu0 %6986, %v1028_v30   ;;  %v9253_v59 = vpop.f32.mrb[107].mxu1  ;;  %v1317_v28 = vpop.permute.xlu0 %1316 }
 0x23f   : > { %v4057_v34 = vadd.f32 %v10454_v41, %v3384_v17  ;;  %3655 = vmatprep.mubr.bf16.mxu0 %v7267_v40  ;;  %v4534_v23 = vmax.f32 %v4053_v2, 0.0  ;;  %10457 = vst [vmem:[#allocation72_spill] sm:$0xff] %v9253_v59  ;;  %v7273_v2 = vld [vmem:[%s10346_s1 + $0x6e4] ss:$16 sps:$4 sm:$0xff]   ;;  %v10464_v59 = vld [vmem:[#allocation34_spill] sm:$0xff] }
 0x240   : > { %v4535_v7 = vmax.f32 %v4055_v39, 0.0  ;;  %v1025_v39 = vld [vmem:[%s10347_s2 + $0x3b8] sm:$0xff] }
 0x241   : > { %v4536_v10 = vmax.f32 %v4057_v34, 0.0  ;;  %v3387_v54 = vpop.f32.mrb[108].mxu0  ;;  %v1030_v34 = vld [vmem:[%s10347_s2 + $0x3e0] sm:$0xff]  ;;  %1631 = vperm.xlu1 %6987, %v1025_v39  }
 0x242   : > { %v9255_v41 = vpack.c.bf16 %v4535_v7, %v4533_v53  ;;  %v3388_v40 = vadd.f32 %v3387_v54, %v1307_v6  ;;  %v3389_v60 = vpop.f32.mrb[109].mxu0  ;;  %v10460_v53 = vld [vmem:[#allocation31_spill] sm:$0xff]  ;;  %1656 = vperm.xlu0 %6986, %v1030_v34  }
 0x243   : > { %v9260_v17 = vpack.c.bf16 %v4536_v10, %v4534_v23  ;;  %v3390_v51 = vadd.f32 %v3389_v60, %v1307_v6  ;;  %v3391_v45 = vpop.f32.mrb[110].mxu0  ;;  %v10461_v23 = vld [vmem:[#allocation32_spill] sm:$0xff]  ;;  %v10462_v60 = vld [vmem:[#allocation33_spill] sm:$0xff] }
 0x244   : > { %10458 = vst [vmem:[#allocation73_spill] sm:$0xff] %v9255_v41  ;;  %v3392_v30 = vadd.f32 %v3391_v45, %v1312_v21  ;;  %v4061_v7 = vadd.f32 %v10460_v53, %v3388_v40  ;;  %v3393_v54 = vpop.f32.mrb[111].mxu0  ;;  %v1032_v40 = vld [vmem:[%s10347_s2 + $0x3f0] sm:$0xff] }
 0x245   : > { %10459 = vst [vmem:[#allocation74_spill] sm:$0xff] %v9260_v17  ;;  %v3394_v6 = vadd.f32 %v3393_v54, %v1312_v21  ;;  %v4063_v10 = vadd.f32 %v10461_v23, %v3390_v51  ;;  %v9274_v17 = vpop.f32.mrb[108].mxu1  ;;  %v1322_v21 = vpop.permute.xlu1 %1321 }
 0x246   : > { %v4065_v41 = vadd.f32 %v10462_v60, %v3392_v30  ;;  %3656 = vmatmul.mubr.bf16.gmra.mrb[216].mxu0 %v7269_v32  ;;  %10463 = vst [vmem:[#allocation31_spill] sm:$0xff] %v9274_v17  ;;  %v9277_v37 = vpop.f32.mrb[109].mxu1  ;;  %v4537_v45 = vmax.f32 %v4061_v7, 0.0  ;;  %1666 = vperm.xlu0 %6986, %v1032_v40   ;;  %v1027_v60 = vld [vmem:[%s10347_s2 + $0x3c8] sm:$0xff] }
 0x247   : > { %v4067_v0 = vadd.f32 %v10464_v59, %v3394_v6  ;;  %3665 = vmatprep.mubr.bf16.mxu0 %v7273_v2  ;;  %10465 = vst [vmem:[#allocation32_spill] sm:$0xff] %v9277_v37  ;;  %v9282_v39 = vpop.f32.mrb[110].mxu1  ;;  %v4538_v51 = vmax.f32 %v4063_v10, 0.0  ;;  %v7275_v6 = vld [vmem:[%s10346_s1 + $0x6e0] ss:$16 sps:$4 sm:$0xff]   ;;  %1641 = vperm.xlu1 %6987, %v1027_v60   ;;  %v1327_v37 = vpop.permute.xlu0 %1326 }
 0x248   : > { %v4539_v34 = vmax.f32 %v4065_v41, 0.0  ;;  %10466 = vst [vmem:[#allocation33_spill] sm:$0xff] %v9282_v39  ;;  %v9284_v53 = vpop.f32.mrb[111].mxu1  ;;  %v7279_v10 = vld [vmem:[%s10346_s1 + $0x704] ss:$16 sps:$4 sm:$0xff]  }
 0x249   : > { %v4540_v32 = vmax.f32 %v4067_v0, 0.0  ;;  %v3397_v30 = vpop.f32.mrb[112].mxu0  ;;  %10467 = vst [vmem:[#allocation34_spill] sm:$0xff] %v9284_v53  ;;  %v4877_v0 = vld [vmem:[%s10349_s4] sm:$0xff]  ;;  %v10474_v53 = vld [vmem:[#allocation41_spill] sm:$0xff] }
 0x24a   : > { %v9286_v59 = vpack.c.bf16 %v4539_v34, %v4537_v45  ;;  %v3398_v2 = vadd.f32 %v3397_v30, %v1317_v28  ;;  %v3399_v54 = vpop.f32.mrb[113].mxu0  ;;  %v10470_v45 = vld [vmem:[#allocation37_spill] sm:$0xff]  ;;  %4895 = vperm.xlu0 %6986, %v4877_v0  }
 0x24b   : > { %v9291_v23 = vpack.c.bf16 %v4540_v32, %v4538_v51  ;;  %v3400_v41 = vadd.f32 %v3399_v54, %v1317_v28  ;;  %v3401_v7 = vpop.f32.mrb[114].mxu0  ;;  %v10471_v51 = vld [vmem:[#allocation38_spill] sm:$0xff]  ;;  %v10472_v54 = vld [vmem:[#allocation39_spill] sm:$0xff] }
 0x24c   : > { %10468 = vst [vmem:[#allocation75_spill] sm:$0xff] %v9286_v59  ;;  %v3402_v40 = vadd.f32 %v3401_v7, %v1322_v21  ;;  %v4071_v34 = vadd.f32 %v10470_v45, %v3398_v2  ;;  %v3403_v30 = vpop.f32.mrb[115].mxu0  ;;  %v4879_v2 = vld [vmem:[%s10349_s4 + $0x10] sm:$0xff] }
 0x24d   : > { %10469 = vst [vmem:[#allocation76_spill] sm:$0xff] %v9291_v23  ;;  %v3404_v28 = vadd.f32 %v3403_v30, %v1322_v21  ;;  %v4073_v32 = vadd.f32 %v10471_v51, %v3400_v41  ;;  %v9305_v23 = vpop.f32.mrb[112].mxu1  ;;  %v1332_v21 = vpop.permute.xlu1 %1331 }
 0x24e   : > { %v4075_v59 = vadd.f32 %v10472_v54, %v3402_v40  ;;  %3666 = vmatmul.mubr.bf16.gmra.mrb[220].mxu0 %v7275_v6  ;;  %10473 = vst [vmem:[#allocation37_spill] sm:$0xff] %v9305_v23  ;;  %v9308_v17 = vpop.f32.mrb[113].mxu1  ;;  %v4541_v7 = vmax.f32 %v4071_v34, 0.0  ;;  %4905 = vperm.xlu0 %6986, %v4879_v2   ;;  %v1029_v54 = vld [vmem:[%s10347_s2 + $0x3d8] sm:$0xff] }
 0x24f   : > { %v4077_v39 = vadd.f32 %v10474_v53, %v3404_v28  ;;  %3675 = vmatprep.mubr.bf16.mxu0 %v7279_v10  ;;  %10475 = vst [vmem:[#allocation38_spill] sm:$0xff] %v9308_v17  ;;  %v9313_v60 = vpop.f32.mrb[114].mxu1  ;;  %v4542_v41 = vmax.f32 %v4073_v32, 0.0  ;;  %v7281_v28 = vld [vmem:[%s10346_s1 + $0x700] ss:$16 sps:$4 sm:$0xff]   ;;  %1651 = vperm.xlu1 %6987, %v1029_v54   ;;  %v1337_v17 = vpop.permute.xlu0 %1336 }
 0x250   : > { %v4543_v0 = vmax.f32 %v4075_v59, 0.0  ;;  %10476 = vst [vmem:[#allocation39_spill] sm:$0xff] %v9313_v60  ;;  %v9315_v45 = vpop.f32.mrb[115].mxu1  ;;  %v7285_v32 = vld [vmem:[%s10346_s1 + $0x724] ss:$16 sps:$4 sm:$0xff]  }
 0x251   : > { %v4544_v6 = vmax.f32 %v4077_v39, 0.0  ;;  %v3407_v40 = vpop.f32.mrb[116].mxu0  ;;  %10477 = vst [vmem:[#allocation41_spill] sm:$0xff] %v9315_v45  ;;  %v4881_v39 = vld [vmem:[%s10349_s4 + $0x20] sm:$0xff]  ;;  %v10483_v45 = vld [vmem:[#allocation46_spill] sm:$0xff] }
 0x252   : > { %v9317_v53 = vpack.c.bf16 %v4543_v0, %v4541_v7  ;;  %v3408_v10 = vadd.f32 %v3407_v40, %v1327_v37  ;;  %v3409_v30 = vpop.f32.mrb[117].mxu0  ;;  %v10480_v7 = vld [vmem:[#allocation43_spill] sm:$0xff]  ;;  %4915 = vperm.xlu0 %6986, %v4881_v39  }
 0x253   : > { %v9322_v51 = vpack.c.bf16 %v4544_v6, %v4542_v41  ;;  %v3410_v59 = vadd.f32 %v3409_v30, %v1327_v37  ;;  %v3411_v34 = vpop.f32.mrb[118].mxu0  ;;  %v10481_v41 = vld [vmem:[#allocation44_spill] sm:$0xff]  ;;  %v10482_v30 = vld [vmem:[#allocation45_spill] sm:$0xff] }
 0x254   : > { %10478 = vst [vmem:[#allocation77_spill] sm:$0xff] %v9317_v53  ;;  %v3412_v2 = vadd.f32 %v3411_v34, %v1332_v21  ;;  %v4081_v0 = vadd.f32 %v10480_v7, %v3408_v10  ;;  %v3413_v40 = vpop.f32.mrb[119].mxu0  ;;  %v4883_v10 = vld [vmem:[%s10349_s4 + $0x30] sm:$0xff] }
 0x255   : > { %10479 = vst [vmem:[#allocation78_spill] sm:$0xff] %v9322_v51  ;;  %v3414_v37 = vadd.f32 %v3413_v40, %v1332_v21  ;;  %v4083_v6 = vadd.f32 %v10481_v41, %v3410_v59  ;;  %v9336_v51 = vpop.f32.mrb[116].mxu1  ;;  %v1342_v21 = vpop.permute.xlu1 %1341 }
 0x256   : > { %v4085_v53 = vadd.f32 %v10482_v30, %v3412_v2  ;;  %3676 = vmatmul.mubr.bf16.gmra.mrb[224].mxu0 %v7281_v28  ;;  %v9339_v23 = vpop.f32.mrb[117].mxu1  ;;  %v4545_v34 = vmax.f32 %v4081_v0, 0.0  ;;  %4925 = vperm.xlu0 %6986, %v4883_v10   ;;  %v1031_v30 = vld [vmem:[%s10347_s2 + $0x3e8] sm:$0xff] }
 0x257   : > { %v4087_v60 = vadd.f32 %v10483_v45, %v3414_v37  ;;  %3685 = vmatprep.mubr.bf16.mxu0 %v7285_v32  ;;  %v9344_v54 = vpop.f32.mrb[118].mxu1  ;;  %v4546_v59 = vmax.f32 %v4083_v6, 0.0  ;;  %v7287_v37 = vld [vmem:[%s10346_s1 + $0x720] ss:$16 sps:$4 sm:$0xff]   ;;  %v7291_v6 = vld [vmem:[%s10346_s1 + $0x744] ss:$16 sps:$4 sm:$0xff]   ;;  %1661 = vperm.xlu1 %6987, %v1031_v30  }
 0x258   : > { %v4547_v39 = vmax.f32 %v4085_v53, 0.0  ;;  %v9346_v7 = vpop.f32.mrb[119].mxu1 }
 0x259   : > { %v4548_v28 = vmax.f32 %v4087_v60, 0.0  ;;  %v3417_v2 = vpop.f32.mrb[120].mxu0  ;;  %v4885_v60 = vld [vmem:[%s10349_s4 + $0x40] sm:$0xff] }
 0x25a   : > { %v9348_v45 = vpack.c.bf16 %v4547_v39, %v4545_v34  ;;  %v3418_v32 = vadd.f32 %v3417_v2, %v1337_v17  ;;  %v3419_v40 = vpop.f32.mrb[121].mxu0  ;;  %4935 = vperm.xlu0 %6986, %v4885_v60   ;;  %v9367_v2 = vpop.f32.mrb[120].mxu1 }
 0x25b   : > { %v9353_v41 = vpack.c.bf16 %v4548_v28, %v4546_v59  ;;  %v3420_v53 = vadd.f32 %v3419_v40, %v1337_v17  ;;  %v3421_v0 = vpop.f32.mrb[122].mxu0 }
 0x25c   : > { %10484 = vst [vmem:[#allocation43_spill] sm:$0xff] %v9348_v45  ;;  %v3422_v10 = vadd.f32 %v3421_v0, %v1342_v21  ;;  %v4091_v34 = vadd.f32 %v8884_v25, %v3418_v32  ;;  %v3423_v39 = vpop.f32.mrb[123].mxu0  ;;  %v1347_v45 = vpop.permute.xlu0 %1346  ;;  %v4887_v25 = vld [vmem:[%s10349_s4 + $0x50] sm:$0xff] }
 0x25d   : > { %10485 = vst [vmem:[#allocation44_spill] sm:$0xff] %v9353_v41  ;;  %v3424_v17 = vadd.f32 %v3423_v39, %v1342_v21  ;;  %v4093_v59 = vadd.f32 %v8887_v12, %v3420_v53  ;;  %v9370_v41 = vpop.f32.mrb[121].mxu1  ;;  %v1352_v21 = vpop.permute.xlu1 %1351 }
 0x25e   : > { %v4095_v28 = vadd.f32 %v8892_v8, %v3422_v10  ;;  %3686 = vmatmul.mubr.bf16.gmra.mrb[228].mxu0 %v7287_v37  ;;  %v4549_v32 = vmax.f32 %v4091_v34, 0.0  ;;  %v9375_v60 = vpop.f32.mrb[122].mxu1  ;;  %4945 = vperm.xlu0 %6986, %v4887_v25   ;;  %v7293_v10 = vld [vmem:[%s10346_s1 + $0x740] ss:$16 sps:$4 sm:$0xff]  }
 0x25f   : > { %v4097_v40 = vadd.f32 %v8897_v27, %v3424_v17  ;;  %3695 = vmatprep.mubr.bf16.mxu0 %v7291_v6  ;;  %v4550_v12 = vmax.f32 %v4093_v59, 0.0  ;;  %v9377_v53 = vpop.f32.mrb[123].mxu1  ;;  %v7297_v59 = vld [vmem:[%s10346_s1 + $0x764] ss:$16 sps:$4 sm:$0xff]  }
 0x260   : > { %v4551_v0 = vmax.f32 %v4095_v28, 0.0  ;;  %v4889_v28 = vld [vmem:[%s10349_s4 + $0x60] sm:$0xff] }
 0x261   : > { %v4552_v8 = vmax.f32 %v4097_v40, 0.0  ;;  %v3427_v37 = vpop.f32.mrb[124].mxu0  ;;  %v1033_v40 = vld [vmem:[%s10347_s2 + $0x3f8] sm:$0xff] }
 0x262   : > { %v9379_v27 = vpack.c.bf16 %v4551_v0, %v4549_v32  ;;  %v3428_v6 = vadd.f32 %v3427_v37, %v1347_v45  ;;  %v3429_v30 = vpop.f32.mrb[125].mxu0  ;;  %4955 = vperm.xlu0 %6986, %v4889_v28   ;;  %1671 = vperm.xlu1 %6987, %v1033_v40   ;;  %v9398_v37 = vpop.f32.mrb[124].mxu1 }
 0x263   : > { %v9384_v39 = vpack.c.bf16 %v4552_v8, %v4550_v12  ;;  %v3430_v34 = vadd.f32 %v3429_v30, %v1347_v45  ;;  %v3431_v17 = vpop.f32.mrb[126].mxu0 }
 0x264   : > { %10486 = vst [vmem:[#allocation45_spill] sm:$0xff] %v9379_v27  ;;  %v3432_v25 = vadd.f32 %v3431_v17, %v1352_v21  ;;  %v4101_v32 = vadd.f32 %v8919_v43, %v3428_v6  ;;  %v3433_v0 = vpop.f32.mrb[127].mxu0  ;;  %v1357_v27 = vpop.permute.xlu0 %1356  ;;  %v4891_v43 = vld [vmem:[%s10349_s4 + $0x70] sm:$0xff] }
 0x265   : > { %10487 = vst [vmem:[#allocation46_spill] sm:$0xff] %v9384_v39  ;;  %v3434_v45 = vadd.f32 %v3433_v0, %v1352_v21  ;;  %v4103_v12 = vadd.f32 %v8922_v15, %v3430_v34  ;;  %v9401_v39 = vpop.f32.mrb[125].mxu1  ;;  %v1362_v21 = vpop.permute.xlu1 %1361 }
 0x266   : > { %v4105_v8 = vadd.f32 %v8927_v47, %v3432_v25  ;;  %3696 = vmatmul.mubr.bf16.gmra.mrb[232].mxu0 %v7293_v10  ;;  %v4553_v6 = vmax.f32 %v4101_v32, 0.0  ;;  %v9406_v28 = vpop.f32.mrb[126].mxu1  ;;  %4965 = vperm.xlu0 %6986, %v4891_v43   ;;  %v7299_v25 = vld [vmem:[%s10346_s1 + $0x760] ss:$16 sps:$4 sm:$0xff]   ;;  %v4878_v32 = vld [vmem:[%s10349_s4 + $0x8] sm:$0xff] }
 0x267   : > { %v4107_v30 = vadd.f32 %v8932_v36, %v3434_v45  ;;  %3705 = vmatprep.mubr.bf16.mxu0 %v7297_v59  ;;  %v4554_v15 = vmax.f32 %v4103_v12, 0.0  ;;  %v9408_v34 = vpop.f32.mrb[127].mxu1  ;;  %4900 = vperm.xlu1 %6987, %v4878_v32  }
 0x268   : > { %v4555_v17 = vmax.f32 %v4105_v8, 0.0  ;;  %v7303_v8 = vld [vmem:[%s10346_s1 + $0x784] ss:$16 sps:$4 sm:$0xff]  }
 0x269   : > { %v4556_v47 = vmax.f32 %v4107_v30, 0.0  ;;  %v3437_v10 = vpop.f32.mrb[128].mxu0  ;;  %v5794_v30 = vld [vmem:[%s10351_s6] sm:$0xff] }
 0x26a   : > { %v9410_v36 = vpack.c.bf16 %v4555_v17, %v4553_v6  ;;  %v3438_v59 = vadd.f32 %v3437_v10, %v1357_v27  ;;  %v3439_v40 = vpop.f32.mrb[129].mxu0  ;;  %5797 = vperm.xlu0 %6986, %v5794_v30   ;;  %v1372_v30 = vpop.permute.xlu1 %1371 }
 0x26b   : > { %v9418_v0 = vpack.c.bf16 %v4556_v47, %v4554_v15  ;;  %v3440_v45 = vadd.f32 %v3439_v40, %v1357_v27  ;;  %v3441_v12 = vpop.f32.mrb[130].mxu0  ;;  %v4880_v15 = vld [vmem:[%s10349_s4 + $0x18] sm:$0xff]  ;;  %v9432_v40 = vpop.f32.mrb[128].mxu1 }
 0x26c   : > { %10488 = vst [vmem:[#allocation79_spill] sm:$0xff] %v9410_v36  ;;  %v3442_v43 = vadd.f32 %v3441_v12, %v1362_v21  ;;  %v4111_v6 = vadd.f32 %v8954_v18, %v3438_v59  ;;  %v3443_v17 = vpop.f32.mrb[131].mxu0  ;;  %v1367_v36 = vpop.permute.xlu0 %1366  ;;  %4910 = vperm.xlu1 %6987, %v4880_v15  }
 0x26d   : > { %10489 = vst [vmem:[#allocation80_spill] sm:$0xff] %v9418_v0  ;;  %v3444_v27 = vadd.f32 %v3443_v17, %v1362_v21  ;;  %v4113_v47 = vadd.f32 %v8957_v55, %v3440_v45  ;;  %v9435_v12 = vpop.f32.mrb[129].mxu1 }
 0x26e   : > { %v4115_v10 = vadd.f32 %v8962_v38, %v3442_v43  ;;  %3706 = vmatmul.mubr.bf16.gmra.mrb[236].mxu0 %v7299_v25  ;;  %v4557_v18 = vmax.f32 %v4111_v6, 0.0  ;;  %v9437_v0 = vpop.f32.mrb[130].mxu1 }
 0x26f   : > { %v4117_v32 = vadd.f32 %v8967_v26, %v3444_v27  ;;  %3715 = vmatprep.mubr.bf16.mxu0 %v7303_v8  ;;  %v4558_v21 = vmax.f32 %v4113_v47, 0.0  ;;  %v9439_v45 = vpop.f32.mrb[131].mxu1  ;;  %v7305_v26 = vld [vmem:[%s10346_s1 + $0x780] ss:$16 sps:$4 sm:$0xff]   ;;  %v4882_v8 = vld [vmem:[%s10349_s4 + $0x28] sm:$0xff] }
 0x270   : > { %v4559_v59 = vmax.f32 %v4115_v10, 0.0  ;;  %v7309_v47 = vld [vmem:[%s10346_s1 + $0x7a4] ss:$16 sps:$4 sm:$0xff]   ;;  %4920 = vperm.xlu1 %6987, %v4882_v8  }
 0x271   : > { %v4560_v17 = vmax.f32 %v4117_v32, 0.0  ;;  %v3447_v55 = vpop.f32.mrb[132].mxu0 }
 0x272   : > { %v9441_v38 = vpack.c.bf16 %v4559_v59, %v4557_v18  ;;  %v3448_v25 = vadd.f32 %v3447_v55, %v1367_v36  ;;  %v3449_v43 = vpop.f32.mrb[133].mxu0  ;;  %v4884_v59 = vld [vmem:[%s10349_s4 + $0x38] sm:$0xff] }
 0x273   : > { %v9449_v6 = vpack.c.bf16 %v4560_v17, %v4558_v21  ;;  %v3450_v15 = vadd.f32 %v3449_v43, %v1367_v36  ;;  %v3451_v27 = vpop.f32.mrb[134].mxu0  ;;  %v9460_v36 = vpop.f32.mrb[132].mxu1 }
 0x274   : > { %10490 = vst [vmem:[#allocation81_spill] sm:$0xff] %v9441_v38  ;;  %v3452_v10 = vadd.f32 %v3451_v27, %v1372_v30  ;;  %v4121_v32 = vadd.f32 %v8989_v14, %v3448_v25  ;;  %v3453_v18 = vpop.f32.mrb[135].mxu0  ;;  %v1377_v43 = vpop.permute.xlu0 %1376  ;;  %4930 = vperm.xlu1 %6987, %v4884_v59  }
 0x275   : > { %10491 = vst [vmem:[#allocation82_spill] sm:$0xff] %v9449_v6  ;;  %v3454_v55 = vadd.f32 %v3453_v18, %v1372_v30  ;;  %v4123_v38 = vadd.f32 %v8992_v3, %v3450_v15  ;;  %v9463_v8 = vpop.f32.mrb[133].mxu1  ;;  %v1382_v27 = vpop.permute.xlu1 %1381 }
 0x276   : > { %v4125_v21 = vadd.f32 %v8997_v50, %v3452_v10  ;;  %3716 = vmatmul.mubr.bf16.gmra.mrb[240].mxu0 %v7305_v26  ;;  %v4561_v14 = vmax.f32 %v4121_v32, 0.0  ;;  %v9465_v6 = vpop.f32.mrb[134].mxu1 }
 0x277   : > { %v4127_v17 = vadd.f32 %v9002_v33, %v3454_v55  ;;  %3725 = vmatprep.mubr.bf16.mxu0 %v7309_v47  ;;  %v4562_v30 = vmax.f32 %v4123_v38, 0.0  ;;  %v9467_v15 = vpop.f32.mrb[135].mxu1  ;;  %v7311_v33 = vld [vmem:[%s10346_s1 + $0x7a0] ss:$16 sps:$4 sm:$0xff]   ;;  %v4886_v47 = vld [vmem:[%s10349_s4 + $0x48] sm:$0xff] }
 0x278   : > { %v4563_v25 = vmax.f32 %v4125_v21, 0.0  ;;  %v7315_v55 = vld [vmem:[%s10346_s1 + $0x7c4] ss:$16 sps:$4 sm:$0xff]   ;;  %4940 = vperm.xlu1 %6987, %v4886_v47  }
 0x279   : > { %v4564_v18 = vmax.f32 %v4127_v17, 0.0  ;;  %v3457_v3 = vpop.f32.mrb[136].mxu0 }
 0x27a   : > { %v9469_v50 = vpack.c.bf16 %v4563_v25, %v4561_v14  ;;  %v3458_v26 = vadd.f32 %v3457_v3, %v1377_v43  ;;  %v3459_v10 = vpop.f32.mrb[137].mxu0  ;;  %v4888_v25 = vld [vmem:[%s10349_s4 + $0x58] sm:$0xff] }
 0x27b   : > { %v9477_v32 = vpack.c.bf16 %v4564_v18, %v4562_v30  ;;  %v3460_v59 = vadd.f32 %v3459_v10, %v1377_v43  ;;  %v3461_v38 = vpop.f32.mrb[138].mxu0  ;;  %v9488_v43 = vpop.f32.mrb[136].mxu1 }
 0x27c   : > { %10492 = vst [vmem:[#allocation83_spill] sm:$0xff] %v9469_v50  ;;  %v3462_v21 = vadd.f32 %v3461_v38, %v1382_v27  ;;  %v4131_v17 = vadd.f32 %v9024_v1, %v3458_v26  ;;  %v3463_v14 = vpop.f32.mrb[139].mxu0  ;;  %v1387_v10 = vpop.permute.xlu0 %1386  ;;  %4950 = vperm.xlu1 %6987, %v4888_v25  }
 0x27d   : > { %10493 = vst [vmem:[#allocation84_spill] sm:$0xff] %v9477_v32  ;;  %v3464_v3 = vadd.f32 %v3463_v14, %v1382_v27  ;;  %v4133_v50 = vadd.f32 %v9027_v9, %v3460_v59  ;;  %v9491_v47 = vpop.f32.mrb[137].mxu1  ;;  %v1392_v38 = vpop.permute.xlu1 %1391 }
 0x27e   : > { %v4135_v30 = vadd.f32 %v9032_v62, %v3462_v21  ;;  %3726 = vmatmul.mubr.bf16.gmra.mrb[244].mxu0 %v7311_v33  ;;  %v4565_v1 = vmax.f32 %v4131_v17, 0.0  ;;  %v9493_v32 = vpop.f32.mrb[138].mxu1 }
 0x27f   : > { %v4137_v18 = vadd.f32 %v9037_v61, %v3464_v3  ;;  %3735 = vmatprep.mubr.bf16.mxu0 %v7315_v55  ;;  %v4566_v27 = vmax.f32 %v4133_v50, 0.0  ;;  %v9495_v59 = vpop.f32.mrb[139].mxu1  ;;  %v7317_v61 = vld [vmem:[%s10346_s1 + $0x7c0] ss:$16 sps:$4 sm:$0xff]   ;;  %v4890_v55 = vld [vmem:[%s10349_s4 + $0x68] sm:$0xff] }
 0x280   : > { %v4567_v26 = vmax.f32 %v4135_v30, 0.0  ;;  %v7321_v3 = vld [vmem:[%s10346_s1 + $0x7e4] ss:$16 sps:$4 sm:$0xff]   ;;  %4960 = vperm.xlu1 %6987, %v4890_v55  }
 0x281   : > { %v4568_v14 = vmax.f32 %v4137_v18, 0.0  ;;  %v3467_v9 = vpop.f32.mrb[140].mxu0 }
 0x282   : > { %v9497_v62 = vpack.c.bf16 %v4567_v26, %v4565_v1  ;;  %v3468_v33 = vadd.f32 %v3467_v9, %v1387_v10  ;;  %v3469_v21 = vpop.f32.mrb[141].mxu0  ;;  %v4892_v26 = vld [vmem:[%s10349_s4 + $0x78] sm:$0xff] }
 0x283   : > { %v9505_v17 = vpack.c.bf16 %v4568_v14, %v4566_v27  ;;  %v3470_v25 = vadd.f32 %v3469_v21, %v1387_v10  ;;  %v3471_v50 = vpop.f32.mrb[142].mxu0  ;;  %v9516_v10 = vpop.f32.mrb[140].mxu1 }
 0x284   : > { %10494 = vst [vmem:[#allocation85_spill] sm:$0xff] %v9497_v62  ;;  %v3472_v30 = vadd.f32 %v3471_v50, %v1392_v38  ;;  %v4141_v18 = vadd.f32 %v9059_v57, %v3468_v33  ;;  %v3473_v1 = vpop.f32.mrb[143].mxu0  ;;  %v1397_v21 = vpop.permute.xlu0 %1396  ;;  %4970 = vperm.xlu1 %6987, %v4892_v26  }
 0x285   : > { %10495 = vst [vmem:[#allocation86_spill] sm:$0xff] %v9505_v17  ;;  %v3474_v9 = vadd.f32 %v3473_v1, %v1392_v38  ;;  %v4143_v62 = vadd.f32 %v9062_v19, %v3470_v25  ;;  %v9519_v55 = vpop.f32.mrb[141].mxu1  ;;  %v1402_v50 = vpop.permute.xlu1 %1401 }
 0x286   : > { %v4145_v27 = vadd.f32 %v9067_v46, %v3472_v30  ;;  %3736 = vmatmul.mubr.bf16.gmra.mrb[248].mxu0 %v7317_v61  ;;  %v4569_v57 = vmax.f32 %v4141_v18, 0.0  ;;  %v9521_v17 = vpop.f32.mrb[142].mxu1 }
 0x287   : > { %v4147_v14 = vadd.f32 %v9072_v56, %v3474_v9  ;;  %3745 = vmatprep.mubr.bf16.mxu0 %v7321_v3  ;;  %v4570_v38 = vmax.f32 %v4143_v62, 0.0  ;;  %v9523_v25 = vpop.f32.mrb[143].mxu1  ;;  %v7323_v56 = vld [vmem:[%s10346_s1 + $0x7e0] ss:$16 sps:$4 sm:$0xff]   ;;  %v7329_v62 = vld [vmem:[%s10346_s1 + $0xc] ss:$16 sps:$4 sm:$0xff]  }
 0x288   : > { %v4571_v33 = vmax.f32 %v4145_v27, 0.0  ;;  %10496 = vst [vmem:[#allocation87_spill] sm:$0xff] %v9523_v25 }
 0x289   : > { %v4572_v1 = vmax.f32 %v4147_v14, 0.0  ;;  %v3477_v19 = vpop.f32.mrb[144].mxu0  ;;  %v1412_v25 = vpop.permute.xlu1 %1411 }
 0x28a   : > { %v9525_v46 = vpack.c.bf16 %v4571_v33, %v4569_v57  ;;  %v3478_v61 = vadd.f32 %v3477_v19, %v1397_v21  ;;  %v3479_v30 = vpop.f32.mrb[145].mxu0 }
 0x28b   : > { %v9530_v3 = vpack.c.bf16 %v4572_v1, %v4570_v38  ;;  %v3480_v18 = vadd.f32 %v3479_v30, %v1397_v21  ;;  %v3481_v26 = vpop.f32.mrb[146].mxu0  ;;  %v10499_v38 = vld [vmem:[#allocation59_spill] sm:$0xff]  ;;  %v1407_v21 = vpop.permute.xlu0 %1406 }
 0x28c   : > { %10497 = vst [vmem:[#allocation88_spill] sm:$0xff] %v9525_v46  ;;  %v3482_v9 = vadd.f32 %v3481_v26, %v1402_v50  ;;  %v4151_v27 = vadd.f32 %v9094_v5, %v3478_v61  ;;  %v3483_v14 = vpop.f32.mrb[147].mxu0  ;;  %v9538_v46 = vpop.f32.mrb[144].mxu1 }
 0x28d   : > { %10498 = vst [vmem:[#allocation89_spill] sm:$0xff] %v9530_v3  ;;  %v3484_v57 = vadd.f32 %v3483_v14, %v1402_v50  ;;  %v4153_v33 = vadd.f32 %v9097_v31, %v3480_v18  ;;  %v9542_v30 = vpop.f32.mrb[145].mxu1 }
 0x28e   : > { %v4155_v19 = vadd.f32 %v9102_v16, %v3482_v9  ;;  %3746 = vmatmul.mubr.bf16.gmra.mrb[252].mxu0 %v7323_v56  ;;  %v4573_v3 = vmax.f32 %v4151_v27, 0.0  ;;  %v9544_v5 = vpop.f32.mrb[146].mxu1 }
 0x28f   : > { %v4157_v1 = vadd.f32 %v10499_v38, %v3484_v57  ;;  %6170 = vmatprep.mubr.msk.bf16.mxu0 %vm2890_vm0, %v7329_v62  ;;  %v4574_v50 = vmax.f32 %v4153_v33, 0.0  ;;  %v9546_v18 = vpop.f32.mrb[147].mxu1  ;;  %v7327_v62 = vld [vmem:[%s10346_s1 + $0x8] ss:$16 sps:$4 sm:$0xff]   ;;  %v7330_v33 = vld [vmem:[%s10346_s1 + $0x2c] ss:$16 sps:$4 sm:$0xff]  }
 0x290   : > { %v4575_v26 = vmax.f32 %v4155_v19, 0.0 }
 0x291   : > { %v4576_v61 = vmax.f32 %v4157_v1, 0.0  ;;  %v3487_v31 = vpop.f32.mrb[148].mxu0 }
 0x292   : > { %v9548_v16 = vpack.c.bf16 %v4575_v26, %v4573_v3  ;;  %v3488_v56 = vadd.f32 %v3487_v31, %v1407_v21  ;;  %v3489_v9 = vpop.f32.mrb[149].mxu0 }
 0x293   : > { %v9553_v14 = vpack.c.bf16 %v4576_v61, %v4574_v50  ;;  %v3490_v27 = vadd.f32 %v3489_v9, %v1407_v21  ;;  %v3491_v57 = vpop.f32.mrb[150].mxu0  ;;  %v1417_v21 = vpop.permute.xlu0 %1416 }
 0x294   : > { %10500 = vst [vmem:[#allocation59_spill] sm:$0xff] %v9548_v16  ;;  %v3492_v19 = vadd.f32 %v3491_v57, %v1412_v25  ;;  %v4161_v38 = vadd.f32 %v9125_v35, %v3488_v56  ;;  %v3493_v1 = vpop.f32.mrb[151].mxu0  ;;  %v9561_v16 = vpop.f32.mrb[148].mxu1 }
 0x295   : > { %10501 = vst [vmem:[#allocation90_spill] sm:$0xff] %v9553_v14  ;;  %v3494_v3 = vadd.f32 %v3493_v1, %v1412_v25  ;;  %v4163_v26 = vadd.f32 %v9128_v29, %v3490_v27  ;;  %v9565_v61 = vpop.f32.mrb[149].mxu1  ;;  %v1422_v14 = vpop.permute.xlu1 %1421 }
 0x296   : > { %v4165_v31 = vadd.f32 %v9130_v20, %v3492_v19  ;;  %3789 = vmatmul.mubr.bf16.vlgmr.msra.gmra.mrb[0].mxu0 %v7327_v62  ;;  %v4577_v9 = vmax.f32 %v4161_v38, 0.0  ;;  %v9567_v35 = vpop.f32.mrb[150].mxu1 }
 0x297   : > { %v4167_v50 = vadd.f32 %v9132_v22, %v3494_v3  ;;  %6171 = vmatprep.mubr.msk.bf16.mxu0 %vm2890_vm0, %v7330_v33  ;;  %v4578_v25 = vmax.f32 %v4163_v26, 0.0  ;;  %v9569_v27 = vpop.f32.mrb[151].mxu1  ;;  %v7332_v22 = vld [vmem:[%s10346_s1 + $0x28] ss:$16 sps:$4 sm:$0xff]   ;;  %v7333_v3 = vld [vmem:[%s10346_s1 + $0x4c] ss:$16 sps:$4 sm:$0xff]  }
 0x298   : > { %v4579_v57 = vmax.f32 %v4165_v31, 0.0 }
 0x299   : > { %v4580_v56 = vmax.f32 %v4167_v50, 0.0  ;;  %v3497_v29 = vpop.f32.mrb[152].mxu0 }
 0x29a   : > { %v9571_v20 = vpack.c.bf16 %v4579_v57, %v4577_v9  ;;  %v3498_v62 = vadd.f32 %v3497_v29, %v1417_v21  ;;  %v3499_v19 = vpop.f32.mrb[153].mxu0 }
 0x29b   : > { %v9576_v33 = vpack.c.bf16 %v4580_v56, %v4578_v25  ;;  %v3500_v38 = vadd.f32 %v3499_v19, %v1417_v21  ;;  %v3501_v1 = vpop.f32.mrb[154].mxu0  ;;  %v1427_v21 = vpop.permute.xlu0 %1426 }
 0x29c   : > { %10502 = vst [vmem:[#allocation91_spill] sm:$0xff] %v9571_v20  ;;  %v3502_v26 = vadd.f32 %v3501_v1, %v1422_v14  ;;  %v4171_v31 = vadd.f32 %v9153_v4, %v3498_v62  ;;  %v3503_v50 = vpop.f32.mrb[155].mxu0  ;;  %v9584_v20 = vpop.f32.mrb[152].mxu1 }
 0x29d   : > { %10503 = vst [vmem:[#allocation92_spill] sm:$0xff] %v9576_v33  ;;  %v3504_v9 = vadd.f32 %v3503_v50, %v1422_v14  ;;  %v4173_v57 = vadd.f32 %v9156_v11, %v3500_v38  ;;  %v9588_v56 = vpop.f32.mrb[153].mxu1  ;;  %v1432_v33 = vpop.permute.xlu1 %1431 }
 0x29e   : > { %v4175_v29 = vadd.f32 %v9158_v49, %v3502_v26  ;;  %3799 = vmatmul.mubr.bf16.gmra.mrb[4].mxu0 %v7332_v22  ;;  %v4581_v19 = vmax.f32 %v4171_v31, 0.0  ;;  %v9590_v4 = vpop.f32.mrb[154].mxu1 }
 0x29f   : > { %v4177_v25 = vadd.f32 %v9160_v58, %v3504_v9  ;;  %6172 = vmatprep.mubr.msk.bf16.mxu0 %vm2890_vm0, %v7333_v3  ;;  %v4582_v14 = vmax.f32 %v4173_v57, 0.0  ;;  %v9592_v38 = vpop.f32.mrb[155].mxu1  ;;  %v7335_v58 = vld [vmem:[%s10346_s1 + $0x48] ss:$16 sps:$4 sm:$0xff]   ;;  %v7336_v9 = vld [vmem:[%s10346_s1 + $0x6c] ss:$16 sps:$4 sm:$0xff]  }
 0x2a0   : > { %v4583_v1 = vmax.f32 %v4175_v29, 0.0 }
 0x2a1   : > { %v4584_v62 = vmax.f32 %v4177_v25, 0.0  ;;  %v3507_v11 = vpop.f32.mrb[156].mxu0 }
 0x2a2   : > { %v9594_v49 = vpack.c.bf16 %v4583_v1, %v4581_v19  ;;  %v3508_v22 = vadd.f32 %v3507_v11, %v1427_v21  ;;  %v3509_v26 = vpop.f32.mrb[157].mxu0 }
 0x2a3   : > { %v9599_v3 = vpack.c.bf16 %v4584_v62, %v4582_v14  ;;  %v3510_v31 = vadd.f32 %v3509_v26, %v1427_v21  ;;  %v3511_v50 = vpop.f32.mrb[158].mxu0  ;;  %v1437_v21 = vpop.permute.xlu0 %1436 }
 0x2a4   : > { %10504 = vst [vmem:[#allocation93_spill] sm:$0xff] %v9594_v49  ;;  %v3512_v57 = vadd.f32 %v3511_v50, %v1432_v33  ;;  %v4181_v29 = vadd.f32 %v9181_v24, %v3508_v22  ;;  %v3513_v25 = vpop.f32.mrb[159].mxu0  ;;  %v9607_v49 = vpop.f32.mrb[156].mxu1 }
 0x2a5   : > { %10505 = vst [vmem:[#allocation94_spill] sm:$0xff] %v9599_v3  ;;  %v3514_v19 = vadd.f32 %v3513_v25, %v1432_v33  ;;  %v4183_v1 = vadd.f32 %v9184_v44, %v3510_v31  ;;  %v9611_v62 = vpop.f32.mrb[157].mxu1  ;;  %v1442_v3 = vpop.permute.xlu1 %1441 }
 0x2a6   : > { %v4185_v11 = vadd.f32 %v9189_v52, %v3512_v57  ;;  %3809 = vmatmul.mubr.bf16.gmra.mrb[8].mxu0 %v7335_v58  ;;  %v4585_v26 = vmax.f32 %v4181_v29, 0.0  ;;  %v9613_v24 = vpop.f32.mrb[158].mxu1 }
 0x2a7   : > { %v4187_v14 = vadd.f32 %v9191_v63, %v3514_v19  ;;  %6173 = vmatprep.mubr.msk.bf16.mxu0 %vm2890_vm0, %v7336_v9  ;;  %v4586_v33 = vmax.f32 %v4183_v1, 0.0  ;;  %v9615_v31 = vpop.f32.mrb[159].mxu1  ;;  %v7338_v63 = vld [vmem:[%s10346_s1 + $0x68] ss:$16 sps:$4 sm:$0xff]   ;;  %v7339_v19 = vld [vmem:[%s10346_s1 + $0x8c] ss:$16 sps:$4 sm:$0xff]  }
 0x2a8   : > { %v4587_v50 = vmax.f32 %v4185_v11, 0.0  ;;  %10506 = vst [vmem:[#allocation95_spill] sm:$0xff] %v9615_v31 }
 0x2a9   : > { %v4588_v22 = vmax.f32 %v4187_v14, 0.0  ;;  %v3517_v44 = vpop.f32.mrb[160].mxu0  ;;  %v1452_v31 = vpop.permute.xlu1 %1451 }
 0x2aa   : > { %v9617_v52 = vpack.c.bf16 %v4587_v50, %v4585_v26  ;;  %v3518_v58 = vadd.f32 %v3517_v44, %v1437_v21  ;;  %v3519_v57 = vpop.f32.mrb[161].mxu0 }
 0x2ab   : > { %v9622_v9 = vpack.c.bf16 %v4588_v22, %v4586_v33  ;;  %v3520_v29 = vadd.f32 %v3519_v57, %v1437_v21  ;;  %v3521_v25 = vpop.f32.mrb[162].mxu0  ;;  %v10510_v33 = vld [vmem:[#allocation68_spill] sm:$0xff]  ;;  %v1447_v21 = vpop.permute.xlu0 %1446 }
 0x2ac   : > { %10507 = vst [vmem:[#allocation96_spill] sm:$0xff] %v9617_v52  ;;  %v3522_v1 = vadd.f32 %v3521_v25, %v1442_v3  ;;  %v4191_v11 = vadd.f32 %v9212_v42, %v3518_v58  ;;  %v3523_v14 = vpop.f32.mrb[163].mxu0  ;;  %v9630_v52 = vpop.f32.mrb[160].mxu1 }
 0x2ad   : > { %10508 = vst [vmem:[#allocation97_spill] sm:$0xff] %v9622_v9  ;;  %v3524_v26 = vadd.f32 %v3523_v14, %v1442_v3  ;;  %v4193_v50 = vadd.f32 %v9215_v48, %v3520_v29  ;;  %10509 = vst [vmem:[#allocation98_spill] sm:$0xff] %v9630_v52  ;;  %v9634_v57 = vpop.f32.mrb[161].mxu1  ;;  %v1462_v52 = vpop.permute.xlu1 %1461 }
 0x2ae   : > { %v4195_v44 = vadd.f32 %v9220_v13, %v3522_v1  ;;  %3819 = vmatmul.mubr.bf16.gmra.mrb[12].mxu0 %v7338_v63  ;;  %10511 = vst [vmem:[#allocation68_spill] sm:$0xff] %v9634_v57  ;;  %v4589_v9 = vmax.f32 %v4191_v11, 0.0  ;;  %v9636_v42 = vpop.f32.mrb[162].mxu1 }
 0x2af   : > { %v4197_v22 = vadd.f32 %v10510_v33, %v3524_v26  ;;  %6174 = vmatprep.mubr.msk.bf16.mxu0 %vm2890_vm0, %v7339_v19  ;;  %10512 = vst [vmem:[#allocation99_spill] sm:$0xff] %v9636_v42  ;;  %v4590_v3 = vmax.f32 %v4193_v50, 0.0  ;;  %v9638_v29 = vpop.f32.mrb[163].mxu1  ;;  %v7341_v19 = vld [vmem:[%s10346_s1 + $0x88] ss:$16 sps:$4 sm:$0xff]   ;;  %v10516_v33 = vld [vmem:[#allocation27_spill] sm:$0xff] }
 0x2b0   : > { %v4591_v25 = vmax.f32 %v4195_v44, 0.0  ;;  %10513 = vst [vmem:[#allocation100_spill] sm:$0xff] %v9638_v29  ;;  %v7342_v50 = vld [vmem:[%s10346_s1 + $0xac] ss:$16 sps:$4 sm:$0xff]   ;;  %v9653_v57 = vpop.f32.mrb[164].mxu1 }
 0x2b1   : > { %v4592_v58 = vmax.f32 %v4197_v22, 0.0  ;;  %v3527_v48 = vpop.f32.mrb[164].mxu0  ;;  %10519 = vst [vmem:[#allocation27_spill] sm:$0xff] %v9653_v57  ;;  %v1472_v57 = vpop.permute.xlu1 %1471 }
 0x2b2   : > { %v9640_v13 = vpack.c.bf16 %v4591_v25, %v4589_v9  ;;  %v3528_v63 = vadd.f32 %v3527_v48, %v1447_v21  ;;  %v3529_v1 = vpop.f32.mrb[165].mxu0  ;;  %v10517_v25 = vld [vmem:[#allocation28_spill] sm:$0xff] }
 0x2b3   : > { %v9645_v14 = vpack.c.bf16 %v4592_v58, %v4590_v3  ;;  %v3530_v11 = vadd.f32 %v3529_v1, %v1447_v21  ;;  %v3531_v26 = vpop.f32.mrb[166].mxu0  ;;  %v10520_v3 = vld [vmem:[#allocation72_spill] sm:$0xff]  ;;  %v1457_v21 = vpop.permute.xlu0 %1456 }
 0x2b4   : > { %10514 = vst [vmem:[#allocation101_spill] sm:$0xff] %v9640_v13  ;;  %v3532_v44 = vadd.f32 %v3531_v26, %v1452_v31  ;;  %v4201_v22 = vadd.f32 %v10516_v33, %v3528_v63  ;;  %v3533_v29 = vpop.f32.mrb[167].mxu0  ;;  %v10518_v13 = vld [vmem:[#allocation71_spill] sm:$0xff]  ;;  %v9657_v1 = vpop.f32.mrb[165].mxu1 }
 0x2b5   : > { %10515 = vst [vmem:[#allocation102_spill] sm:$0xff] %v9645_v14  ;;  %v3534_v9 = vadd.f32 %v3533_v29, %v1452_v31  ;;  %v4203_v48 = vadd.f32 %v10517_v25, %v3530_v11  ;;  %10521 = vst [vmem:[#allocation28_spill] sm:$0xff] %v9657_v1  ;;  %v9659_v63 = vpop.f32.mrb[166].mxu1  ;;  %v7345_v25 = vld [vmem:[%s10346_s1 + $0xcc] ss:$16 sps:$4 sm:$0xff]  }
 0x2b6   : > { %v4205_v42 = vadd.f32 %v10518_v13, %v3532_v44  ;;  %3829 = vmatmul.mubr.bf16.gmra.mrb[16].mxu0 %v7341_v19  ;;  %v4593_v14 = vmax.f32 %v4201_v22, 0.0  ;;  %10522 = vst [vmem:[#allocation71_spill] sm:$0xff] %v9659_v63  ;;  %v9661_v33 = vpop.f32.mrb[167].mxu1 }
 0x2b7   : > { %v4207_v58 = vadd.f32 %v10520_v3, %v3534_v9  ;;  %6175 = vmatprep.mubr.msk.bf16.mxu0 %vm2890_vm0, %v7342_v50  ;;  %v4594_v31 = vmax.f32 %v4203_v48, 0.0  ;;  %10523 = vst [vmem:[#allocation72_spill] sm:$0xff] %v9661_v33  ;;  %v7344_v50 = vld [vmem:[%s10346_s1 + $0xa8] ss:$16 sps:$4 sm:$0xff]   ;;  %v10526_v3 = vld [vmem:[#allocation31_spill] sm:$0xff] }
 0x2b8   : > { %v4595_v26 = vmax.f32 %v4205_v42, 0.0  ;;  %v9676_v1 = vpop.f32.mrb[168].mxu1 }
 0x2b9   : > { %v4596_v29 = vmax.f32 %v4207_v58, 0.0  ;;  %v3537_v11 = vpop.f32.mrb[168].mxu0  ;;  %10529 = vst [vmem:[#allocation31_spill] sm:$0xff] %v9676_v1  ;;  %v1482_v1 = vpop.permute.xlu1 %1481 }
 0x2ba   : > { %v9663_v13 = vpack.c.bf16 %v4595_v26, %v4593_v14  ;;  %v3538_v19 = vadd.f32 %v3537_v11, %v1457_v21  ;;  %v3539_v44 = vpop.f32.mrb[169].mxu0  ;;  %v10527_v26 = vld [vmem:[#allocation32_spill] sm:$0xff] }
 0x2bb   : > { %v9668_v9 = vpack.c.bf16 %v4596_v29, %v4594_v31  ;;  %v3540_v22 = vadd.f32 %v3539_v44, %v1457_v21  ;;  %v3541_v42 = vpop.f32.mrb[170].mxu0  ;;  %v10530_v31 = vld [vmem:[#allocation34_spill] sm:$0xff]  ;;  %v1467_v21 = vpop.permute.xlu0 %1466 }
 0x2bc   : > { %10524 = vst [vmem:[#allocation103_spill] sm:$0xff] %v9663_v13  ;;  %v3542_v48 = vadd.f32 %v3541_v42, %v1462_v52  ;;  %v4211_v58 = vadd.f32 %v10526_v3, %v3538_v19  ;;  %v3543_v33 = vpop.f32.mrb[171].mxu0  ;;  %v10528_v13 = vld [vmem:[#allocation33_spill] sm:$0xff]  ;;  %v9680_v44 = vpop.f32.mrb[169].mxu1 }
 0x2bd   : > { %10525 = vst [vmem:[#allocation104_spill] sm:$0xff] %v9668_v9  ;;  %v3544_v14 = vadd.f32 %v3543_v33, %v1462_v52  ;;  %v4213_v11 = vadd.f32 %v10527_v26, %v3540_v22  ;;  %10531 = vst [vmem:[#allocation32_spill] sm:$0xff] %v9680_v44  ;;  %v9682_v19 = vpop.f32.mrb[170].mxu1  ;;  %v7348_v26 = vld [vmem:[%s10346_s1 + $0xec] ss:$16 sps:$4 sm:$0xff]  }
 0x2be   : > { %v4215_v63 = vadd.f32 %v10528_v13, %v3542_v48  ;;  %3839 = vmatmul.mubr.bf16.gmra.mrb[20].mxu0 %v7344_v50  ;;  %v4597_v9 = vmax.f32 %v4211_v58, 0.0  ;;  %10532 = vst [vmem:[#allocation33_spill] sm:$0xff] %v9682_v19  ;;  %v9684_v3 = vpop.f32.mrb[171].mxu1 }
 0x2bf   : > { %v4217_v29 = vadd.f32 %v10530_v31, %v3544_v14  ;;  %6176 = vmatprep.mubr.msk.bf16.mxu0 %vm2890_vm0, %v7345_v25  ;;  %v4598_v52 = vmax.f32 %v4213_v11, 0.0  ;;  %10533 = vst [vmem:[#allocation34_spill] sm:$0xff] %v9684_v3  ;;  %v7347_v25 = vld [vmem:[%s10346_s1 + $0xc8] ss:$16 sps:$4 sm:$0xff]   ;;  %v10536_v31 = vld [vmem:[#allocation37_spill] sm:$0xff] }
 0x2c0   : > { %v4599_v42 = vmax.f32 %v4215_v63, 0.0  ;;  %v9699_v44 = vpop.f32.mrb[172].mxu1 }
 0x2c1   : > { %v4600_v33 = vmax.f32 %v4217_v29, 0.0  ;;  %v3547_v22 = vpop.f32.mrb[172].mxu0 }
 0x2c2   : > { %v9686_v13 = vpack.c.bf16 %v4599_v42, %v4597_v9  ;;  %v3548_v50 = vadd.f32 %v3547_v22, %v1467_v21  ;;  %v3549_v48 = vpop.f32.mrb[173].mxu0  ;;  %v10537_v42 = vld [vmem:[#allocation38_spill] sm:$0xff] }
 0x2c3   : > { %v9691_v14 = vpack.c.bf16 %v4600_v33, %v4598_v52  ;;  %v3550_v58 = vadd.f32 %v3549_v48, %v1467_v21  ;;  %v3551_v63 = vpop.f32.mrb[174].mxu0  ;;  %v10539_v52 = vld [vmem:[#allocation41_spill] sm:$0xff]  ;;  %v1477_v21 = vpop.permute.xlu0 %1476 }
 0x2c4   : > { %10534 = vst [vmem:[#allocation105_spill] sm:$0xff] %v9686_v13  ;;  %v3552_v11 = vadd.f32 %v3551_v63, %v1472_v57  ;;  %v4221_v29 = vadd.f32 %v10536_v31, %v3548_v50  ;;  %v3553_v3 = vpop.f32.mrb[175].mxu0  ;;  %v10538_v13 = vld [vmem:[#allocation39_spill] sm:$0xff]  ;;  %v9703_v48 = vpop.f32.mrb[173].mxu1 }
 0x2c5   : > { %10535 = vst [vmem:[#allocation106_spill] sm:$0xff] %v9691_v14  ;;  %v3554_v9 = vadd.f32 %v3553_v3, %v1472_v57  ;;  %v4223_v22 = vadd.f32 %v10537_v42, %v3550_v58  ;;  %v9705_v50 = vpop.f32.mrb[174].mxu1  ;;  %v7351_v42 = vld [vmem:[%s10346_s1 + $0x10c] ss:$16 sps:$4 sm:$0xff]  }
 0x2c6   : > { %v4225_v19 = vadd.f32 %v10538_v13, %v3552_v11  ;;  %3849 = vmatmul.mubr.bf16.gmra.mrb[24].mxu0 %v7347_v25  ;;  %v4601_v14 = vmax.f32 %v4221_v29, 0.0  ;;  %v9707_v31 = vpop.f32.mrb[175].mxu1 }
 0x2c7   : > { %v4227_v33 = vadd.f32 %v10539_v52, %v3554_v9  ;;  %6177 = vmatprep.mubr.msk.bf16.mxu0 %vm2890_vm0, %v7348_v26  ;;  %v4602_v57 = vmax.f32 %v4223_v22, 0.0  ;;  %v7350_v26 = vld [vmem:[%s10346_s1 + $0xe8] ss:$16 sps:$4 sm:$0xff]  }
 0x2c8   : > { %v4603_v63 = vmax.f32 %v4225_v19, 0.0 }
 0x2c9   : > { %v4604_v3 = vmax.f32 %v4227_v33, 0.0  ;;  %v3557_v58 = vpop.f32.mrb[176].mxu0 }
 0x2ca   : > { %v9709_v13 = vpack.c.bf16 %v4603_v63, %v4601_v14  ;;  %v3558_v25 = vadd.f32 %v3557_v58, %v1477_v21  ;;  %v3559_v11 = vpop.f32.mrb[177].mxu0 }
 0x2cb   : > { %v9714_v9 = vpack.c.bf16 %v4604_v3, %v4602_v57  ;;  %v3560_v29 = vadd.f32 %v3559_v11, %v1477_v21  ;;  %v3561_v19 = vpop.f32.mrb[178].mxu0  ;;  %v1487_v21 = vpop.permute.xlu0 %1486 }
 0x2cc   : > { %10540 = vst [vmem:[#allocation37_spill] sm:$0xff] %v9709_v13  ;;  %v3562_v22 = vadd.f32 %v3561_v19, %v1482_v1  ;;  %v4231_v52 = vadd.f32 %v9336_v51, %v3558_v25  ;;  %v3563_v33 = vpop.f32.mrb[179].mxu0  ;;  %v9722_v13 = vpop.f32.mrb[176].mxu1 }
 0x2cd   : > { %10541 = vst [vmem:[#allocation38_spill] sm:$0xff] %v9714_v9  ;;  %v3564_v14 = vadd.f32 %v3563_v33, %v1482_v1  ;;  %v4233_v63 = vadd.f32 %v9339_v23, %v3560_v29  ;;  %v9726_v3 = vpop.f32.mrb[177].mxu1  ;;  %v1492_v9 = vpop.permute.xlu1 %1491 }
 0x2ce   : > { %v4235_v58 = vadd.f32 %v9344_v54, %v3562_v22  ;;  %3859 = vmatmul.mubr.bf16.gmra.mrb[28].mxu0 %v7350_v26  ;;  %v4605_v11 = vmax.f32 %v4231_v52, 0.0  ;;  %v9728_v51 = vpop.f32.mrb[178].mxu1 }
 0x2cf   : > { %v4237_v57 = vadd.f32 %v9346_v7, %v3564_v14  ;;  %6178 = vmatprep.mubr.msk.bf16.mxu0 %vm2890_vm0, %v7351_v42  ;;  %v4606_v1 = vmax.f32 %v4233_v63, 0.0  ;;  %v9730_v29 = vpop.f32.mrb[179].mxu1  ;;  %v7353_v7 = vld [vmem:[%s10346_s1 + $0x108] ss:$16 sps:$4 sm:$0xff]   ;;  %v7354_v14 = vld [vmem:[%s10346_s1 + $0x12c] ss:$16 sps:$4 sm:$0xff]  }
 0x2d0   : > { %v4607_v19 = vmax.f32 %v4235_v58, 0.0 }
 0x2d1   : > { %v4608_v25 = vmax.f32 %v4237_v57, 0.0  ;;  %v3567_v23 = vpop.f32.mrb[180].mxu0 }
 0x2d2   : > { %v9732_v54 = vpack.c.bf16 %v4607_v19, %v4605_v11  ;;  %v3568_v26 = vadd.f32 %v3567_v23, %v1487_v21  ;;  %v3569_v22 = vpop.f32.mrb[181].mxu0 }
 0x2d3   : > { %v9737_v42 = vpack.c.bf16 %v4608_v25, %v4606_v1  ;;  %v3570_v52 = vadd.f32 %v3569_v22, %v1487_v21  ;;  %v3571_v33 = vpop.f32.mrb[182].mxu0  ;;  %v1497_v21 = vpop.permute.xlu0 %1496 }
 0x2d4   : > { %10542 = vst [vmem:[#allocation39_spill] sm:$0xff] %v9732_v54  ;;  %v3572_v63 = vadd.f32 %v3571_v33, %v1492_v9  ;;  %v4241_v58 = vadd.f32 %v9367_v2, %v3568_v26  ;;  %v3573_v57 = vpop.f32.mrb[183].mxu0  ;;  %v9745_v54 = vpop.f32.mrb[180].mxu1 }
 0x2d5   : > { %10543 = vst [vmem:[#allocation41_spill] sm:$0xff] %v9737_v42  ;;  %v3574_v11 = vadd.f32 %v3573_v57, %v1492_v9  ;;  %v4243_v19 = vadd.f32 %v9370_v41, %v3570_v52  ;;  %v9749_v25 = vpop.f32.mrb[181].mxu1  ;;  %v1502_v42 = vpop.permute.xlu1 %1501 }
 0x2d6   : > { %v4245_v23 = vadd.f32 %v9375_v60, %v3572_v63  ;;  %3869 = vmatmul.mubr.bf16.gmra.mrb[32].mxu0 %v7353_v7  ;;  %v4609_v22 = vmax.f32 %v4241_v58, 0.0  ;;  %v9751_v2 = vpop.f32.mrb[182].mxu1 }
 0x2d7   : > { %v4247_v1 = vadd.f32 %v9377_v53, %v3574_v11  ;;  %6179 = vmatprep.mubr.msk.bf16.mxu0 %vm2890_vm0, %v7354_v14  ;;  %v4610_v9 = vmax.f32 %v4243_v19, 0.0  ;;  %v9753_v52 = vpop.f32.mrb[183].mxu1  ;;  %v7356_v53 = vld [vmem:[%s10346_s1 + $0x128] ss:$16 sps:$4 sm:$0xff]   ;;  %v7357_v11 = vld [vmem:[%s10346_s1 + $0x14c] ss:$16 sps:$4 sm:$0xff]  }
 0x2d8   : > { %v4611_v33 = vmax.f32 %v4245_v23, 0.0 }
 0x2d9   : > { %v4612_v26 = vmax.f32 %v4247_v1, 0.0  ;;  %v3577_v41 = vpop.f32.mrb[184].mxu0 }
 0x2da   : > { %v9755_v60 = vpack.c.bf16 %v4611_v33, %v4609_v22  ;;  %v3578_v7 = vadd.f32 %v3577_v41, %v1497_v21  ;;  %v3579_v63 = vpop.f32.mrb[185].mxu0 }
 0x2db   : > { %v9760_v14 = vpack.c.bf16 %v4612_v26, %v4610_v9  ;;  %v3580_v58 = vadd.f32 %v3579_v63, %v1497_v21  ;;  %v3581_v57 = vpop.f32.mrb[186].mxu0  ;;  %v1507_v21 = vpop.permute.xlu0 %1506 }
 0x2dc   : > { %10544 = vst [vmem:[#allocation107_spill] sm:$0xff] %v9755_v60  ;;  %v3582_v19 = vadd.f32 %v3581_v57, %v1502_v42  ;;  %v4251_v23 = vadd.f32 %v9398_v37, %v3578_v7  ;;  %v3583_v1 = vpop.f32.mrb[187].mxu0  ;;  %v9768_v60 = vpop.f32.mrb[184].mxu1 }
 0x2dd   : > { %10545 = vst [vmem:[#allocation108_spill] sm:$0xff] %v9760_v14  ;;  %v3584_v22 = vadd.f32 %v3583_v1, %v1502_v42  ;;  %v4253_v33 = vadd.f32 %v9401_v39, %v3580_v58  ;;  %v9772_v26 = vpop.f32.mrb[185].mxu1  ;;  %v1512_v14 = vpop.permute.xlu1 %1511 }
 0x2de   : > { %v4255_v41 = vadd.f32 %v9406_v28, %v3582_v19  ;;  %3879 = vmatmul.mubr.bf16.gmra.mrb[36].mxu0 %v7356_v53  ;;  %v4613_v63 = vmax.f32 %v4251_v23, 0.0  ;;  %v9774_v37 = vpop.f32.mrb[186].mxu1 }
 0x2df   : > { %v4257_v9 = vadd.f32 %v9408_v34, %v3584_v22  ;;  %6180 = vmatprep.mubr.msk.bf16.mxu0 %vm2890_vm0, %v7357_v11  ;;  %v4614_v42 = vmax.f32 %v4253_v33, 0.0  ;;  %v9776_v58 = vpop.f32.mrb[187].mxu1  ;;  %v7359_v34 = vld [vmem:[%s10346_s1 + $0x148] ss:$16 sps:$4 sm:$0xff]   ;;  %v7360_v22 = vld [vmem:[%s10346_s1 + $0x16c] ss:$16 sps:$4 sm:$0xff]  }
 0x2e0   : > { %v4615_v57 = vmax.f32 %v4255_v41, 0.0 }
 0x2e1   : > { %v4616_v7 = vmax.f32 %v4257_v9, 0.0  ;;  %v3587_v39 = vpop.f32.mrb[188].mxu0 }
 0x2e2   : > { %v9778_v28 = vpack.c.bf16 %v4615_v57, %v4613_v63  ;;  %v3588_v53 = vadd.f32 %v3587_v39, %v1507_v21  ;;  %v3589_v19 = vpop.f32.mrb[189].mxu0 }
 0x2e3   : > { %v9783_v11 = vpack.c.bf16 %v4616_v7, %v4614_v42  ;;  %v3590_v23 = vadd.f32 %v3589_v19, %v1507_v21  ;;  %v3591_v1 = vpop.f32.mrb[190].mxu0  ;;  %v1517_v21 = vpop.permute.xlu0 %1516 }
 0x2e4   : > { %10546 = vst [vmem:[#allocation109_spill] sm:$0xff] %v9778_v28  ;;  %v3592_v33 = vadd.f32 %v3591_v1, %v1512_v14  ;;  %v4261_v41 = vadd.f32 %v9432_v40, %v3588_v53  ;;  %v3593_v9 = vpop.f32.mrb[191].mxu0  ;;  %v9791_v28 = vpop.f32.mrb[188].mxu1 }
 0x2e5   : > { %10547 = vst [vmem:[#allocation110_spill] sm:$0xff] %v9783_v11  ;;  %v3594_v63 = vadd.f32 %v3593_v9, %v1512_v14  ;;  %v4263_v57 = vadd.f32 %v9435_v12, %v3590_v23  ;;  %v9795_v7 = vpop.f32.mrb[189].mxu1  ;;  %v1522_v11 = vpop.permute.xlu1 %1521 }
 0x2e6   : > { %v4265_v39 = vadd.f32 %v9437_v0, %v3592_v33  ;;  %3889 = vmatmul.mubr.bf16.gmra.mrb[40].mxu0 %v7359_v34  ;;  %v4617_v19 = vmax.f32 %v4261_v41, 0.0  ;;  %v9797_v40 = vpop.f32.mrb[190].mxu1 }
 0x2e7   : > { %v4267_v42 = vadd.f32 %v9439_v45, %v3594_v63  ;;  %6181 = vmatprep.mubr.msk.bf16.mxu0 %vm2890_vm0, %v7360_v22  ;;  %v4618_v14 = vmax.f32 %v4263_v57, 0.0  ;;  %v9799_v23 = vpop.f32.mrb[191].mxu1  ;;  %v7362_v45 = vld [vmem:[%s10346_s1 + $0x168] ss:$16 sps:$4 sm:$0xff]   ;;  %v7363_v63 = vld [vmem:[%s10346_s1 + $0x18c] ss:$16 sps:$4 sm:$0xff]  }
 0x2e8   : > { %v4619_v1 = vmax.f32 %v4265_v39, 0.0 }
 0x2e9   : > { %v4620_v53 = vmax.f32 %v4267_v42, 0.0  ;;  %v3597_v12 = vpop.f32.mrb[192].mxu0 }
 0x2ea   : > { %v9801_v0 = vpack.c.bf16 %v4619_v1, %v4617_v19  ;;  %v3598_v34 = vadd.f32 %v3597_v12, %v1517_v21  ;;  %v3599_v33 = vpop.f32.mrb[193].mxu0 }
 0x2eb   : > { %v9806_v22 = vpack.c.bf16 %v4620_v53, %v4618_v14  ;;  %v3600_v41 = vadd.f32 %v3599_v33, %v1517_v21  ;;  %v3601_v9 = vpop.f32.mrb[194].mxu0  ;;  %v1527_v21 = vpop.permute.xlu0 %1526 }
 0x2ec   : > { %10548 = vst [vmem:[#allocation111_spill] sm:$0xff] %v9801_v0  ;;  %v3602_v57 = vadd.f32 %v3601_v9, %v1522_v11  ;;  %v4271_v39 = vadd.f32 %v9460_v36, %v3598_v34  ;;  %v3603_v42 = vpop.f32.mrb[195].mxu0  ;;  %v9814_v0 = vpop.f32.mrb[192].mxu1 }
 0x2ed   : > { %10549 = vst [vmem:[#allocation112_spill] sm:$0xff] %v9806_v22  ;;  %v3604_v19 = vadd.f32 %v3603_v42, %v1522_v11  ;;  %v4273_v1 = vadd.f32 %v9463_v8, %v3600_v41  ;;  %v9818_v53 = vpop.f32.mrb[193].mxu1  ;;  %v1532_v22 = vpop.permute.xlu1 %1531 }
 0x2ee   : > { %v4275_v12 = vadd.f32 %v9465_v6, %v3602_v57  ;;  %3899 = vmatmul.mubr.bf16.gmra.mrb[44].mxu0 %v7362_v45  ;;  %v4621_v33 = vmax.f32 %v4271_v39, 0.0  ;;  %v9820_v36 = vpop.f32.mrb[194].mxu1 }
 0x2ef   : > { %v4277_v14 = vadd.f32 %v9467_v15, %v3604_v19  ;;  %6182 = vmatprep.mubr.msk.bf16.mxu0 %vm2890_vm0, %v7363_v63  ;;  %10550 = vst [vmem:[#allocation113_spill] sm:$0xff] %v9820_v36  ;;  %v4622_v11 = vmax.f32 %v4273_v1, 0.0  ;;  %v9822_v41 = vpop.f32.mrb[195].mxu1  ;;  %v7365_v15 = vld [vmem:[%s10346_s1 + $0x188] ss:$16 sps:$4 sm:$0xff]  }
 0x2f0   : > { %v4623_v9 = vmax.f32 %v4275_v12, 0.0  ;;  %10551 = vst [vmem:[#allocation114_spill] sm:$0xff] %v9822_v41  ;;  %v7366_v19 = vld [vmem:[%s10346_s1 + $0x1ac] ss:$16 sps:$4 sm:$0xff]  }
 0x2f1   : > { %v4624_v34 = vmax.f32 %v4277_v14, 0.0  ;;  %v3607_v8 = vpop.f32.mrb[196].mxu0 }
 0x2f2   : > { %v9824_v6 = vpack.c.bf16 %v4623_v9, %v4621_v33  ;;  %v3608_v45 = vadd.f32 %v3607_v8, %v1527_v21  ;;  %v3609_v57 = vpop.f32.mrb[197].mxu0 }
 0x2f3   : > { %v9829_v63 = vpack.c.bf16 %v4624_v34, %v4622_v11  ;;  %v3610_v39 = vadd.f32 %v3609_v57, %v1527_v21  ;;  %v3611_v42 = vpop.f32.mrb[198].mxu0  ;;  %v1537_v11 = vpop.permute.xlu0 %1536 }
 0x2f4   : > { %10552 = vst [vmem:[#allocation115_spill] sm:$0xff] %v9824_v6  ;;  %v3612_v1 = vadd.f32 %v3611_v42, %v1532_v22  ;;  %v4281_v12 = vadd.f32 %v9488_v43, %v3608_v45  ;;  %v3613_v14 = vpop.f32.mrb[199].mxu0  ;;  %v1542_v42 = vpop.permute.xlu1 %1541 }
 0x2f5   : > { %10553 = vst [vmem:[#allocation116_spill] sm:$0xff] %v9829_v63  ;;  %v3614_v33 = vadd.f32 %v3613_v14, %v1532_v22  ;;  %v4283_v9 = vadd.f32 %v9491_v47, %v3610_v39  ;;  %v10554_v14 = vld [vmem:[#allocation87_spill] sm:$0xff] }
 0x2f6   : > { %v4285_v8 = vadd.f32 %v9493_v32, %v3612_v1  ;;  %3909 = vmatmul.mubr.bf16.gmra.mrb[48].mxu0 %v7365_v15  ;;  %v4625_v21 = vmax.f32 %v4281_v12, 0.0  ;;  %v7368_v32 = vld [vmem:[%s10346_s1 + $0x1a8] ss:$16 sps:$4 sm:$0xff]   ;;  %v7369_v15 = vld [vmem:[%s10346_s1 + $0x1cc] ss:$16 sps:$4 sm:$0xff]  }
 0x2f7   : > { %v4287_v6 = vadd.f32 %v9495_v59, %v3614_v33  ;;  %6183 = vmatprep.mubr.msk.bf16.mxu0 %vm2890_vm0, %v7366_v19  ;;  %v4626_v57 = vmax.f32 %v4283_v9, 0.0 }
 0x2f8   : > { %v4627_v34 = vmax.f32 %v4285_v8, 0.0 }
 0x2f9   : > { %v4628_v63 = vmax.f32 %v4287_v6, 0.0  ;;  %v3617_v41 = vpop.f32.mrb[200].mxu0 }
 0x2fa   : > { %v9839_v36 = vpack.c.bf16 %v4627_v34, %v4625_v21  ;;  %v3618_v43 = vadd.f32 %v3617_v41, %v1537_v11  ;;  %v3619_v22 = vpop.f32.mrb[201].mxu0 }
 0x2fb   : > { %v9844_v47 = vpack.c.bf16 %v4628_v63, %v4626_v57  ;;  %v3620_v59 = vadd.f32 %v3619_v22, %v1537_v11  ;;  %v3621_v45 = vpop.f32.mrb[202].mxu0  ;;  %v1547_v63 = vpop.permute.xlu0 %1546 }
 0x2fc   : > { %v3622_v39 = vadd.f32 %v3621_v45, %v1542_v42  ;;  %v4291_v6 = vadd.f32 %v9516_v10, %v3618_v43  ;;  %v3623_v19 = vpop.f32.mrb[203].mxu0  ;;  %v1552_v57 = vpop.permute.xlu1 %1551 }
 0x2fd   : > { %v3624_v1 = vadd.f32 %v3623_v19, %v1542_v42  ;;  %v4293_v41 = vadd.f32 %v9519_v55, %v3620_v59 }
 0x2fe   : > { %v4295_v12 = vadd.f32 %v9521_v17, %v3622_v39  ;;  %3919 = vmatmul.mubr.bf16.gmra.mrb[52].mxu0 %v7368_v32  ;;  %v4629_v9 = vmax.f32 %v4291_v6, 0.0  ;;  %v7371_v17 = vld [vmem:[%s10346_s1 + $0x1c8] ss:$16 sps:$4 sm:$0xff]  }
 0x2ff   : > { %v4297_v33 = vadd.f32 %v10554_v14, %v3624_v1  ;;  %6184 = vmatprep.mubr.msk.bf16.mxu0 %vm2890_vm0, %v7369_v15  ;;  %v4630_v11 = vmax.f32 %v4293_v41, 0.0  ;;  %v1557_v41 = vpop.permute.xlu0 %1556 }
 0x300   : > { %v4631_v8 = vmax.f32 %v4295_v12, 0.0 }
 0x301   : > { %v4632_v21 = vmax.f32 %v4297_v33, 0.0  ;;  %v3627_v34 = vpop.f32.mrb[204].mxu0 }
 0x302   : > { %v9854_v22 = vpack.c.bf16 %v4631_v8, %v4629_v9  ;;  %v3628_v10 = vadd.f32 %v3627_v34, %v1547_v63  ;;  %v3629_v42 = vpop.f32.mrb[205].mxu0 }
 0x303   : > { %v9859_v55 = vpack.c.bf16 %v4632_v21, %v4630_v11  ;;  %v3630_v43 = vadd.f32 %v3629_v42, %v1547_v63  ;;  %v3631_v32 = vpop.f32.mrb[206].mxu0  ;;  %v1562_v63 = vpop.permute.xlu1 %1561 }
 0x304   : > { %v3632_v59 = vadd.f32 %v3631_v32, %v1552_v57  ;;  %v4301_v45 = vadd.f32 %v9538_v46, %v3628_v10  ;;  %v3633_v15 = vpop.f32.mrb[207].mxu0 }
 0x305   : > { %v3634_v39 = vadd.f32 %v3633_v15, %v1552_v57  ;;  %v4303_v6 = vadd.f32 %v9542_v30, %v3630_v43 }
 0x306   : > { %v4305_v19 = vadd.f32 %v9544_v5, %v3632_v59  ;;  %3929 = vmatmul.mubr.bf16.gmra.mrb[56].mxu0 %v7371_v17  ;;  %v4633_v12 = vmax.f32 %v4301_v45, 0.0  ;;  %v1567_v59 = vpop.permute.xlu0 %1566 }
 0x307   : > { %v4307_v1 = vadd.f32 %v9546_v18, %v3634_v39  ;;  %v4634_v33 = vmax.f32 %v4303_v6, 0.0 }
 0x308   : > { %v4635_v14 = vmax.f32 %v4305_v19, 0.0 }
 0x309   : > { %v4636_v9 = vmax.f32 %v4307_v1, 0.0  ;;  %v3637_v8 = vpop.f32.mrb[208].mxu0  ;;  %v1572_v1 = vpop.permute.xlu1 %1571 }
 0x30a   : > { %v9865_v11 = vpack.c.bf16 %v4635_v14, %v4633_v12  ;;  %v3638_v21 = vadd.f32 %v3637_v8, %v1557_v41  ;;  %v3639_v46 = vpop.f32.mrb[209].mxu0 }
 0x30b   : > { %v9867_v34 = vpack.c.bf16 %v4636_v9, %v4634_v33  ;;  %v3640_v57 = vadd.f32 %v3639_v46, %v1557_v41  ;;  %v3641_v30 = vpop.f32.mrb[210].mxu0 }
 0x30c   : > { %v3642_v10 = vadd.f32 %v3641_v30, %v1562_v63  ;;  %v4311_v5 = vadd.f32 %v9561_v16, %v3638_v21  ;;  %v3643_v42 = vpop.f32.mrb[211].mxu0 }
 0x30d   : > { %v3644_v18 = vadd.f32 %v3643_v42, %v1562_v63  ;;  %v4313_v17 = vadd.f32 %v9565_v61, %v3640_v57  ;;  %v1577_v57 = vpop.permute.xlu0 %1576 }
 0x30e   : > { %v4315_v43 = vadd.f32 %v9567_v35, %v3642_v10  ;;  %v4637_v45 = vmax.f32 %v4311_v5, 0.0 }
 0x30f   : > { %v4317_v32 = vadd.f32 %v9569_v27, %v3644_v18  ;;  %v4638_v39 = vmax.f32 %v4313_v17, 0.0  ;;  %v1582_v17 = vpop.permute.xlu1 %1581 }
 0x310   : > { %v4639_v15 = vmax.f32 %v4315_v43, 0.0 }
 0x311   : > { %v4640_v6 = vmax.f32 %v4317_v32, 0.0  ;;  %v3647_v19 = vpop.f32.mrb[212].mxu0 }
 0x312   : > { %v9873_v41 = vpack.c.bf16 %v4639_v15, %v4637_v45  ;;  %v3648_v12 = vadd.f32 %v3647_v19, %v1567_v59  ;;  %v3649_v14 = vpop.f32.mrb[213].mxu0 }
 0x313   : > { %v9875_v16 = vpack.c.bf16 %v4640_v6, %v4638_v39  ;;  %v3650_v33 = vadd.f32 %v3649_v14, %v1567_v59  ;;  %v3651_v9 = vpop.f32.mrb[214].mxu0  ;;  %v1587_v14 = vpop.permute.xlu0 %1586 }
 0x314   : > { %v3652_v61 = vadd.f32 %v3651_v9, %v1572_v1  ;;  %v4321_v35 = vadd.f32 %v9584_v20, %v3648_v12  ;;  %v3653_v8 = vpop.f32.mrb[215].mxu0 }
 0x315   : > { %v3654_v27 = vadd.f32 %v3653_v8, %v1572_v1  ;;  %v4323_v63 = vadd.f32 %v9588_v56, %v3650_v33  ;;  %v10555_v1 = vld [vmem:[#allocation95_spill] sm:$0xff] }
 0x316   : > { %v4325_v21 = vadd.f32 %v9590_v4, %v3652_v61  ;;  %v4641_v30 = vmax.f32 %v4321_v35, 0.0 }
 0x317   : > { %v4327_v46 = vadd.f32 %v9592_v38, %v3654_v27  ;;  %v4642_v5 = vmax.f32 %v4323_v63, 0.0  ;;  %v1592_v27 = vpop.permute.xlu1 %1591 }
 0x318   : > { %v4643_v10 = vmax.f32 %v4325_v21, 0.0 }
 0x319   : > { %v4644_v42 = vmax.f32 %v4327_v46, 0.0  ;;  %v3657_v18 = vpop.f32.mrb[216].mxu0 }
 0x31a   : > { %v9881_v43 = vpack.c.bf16 %v4643_v10, %v4641_v30  ;;  %v3658_v32 = vadd.f32 %v3657_v18, %v1577_v57  ;;  %v3659_v59 = vpop.f32.mrb[217].mxu0  ;;  %v10556_v10 = vld [vmem:[#allocation98_spill] sm:$0xff]  ;;  %v10557_v18 = vld [vmem:[#allocation68_spill] sm:$0xff] }
 0x31b   : > { %v9883_v20 = vpack.c.bf16 %v4644_v42, %v4642_v5  ;;  %v3660_v45 = vadd.f32 %v3659_v59, %v1577_v57  ;;  %v3661_v15 = vpop.f32.mrb[218].mxu0 }
 0x31c   : > { %v3662_v56 = vadd.f32 %v3661_v15, %v1582_v17  ;;  %v4331_v4 = vadd.f32 %v9607_v49, %v3658_v32  ;;  %v3663_v39 = vpop.f32.mrb[219].mxu0  ;;  %v10558_v32 = vld [vmem:[#allocation99_spill] sm:$0xff] }
 0x31d   : > { %v3664_v38 = vadd.f32 %v3663_v39, %v1582_v17  ;;  %v4333_v6 = vadd.f32 %v9611_v62, %v3660_v45  ;;  %v10559_v45 = vld [vmem:[#allocation100_spill] sm:$0xff] }
 0x31e   : > { %v4335_v19 = vadd.f32 %v9613_v24, %v3662_v56  ;;  %v4645_v33 = vmax.f32 %v4331_v4, 0.0  ;;  %v1597_v56 = vpop.permute.xlu0 %1596 }
 0x31f   : > { %v4337_v12 = vadd.f32 %v10555_v1, %v3664_v38  ;;  %v4646_v61 = vmax.f32 %v4333_v6, 0.0  ;;  %v1602_v1 = vpop.permute.xlu1 %1601 }
 0x320   : > { %v4647_v9 = vmax.f32 %v4335_v19, 0.0 }
 0x321   : > { %v4648_v35 = vmax.f32 %v4337_v12, 0.0  ;;  %v3667_v8 = vpop.f32.mrb[220].mxu0 }
 0x322   : > { %v9889_v63 = vpack.c.bf16 %v4647_v9, %v4645_v33  ;;  %v3668_v21 = vadd.f32 %v3667_v8, %v1587_v14  ;;  %v3669_v46 = vpop.f32.mrb[221].mxu0 }
 0x323   : > { %v9891_v49 = vpack.c.bf16 %v4648_v35, %v4646_v61  ;;  %v3670_v57 = vadd.f32 %v3669_v46, %v1587_v14  ;;  %v3671_v30 = vpop.f32.mrb[222].mxu0 }
 0x324   : > { %v3672_v62 = vadd.f32 %v3671_v30, %v1592_v27  ;;  %v4341_v24 = vadd.f32 %v10556_v10, %v3668_v21  ;;  %v3673_v5 = vpop.f32.mrb[223].mxu0  ;;  %v10561_v30 = vld [vmem:[#allocation28_spill] sm:$0xff]  ;;  %v10562_v10 = vld [vmem:[#allocation71_spill] sm:$0xff] }
 0x325   : > { %v3674_v42 = vadd.f32 %v3673_v5, %v1592_v27  ;;  %v4343_v17 = vadd.f32 %v10557_v18, %v3670_v57  ;;  %v10560_v27 = vld [vmem:[#allocation27_spill] sm:$0xff]  ;;  %v1607_v5 = vpop.permute.xlu0 %1606 }
 0x326   : > { %v4345_v59 = vadd.f32 %v10558_v32, %v3672_v62  ;;  %v4649_v4 = vmax.f32 %v4341_v24, 0.0 }
 0x327   : > { %v4347_v15 = vadd.f32 %v10559_v45, %v3674_v42  ;;  %v4650_v38 = vmax.f32 %v4343_v17, 0.0  ;;  %v10563_v42 = vld [vmem:[#allocation72_spill] sm:$0xff] }
 0x328   : > { %v4651_v39 = vmax.f32 %v4345_v59, 0.0 }
 0x329   : > { %v4652_v6 = vmax.f32 %v4347_v15, 0.0  ;;  %v3677_v19 = vpop.f32.mrb[224].mxu0 }
 0x32a   : > { %v9897_v12 = vpack.c.bf16 %v4651_v39, %v4649_v4  ;;  %v3678_v14 = vadd.f32 %v3677_v19, %v1597_v56  ;;  %v3679_v33 = vpop.f32.mrb[225].mxu0  ;;  %v1612_v4 = vpop.permute.xlu1 %1611 }
 0x32b   : > { %v9899_v9 = vpack.c.bf16 %v4652_v6, %v4650_v38  ;;  %v3680_v61 = vadd.f32 %v3679_v33, %v1597_v56  ;;  %v3681_v35 = vpop.f32.mrb[226].mxu0  ;;  %v10564_v33 = vld [vmem:[#allocation31_spill] sm:$0xff] }
 0x32c   : > { %v3682_v8 = vadd.f32 %v3681_v35, %v1602_v1  ;;  %v4351_v21 = vadd.f32 %v10560_v27, %v3678_v14  ;;  %v3683_v46 = vpop.f32.mrb[227].mxu0  ;;  %v10565_v27 = vld [vmem:[#allocation32_spill] sm:$0xff] }
 0x32d   : > { %v3684_v57 = vadd.f32 %v3683_v46, %v1602_v1  ;;  %v4353_v62 = vadd.f32 %v10561_v30, %v3680_v61  ;;  %v10566_v46 = vld [vmem:[#allocation33_spill] sm:$0xff]  ;;  %v1617_v30 = vpop.permute.xlu0 %1616 }
 0x32e   : > { %v4355_v24 = vadd.f32 %v10562_v10, %v3682_v8  ;;  %v4653_v17 = vmax.f32 %v4351_v21, 0.0 }
 0x32f   : > { %v4357_v18 = vadd.f32 %v10563_v42, %v3684_v57  ;;  %v4654_v59 = vmax.f32 %v4353_v62, 0.0  ;;  %v10567_v62 = vld [vmem:[#allocation34_spill] sm:$0xff] }
 0x330   : > { %v4655_v32 = vmax.f32 %v4355_v24, 0.0 }
 0x331   : > { %v4656_v45 = vmax.f32 %v4357_v18, 0.0  ;;  %v3687_v15 = vpop.f32.mrb[228].mxu0 }
 0x332   : > { %v9905_v56 = vpack.c.bf16 %v4655_v32, %v4653_v17  ;;  %v3688_v39 = vadd.f32 %v3687_v15, %v1607_v5  ;;  %v3689_v38 = vpop.f32.mrb[229].mxu0 }
 0x333   : > { %v9907_v6 = vpack.c.bf16 %v4656_v45, %v4654_v59  ;;  %v3690_v19 = vadd.f32 %v3689_v38, %v1607_v5  ;;  %v3691_v1 = vpop.f32.mrb[230].mxu0  ;;  %v1622_v59 = vpop.permute.xlu1 %1621 }
 0x334   : > { %v3692_v14 = vadd.f32 %v3691_v1, %v1612_v4  ;;  %v4361_v61 = vadd.f32 %v10564_v33, %v3688_v39  ;;  %v3693_v35 = vpop.f32.mrb[231].mxu0 }
 0x335   : > { %v3694_v8 = vadd.f32 %v3693_v35, %v1612_v4  ;;  %v4363_v21 = vadd.f32 %v10565_v27, %v3690_v19 }
 0x336   : > { %v4365_v57 = vadd.f32 %v10566_v46, %v3692_v14  ;;  %v4657_v24 = vmax.f32 %v4361_v61, 0.0 }
 0x337   : > { %v4367_v10 = vadd.f32 %v10567_v62, %v3694_v8  ;;  %v4658_v18 = vmax.f32 %v4363_v21, 0.0  ;;  %v1627_v8 = vpop.permute.xlu0 %1626 }
 0x338   : > { %v4659_v42 = vmax.f32 %v4365_v57, 0.0 }
 0x339   : > { %v4660_v17 = vmax.f32 %v4367_v10, 0.0  ;;  %v3697_v32 = vpop.f32.mrb[232].mxu0 }
 0x33a   : > { %v9913_v5 = vpack.c.bf16 %v4659_v42, %v4657_v24  ;;  %v3698_v45 = vadd.f32 %v3697_v32, %v1617_v30  ;;  %v3699_v15 = vpop.f32.mrb[233].mxu0  ;;  %v1632_v24 = vpop.permute.xlu1 %1631 }
 0x33b   : > { %v9915_v39 = vpack.c.bf16 %v4660_v17, %v4658_v18  ;;  %v3700_v4 = vadd.f32 %v3699_v15, %v1617_v30  ;;  %v3701_v38 = vpop.f32.mrb[234].mxu0 }
 0x33c   : > { %v3702_v19 = vadd.f32 %v3701_v38, %v1622_v59  ;;  %v4371_v1 = vadd.f32 %v9699_v44, %v3698_v45  ;;  %v3703_v14 = vpop.f32.mrb[235].mxu0 }
 0x33d   : > { %v3704_v33 = vadd.f32 %v3703_v14, %v1622_v59  ;;  %v4373_v61 = vadd.f32 %v9703_v48, %v3700_v4  ;;  %v1637_v4 = vpop.permute.xlu0 %1636 }
 0x33e   : > { %v4375_v35 = vadd.f32 %v9705_v50, %v3702_v19  ;;  %v4661_v21 = vmax.f32 %v4371_v1, 0.0 }
 0x33f   : > { %v4377_v27 = vadd.f32 %v9707_v31, %v3704_v33  ;;  %v4662_v57 = vmax.f32 %v4373_v61, 0.0 }
 0x340   : > { %v4663_v46 = vmax.f32 %v4375_v35, 0.0  ;;  %v1642_v35 = vpop.permute.xlu1 %1641 }
 0x341   : > { %v4664_v62 = vmax.f32 %v4377_v27, 0.0  ;;  %v3707_v10 = vpop.f32.mrb[236].mxu0 }
 0x342   : > { %v9921_v30 = vpack.c.bf16 %v4663_v46, %v4661_v21  ;;  %v3708_v42 = vadd.f32 %v3707_v10, %v1627_v8  ;;  %v3709_v18 = vpop.f32.mrb[237].mxu0 }
 0x343   : > { %v9923_v44 = vpack.c.bf16 %v4664_v62, %v4662_v57  ;;  %v3710_v17 = vadd.f32 %v3709_v18, %v1627_v8  ;;  %v3711_v32 = vpop.f32.mrb[238].mxu0 }
 0x344   : > { %v3712_v48 = vadd.f32 %v3711_v32, %v1632_v24  ;;  %v4381_v50 = vadd.f32 %v9722_v13, %v3708_v42  ;;  %v3713_v59 = vpop.f32.mrb[239].mxu0  ;;  %v1647_v42 = vpop.permute.xlu0 %1646 }
 0x345   : > { %v3714_v45 = vadd.f32 %v3713_v59, %v1632_v24  ;;  %v4383_v31 = vadd.f32 %v9726_v3, %v3710_v17 }
 0x346   : > { %v4385_v15 = vadd.f32 %v9728_v51, %v3712_v48  ;;  %v4665_v19 = vmax.f32 %v4381_v50, 0.0 }
 0x347   : > { %v4387_v38 = vadd.f32 %v9730_v29, %v3714_v45  ;;  %v4666_v14 = vmax.f32 %v4383_v31, 0.0  ;;  %v1652_v45 = vpop.permute.xlu1 %1651 }
 0x348   : > { %v4667_v1 = vmax.f32 %v4385_v15, 0.0 }
 0x349   : > { %v4668_v33 = vmax.f32 %v4387_v38, 0.0  ;;  %v3717_v61 = vpop.f32.mrb[240].mxu0 }
 0x34a   : > { %v9929_v8 = vpack.c.bf16 %v4667_v1, %v4665_v19  ;;  %v3718_v27 = vadd.f32 %v3717_v61, %v1637_v4  ;;  %v3719_v21 = vpop.f32.mrb[241].mxu0  ;;  %v1657_v61 = vpop.permute.xlu0 %1656 }
 0x34b   : > { %v9931_v13 = vpack.c.bf16 %v4668_v33, %v4666_v14  ;;  %v3720_v46 = vadd.f32 %v3719_v21, %v1637_v4  ;;  %v3721_v57 = vpop.f32.mrb[242].mxu0 }
 0x34c   : > { %v3722_v3 = vadd.f32 %v3721_v57, %v1642_v35  ;;  %v4391_v51 = vadd.f32 %v9745_v54, %v3718_v27  ;;  %v3723_v62 = vpop.f32.mrb[243].mxu0 }
 0x34d   : > { %v3724_v10 = vadd.f32 %v3723_v62, %v1642_v35  ;;  %v4393_v29 = vadd.f32 %v9749_v25, %v3720_v46 }
 0x34e   : > { %v4395_v24 = vadd.f32 %v9751_v2, %v3722_v3  ;;  %v4669_v17 = vmax.f32 %v4391_v51, 0.0  ;;  %v1662_v51 = vpop.permute.xlu1 %1661 }
 0x34f   : > { %v4397_v18 = vadd.f32 %v9753_v52, %v3724_v10  ;;  %v4670_v48 = vmax.f32 %v4393_v29, 0.0 }
 0x350   : > { %v4671_v32 = vmax.f32 %v4395_v24, 0.0 }
 0x351   : > { %v4672_v50 = vmax.f32 %v4397_v18, 0.0  ;;  %v3727_v59 = vpop.f32.mrb[244].mxu0 }
 0x352   : > { %v9937_v31 = vpack.c.bf16 %v4671_v32, %v4669_v17  ;;  %v3728_v15 = vadd.f32 %v3727_v59, %v1647_v42  ;;  %v3729_v4 = vpop.f32.mrb[245].mxu0 }
 0x353   : > { %v9939_v54 = vpack.c.bf16 %v4672_v50, %v4670_v48  ;;  %v3730_v38 = vadd.f32 %v3729_v4, %v1647_v42  ;;  %v3731_v19 = vpop.f32.mrb[246].mxu0  ;;  %v1667_v48 = vpop.permute.xlu0 %1666 }
 0x354   : > { %v3732_v25 = vadd.f32 %v3731_v19, %v1652_v45  ;;  %v4401_v2 = vadd.f32 %v9768_v60, %v3728_v15  ;;  %v3733_v1 = vpop.f32.mrb[247].mxu0 }
 0x355   : > { %v3734_v14 = vadd.f32 %v3733_v1, %v1652_v45  ;;  %v4403_v52 = vadd.f32 %v9772_v26, %v3730_v38  ;;  %v1672_v38 = vpop.permute.xlu1 %1671 }
 0x356   : > { %v4405_v33 = vadd.f32 %v9774_v37, %v3732_v25  ;;  %v4673_v27 = vmax.f32 %v4401_v2, 0.0 }
 0x357   : > { %v4407_v35 = vadd.f32 %v9776_v58, %v3734_v14  ;;  %v4674_v46 = vmax.f32 %v4403_v52, 0.0 }
 0x358   : > { %v4675_v21 = vmax.f32 %v4405_v33, 0.0 }
 0x359   : > { %v4676_v57 = vmax.f32 %v4407_v35, 0.0  ;;  %v3737_v3 = vpop.f32.mrb[248].mxu0  ;;  %v10568_v35 = vld [vmem:[#allocation113_spill] sm:$0xff] }
 0x35a   : > { %v9945_v62 = vpack.c.bf16 %v4675_v21, %v4673_v27  ;;  %v3738_v10 = vadd.f32 %v3737_v3, %v1657_v61  ;;  %v3739_v29 = vpop.f32.mrb[249].mxu0  ;;  %v10569_v21 = vld [vmem:[#allocation114_spill] sm:$0xff]  ;;  %v9969_v3 = vld [vmem:[%s10348_s3 + $0x20] sm:$0xff] }
 0x35b   : > { %v9947_v60 = vpack.c.bf16 %v4676_v57, %v4674_v46  ;;  %v3740_v24 = vadd.f32 %v3739_v29, %v1657_v61  ;;  %v3741_v42 = vpop.f32.mrb[250].mxu0  ;;  %v9964_v57 = vld [vmem:[%s10348_s3] sm:$0xff] }
 0x35c   : > { %v3742_v26 = vadd.f32 %v3741_v42, %v1662_v51  ;;  %v4411_v37 = vadd.f32 %v9791_v28, %v3738_v10  ;;  %v3743_v18 = vpop.f32.mrb[251].mxu0  ;;  %v6235_v10 = vcombine.high %v9964_v57, %v9969_v3  ;;  %v6234_v42 = vcombine.low %v9964_v57, %v9969_v3  ;;  %v10607_v57 = vld [vmem:[#allocation53_spill] sm:$0xff]  ;;  %v10608_v3 = vld [vmem:[#allocation56_spill] sm:$0xff] }
 0x35d   : > { %v3744_v17 = vadd.f32 %v3743_v18, %v1662_v51  ;;  %v4413_v58 = vadd.f32 %v9795_v7, %v3740_v24 }
 0x35e   : > { %v4415_v32 = vadd.f32 %v9797_v40, %v3742_v26  ;;  %v4677_v59 = vmax.f32 %v4411_v37, 0.0  ;;  %v10570_v37 = vld [vmem:[#allocation3_spill] sm:$0xff]  ;;  %5325 = vmatprep.mubr.bf16.mxu1 %v6235_v10 }
 0x35f   : > { %v4417_v50 = vadd.f32 %v9799_v23, %v3744_v17  ;;  %v4678_v15 = vmax.f32 %v4413_v58, 0.0 }
 0x360   : > { %v4679_v45 = vmax.f32 %v4415_v32, 0.0 }
 0x361   : > { %v4680_v4 = vmax.f32 %v4417_v50, 0.0  ;;  %v3747_v19 = vpop.f32.mrb[252].mxu0  ;;  %v10571_v50 = vld [vmem:[#allocation5_spill] sm:$0xff] }
 0x362   : > { %v9953_v25 = vpack.c.bf16 %v4679_v45, %v4677_v59  ;;  %v3748_v2 = vadd.f32 %v3747_v19, %v1667_v48  ;;  %v3749_v1 = vpop.f32.mrb[253].mxu0 }
 0x363   : > { %v9955_v28 = vpack.c.bf16 %v4680_v4, %v4678_v15  ;;  %v3750_v14 = vadd.f32 %v3749_v1, %v1667_v48  ;;  %v3751_v52 = vpop.f32.mrb[254].mxu0 }
 0x364   : > { %v3752_v7 = vadd.f32 %v3751_v52, %v1672_v38  ;;  %v4421_v40 = vadd.f32 %v9814_v0, %v3748_v2  ;;  %v3753_v33 = vpop.f32.mrb[255].mxu0 }
 0x365   : > { %v3754_v61 = vadd.f32 %v3753_v33, %v1672_v38  ;;  %v4423_v23 = vadd.f32 %v9818_v53, %v3750_v14 }
 0x366   : > { %v4425_v27 = vadd.f32 %v10568_v35, %v3752_v7  ;;  %v4681_v51 = vmax.f32 %v4421_v40, 0.0  ;;  %v10572_v7 = vld [vmem:[#allocation4_spill] sm:$0xff]  ;;  %v10573_v35 = vld [vmem:[#allocation6_spill] sm:$0xff] }
 0x367   : > { %v4427_v46 = vadd.f32 %v10569_v21, %v3754_v61  ;;  %v4682_v53 = vmax.f32 %v4423_v23, 0.0 }
 0x368   : > { %v4683_v0 = vmax.f32 %v4425_v27, 0.0 }
 0x369   : > { %v4684_v29 = vmax.f32 %v4427_v46, 0.0  ;;  %v3790_v24 = vpop.f32.mrb[0].mxu0 }
 0x36a   : > { %v9975_v26 = vpack.c.bf16 %v4683_v0, %v4681_v51  ;;  %v6319_v18 = vadd.f32 %v3790_v24, %v10570_v37  ;;  %v3792_v17 = vpop.f32.mrb[1].mxu0 }
 0x36b   : > { %v9978_v58 = vpack.c.bf16 %v4684_v29, %v4682_v53  ;;  %v6320_v32 = vadd.f32 %v3792_v17, %v10570_v37  ;;  %v3794_v48 = vpop.f32.mrb[2].mxu0 }
 0x36c   : > { %v6321_v59 = vadd.f32 %v3794_v48, %v10571_v50  ;;  %v3796_v45 = vpop.f32.mrb[3].mxu0  ;;  %v4429_v4 = vmax.f32 %v6319_v18, 0.0  ;;  %v10574_v18 = vld [vmem:[#allocation7_spill] sm:$0xff] }
 0x36d   : > { %v6322_v15 = vadd.f32 %v3796_v45, %v10571_v50  ;;  %v4430_v19 = vmax.f32 %v6320_v32, 0.0 }
 0x36e   : > { %v4431_v38 = vmax.f32 %v6321_v59, 0.0  ;;  %v10575_v59 = vld [vmem:[#allocation8_spill] sm:$0xff] }
 0x36f   : > { %v4432_v2 = vmax.f32 %v6322_v15, 0.0 }
 0x370   : > { %v4749_v1 = vpack.c.bf16 %v4431_v38, %v4429_v4 }
 0x371   : > { %v4750_v14 = vpack.c.bf16 %v4432_v2, %v4430_v19  ;;  %v3800_v52 = vpop.f32.mrb[4].mxu0 }
 0x372   : > { %v6323_v40 = vadd.f32 %v3800_v52, %v10572_v7  ;;  %v3802_v33 = vpop.f32.mrb[5].mxu0 }
 0x373   : > { %v6324_v61 = vadd.f32 %v3802_v33, %v10572_v7  ;;  %v3804_v23 = vpop.f32.mrb[6].mxu0  ;;  %5293 = vmatprep.subr.bf16.mxu1 %v4750_v14 }
 0x374   : > { %v6325_v27 = vadd.f32 %v3804_v23, %v10573_v35  ;;  %v3806_v21 = vpop.f32.mrb[7].mxu0  ;;  %5294 = vmatpush1.bf16.msra.mxu1 %v4749_v1  ;;  %v4433_v51 = vmax.f32 %v6323_v40, 0.0  ;;  %v10576_v40 = vld [vmem:[#allocation9_spill] sm:$0xff] }
 0x375   : > { %v6326_v46 = vadd.f32 %v3806_v21, %v10573_v35  ;;  %v4434_v10 = vmax.f32 %v6324_v61, 0.0 }
 0x376   : > { %v4435_v0 = vmax.f32 %v6325_v27, 0.0  ;;  %v10577_v27 = vld [vmem:[#allocation10_spill] sm:$0xff] }
 0x377   : > { %v4436_v53 = vmax.f32 %v6326_v46, 0.0 }
 0x378   : > { %v4751_v29 = vpack.c.bf16 %v4435_v0, %v4433_v51 }
 0x379   : > { %v4752_v24 = vpack.c.bf16 %v4436_v53, %v4434_v10  ;;  %v3810_v37 = vpop.f32.mrb[8].mxu0 }
 0x37a   : > { %v6327_v17 = vadd.f32 %v3810_v37, %v10574_v18  ;;  %v3812_v32 = vpop.f32.mrb[9].mxu0 }
 0x37b   : > { %v6328_v48 = vadd.f32 %v3812_v32, %v10574_v18  ;;  %v3814_v50 = vpop.f32.mrb[10].mxu0  ;;  %5295 = vmatprep.subr.bf16.mxu1 %v4752_v24 }
 0x37c   : > { %v6329_v45 = vadd.f32 %v3814_v50, %v10575_v59  ;;  %v3816_v15 = vpop.f32.mrb[11].mxu0  ;;  %5296 = vmatpush1.bf16.msra.mxu1 %v4751_v29  ;;  %v4437_v38 = vmax.f32 %v6327_v17, 0.0  ;;  %v10578_v17 = vld [vmem:[#allocation11_spill] sm:$0xff] }
 0x37d   : > { %v6330_v4 = vadd.f32 %v3816_v15, %v10575_v59  ;;  %v4438_v2 = vmax.f32 %v6328_v48, 0.0 }
 0x37e   : > { %v4439_v19 = vmax.f32 %v6329_v45, 0.0  ;;  %v10579_v45 = vld [vmem:[#allocation12_spill] sm:$0xff] }
 0x37f   : > { %v4440_v1 = vmax.f32 %v6330_v4, 0.0 }
 0x380   : > { %v4753_v14 = vpack.c.bf16 %v4439_v19, %v4437_v38 }
 0x381   : > { %v4754_v52 = vpack.c.bf16 %v4440_v1, %v4438_v2  ;;  %v3820_v7 = vpop.f32.mrb[12].mxu0 }
 0x382   : > { %v6331_v33 = vadd.f32 %v3820_v7, %v10576_v40  ;;  %v3822_v61 = vpop.f32.mrb[13].mxu0 }
 0x383   : > { %v6332_v23 = vadd.f32 %v3822_v61, %v10576_v40  ;;  %v3824_v35 = vpop.f32.mrb[14].mxu0  ;;  %5297 = vmatprep.subr.bf16.mxu1 %v4754_v52 }
 0x384   : > { %v6333_v21 = vadd.f32 %v3824_v35, %v10577_v27  ;;  %v3826_v46 = vpop.f32.mrb[15].mxu0  ;;  %5298 = vmatpush1.bf16.msra.mxu1 %v4753_v14  ;;  %v4441_v0 = vmax.f32 %v6331_v33, 0.0  ;;  %v10580_v33 = vld [vmem:[#allocation13_spill] sm:$0xff] }
 0x385   : > { %v6334_v51 = vadd.f32 %v3826_v46, %v10577_v27  ;;  %v4442_v53 = vmax.f32 %v6332_v23, 0.0 }
 0x386   : > { %v4443_v10 = vmax.f32 %v6333_v21, 0.0  ;;  %v10581_v21 = vld [vmem:[#allocation14_spill] sm:$0xff] }
 0x387   : > { %v4444_v29 = vmax.f32 %v6334_v51, 0.0 }
 0x388   : > { %v4755_v24 = vpack.c.bf16 %v4443_v10, %v4441_v0 }
 0x389   : > { %v4756_v37 = vpack.c.bf16 %v4444_v29, %v4442_v53  ;;  %v3830_v18 = vpop.f32.mrb[16].mxu0 }
 0x38a   : > { %v6335_v32 = vadd.f32 %v3830_v18, %v10578_v17  ;;  %v3832_v48 = vpop.f32.mrb[17].mxu0 }
 0x38b   : > { %v6336_v50 = vadd.f32 %v3832_v48, %v10578_v17  ;;  %v3834_v59 = vpop.f32.mrb[18].mxu0  ;;  %5299 = vmatprep.subr.bf16.mxu1 %v4756_v37 }
 0x38c   : > { %v6337_v15 = vadd.f32 %v3834_v59, %v10579_v45  ;;  %v3836_v4 = vpop.f32.mrb[19].mxu0  ;;  %5300 = vmatpush1.bf16.msra.mxu1 %v4755_v24  ;;  %v4445_v19 = vmax.f32 %v6335_v32, 0.0  ;;  %v10582_v32 = vld [vmem:[#allocation15_spill] sm:$0xff] }
 0x38d   : > { %v6338_v38 = vadd.f32 %v3836_v4, %v10579_v45  ;;  %v4446_v1 = vmax.f32 %v6336_v50, 0.0 }
 0x38e   : > { %v4447_v2 = vmax.f32 %v6337_v15, 0.0  ;;  %v10583_v15 = vld [vmem:[#allocation16_spill] sm:$0xff] }
 0x38f   : > { %v4448_v14 = vmax.f32 %v6338_v38, 0.0 }
 0x390   : > { %v4757_v52 = vpack.c.bf16 %v4447_v2, %v4445_v19 }
 0x391   : > { %v4758_v7 = vpack.c.bf16 %v4448_v14, %v4446_v1  ;;  %v3840_v40 = vpop.f32.mrb[20].mxu0 }
 0x392   : > { %v6339_v61 = vadd.f32 %v3840_v40, %v10580_v33  ;;  %v3842_v23 = vpop.f32.mrb[21].mxu0 }
 0x393   : > { %v6340_v35 = vadd.f32 %v3842_v23, %v10580_v33  ;;  %v3844_v27 = vpop.f32.mrb[22].mxu0  ;;  %5301 = vmatprep.subr.bf16.mxu1 %v4758_v7 }
 0x394   : > { %v6341_v46 = vadd.f32 %v3844_v27, %v10581_v21  ;;  %v3846_v51 = vpop.f32.mrb[23].mxu0  ;;  %5302 = vmatpush1.bf16.msra.mxu1 %v4757_v52  ;;  %v4449_v10 = vmax.f32 %v6339_v61, 0.0  ;;  %v10584_v61 = vld [vmem:[#allocation17_spill] sm:$0xff] }
 0x395   : > { %v6342_v0 = vadd.f32 %v3846_v51, %v10581_v21  ;;  %v4450_v29 = vmax.f32 %v6340_v35, 0.0 }
 0x396   : > { %v4451_v53 = vmax.f32 %v6341_v46, 0.0  ;;  %v10585_v46 = vld [vmem:[#allocation18_spill] sm:$0xff] }
 0x397   : > { %v4452_v24 = vmax.f32 %v6342_v0, 0.0 }
 0x398   : > { %v4759_v37 = vpack.c.bf16 %v4451_v53, %v4449_v10 }
 0x399   : > { %v4760_v18 = vpack.c.bf16 %v4452_v24, %v4450_v29  ;;  %v3850_v17 = vpop.f32.mrb[24].mxu0 }
 0x39a   : > { %v6343_v48 = vadd.f32 %v3850_v17, %v10582_v32  ;;  %v3852_v50 = vpop.f32.mrb[25].mxu0 }
 0x39b   : > { %v6344_v59 = vadd.f32 %v3852_v50, %v10582_v32  ;;  %v3854_v45 = vpop.f32.mrb[26].mxu0  ;;  %5303 = vmatprep.subr.bf16.mxu1 %v4760_v18 }
 0x39c   : > { %v6345_v4 = vadd.f32 %v3854_v45, %v10583_v15  ;;  %v3856_v38 = vpop.f32.mrb[27].mxu0  ;;  %5304 = vmatpush1.bf16.msra.mxu1 %v4759_v37  ;;  %v4453_v2 = vmax.f32 %v6343_v48, 0.0  ;;  %v10586_v48 = vld [vmem:[#allocation19_spill] sm:$0xff] }
 0x39d   : > { %v6346_v19 = vadd.f32 %v3856_v38, %v10583_v15  ;;  %v4454_v14 = vmax.f32 %v6344_v59, 0.0 }
 0x39e   : > { %v4455_v1 = vmax.f32 %v6345_v4, 0.0  ;;  %v10587_v4 = vld [vmem:[#allocation20_spill] sm:$0xff] }
 0x39f   : > { %v4456_v52 = vmax.f32 %v6346_v19, 0.0 }
 0x3a0   : > { %v4761_v7 = vpack.c.bf16 %v4455_v1, %v4453_v2 }
 0x3a1   : > { %v4762_v40 = vpack.c.bf16 %v4456_v52, %v4454_v14  ;;  %v3860_v33 = vpop.f32.mrb[28].mxu0 }
 0x3a2   : > { %v6347_v23 = vadd.f32 %v3860_v33, %v10584_v61  ;;  %v3862_v35 = vpop.f32.mrb[29].mxu0 }
 0x3a3   : > { %v6348_v27 = vadd.f32 %v3862_v35, %v10584_v61  ;;  %v3864_v21 = vpop.f32.mrb[30].mxu0  ;;  %5305 = vmatprep.subr.bf16.mxu1 %v4762_v40 }
 0x3a4   : > { %v6349_v51 = vadd.f32 %v3864_v21, %v10585_v46  ;;  %v3866_v0 = vpop.f32.mrb[31].mxu0  ;;  %5306 = vmatpush1.bf16.msra.mxu1 %v4761_v7  ;;  %v4457_v53 = vmax.f32 %v6347_v23, 0.0  ;;  %v10588_v23 = vld [vmem:[#allocation21_spill] sm:$0xff] }
 0x3a5   : > { %v6350_v10 = vadd.f32 %v3866_v0, %v10585_v46  ;;  %v4458_v24 = vmax.f32 %v6348_v27, 0.0 }
 0x3a6   : > { %v4459_v29 = vmax.f32 %v6349_v51, 0.0  ;;  %v10589_v51 = vld [vmem:[#allocation22_spill] sm:$0xff] }
 0x3a7   : > { %v4460_v37 = vmax.f32 %v6350_v10, 0.0 }
 0x3a8   : > { %v4763_v18 = vpack.c.bf16 %v4459_v29, %v4457_v53 }
 0x3a9   : > { %v4764_v17 = vpack.c.bf16 %v4460_v37, %v4458_v24  ;;  %v3870_v32 = vpop.f32.mrb[32].mxu0 }
 0x3aa   : > { %v6351_v50 = vadd.f32 %v3870_v32, %v10586_v48  ;;  %v3872_v59 = vpop.f32.mrb[33].mxu0 }
 0x3ab   : > { %v6352_v45 = vadd.f32 %v3872_v59, %v10586_v48  ;;  %v3874_v15 = vpop.f32.mrb[34].mxu0  ;;  %5307 = vmatprep.subr.bf16.mxu1 %v4764_v17 }
 0x3ac   : > { %v6353_v38 = vadd.f32 %v3874_v15, %v10587_v4  ;;  %v3876_v19 = vpop.f32.mrb[35].mxu0  ;;  %5308 = vmatpush1.bf16.msra.mxu1 %v4763_v18  ;;  %v4461_v1 = vmax.f32 %v6351_v50, 0.0  ;;  %v10590_v50 = vld [vmem:[#allocation23_spill] sm:$0xff] }
 0x3ad   : > { %v6354_v2 = vadd.f32 %v3876_v19, %v10587_v4  ;;  %v4462_v52 = vmax.f32 %v6352_v45, 0.0 }
 0x3ae   : > { %v4463_v14 = vmax.f32 %v6353_v38, 0.0  ;;  %v10591_v38 = vld [vmem:[#allocation24_spill] sm:$0xff] }
 0x3af   : > { %v4464_v7 = vmax.f32 %v6354_v2, 0.0 }
 0x3b0   : > { %v4765_v40 = vpack.c.bf16 %v4463_v14, %v4461_v1 }
 0x3b1   : > { %v4766_v33 = vpack.c.bf16 %v4464_v7, %v4462_v52  ;;  %v3880_v61 = vpop.f32.mrb[36].mxu0 }
 0x3b2   : > { %v6355_v35 = vadd.f32 %v3880_v61, %v10588_v23  ;;  %v3882_v27 = vpop.f32.mrb[37].mxu0 }
 0x3b3   : > { %v6356_v21 = vadd.f32 %v3882_v27, %v10588_v23  ;;  %v3884_v46 = vpop.f32.mrb[38].mxu0  ;;  %5309 = vmatprep.subr.bf16.mxu1 %v4766_v33 }
 0x3b4   : > { %v6357_v0 = vadd.f32 %v3884_v46, %v10589_v51  ;;  %v3886_v10 = vpop.f32.mrb[39].mxu0  ;;  %5310 = vmatpush1.bf16.msra.mxu1 %v4765_v40  ;;  %v4465_v29 = vmax.f32 %v6355_v35, 0.0  ;;  %v10592_v35 = vld [vmem:[#allocation25_spill] sm:$0xff] }
 0x3b5   : > { %v6358_v53 = vadd.f32 %v3886_v10, %v10589_v51  ;;  %v4466_v37 = vmax.f32 %v6356_v21, 0.0 }
 0x3b6   : > { %v4467_v24 = vmax.f32 %v6357_v0, 0.0  ;;  %v10593_v0 = vld [vmem:[#allocation26_spill] sm:$0xff] }
 0x3b7   : > { %v4468_v18 = vmax.f32 %v6358_v53, 0.0 }
 0x3b8   : > { %v4767_v17 = vpack.c.bf16 %v4467_v24, %v4465_v29 }
 0x3b9   : > { %v4768_v32 = vpack.c.bf16 %v4468_v18, %v4466_v37  ;;  %v3890_v48 = vpop.f32.mrb[40].mxu0 }
 0x3ba   : > { %v6359_v59 = vadd.f32 %v3890_v48, %v10590_v50  ;;  %v3892_v45 = vpop.f32.mrb[41].mxu0 }
 0x3bb   : > { %v6360_v15 = vadd.f32 %v3892_v45, %v10590_v50  ;;  %v3894_v4 = vpop.f32.mrb[42].mxu0  ;;  %5311 = vmatprep.subr.bf16.mxu1 %v4768_v32 }
 0x3bc   : > { %v6361_v19 = vadd.f32 %v3894_v4, %v10591_v38  ;;  %v3896_v2 = vpop.f32.mrb[43].mxu0  ;;  %5312 = vmatpush1.bf16.msra.mxu1 %v4767_v17  ;;  %v4469_v14 = vmax.f32 %v6359_v59, 0.0  ;;  %v10594_v59 = vld [vmem:[#allocation29_spill] sm:$0xff] }
 0x3bd   : > { %v6362_v1 = vadd.f32 %v3896_v2, %v10591_v38  ;;  %v4470_v7 = vmax.f32 %v6360_v15, 0.0 }
 0x3be   : > { %v4471_v52 = vmax.f32 %v6361_v19, 0.0  ;;  %v10595_v19 = vld [vmem:[#allocation30_spill] sm:$0xff] }
 0x3bf   : > { %v4472_v40 = vmax.f32 %v6362_v1, 0.0 }
 0x3c0   : > { %v4769_v33 = vpack.c.bf16 %v4471_v52, %v4469_v14 }
 0x3c1   : > { %v4770_v61 = vpack.c.bf16 %v4472_v40, %v4470_v7  ;;  %v3900_v23 = vpop.f32.mrb[44].mxu0 }
 0x3c2   : > { %v6363_v27 = vadd.f32 %v3900_v23, %v10592_v35  ;;  %v3902_v21 = vpop.f32.mrb[45].mxu0 }
 0x3c3   : > { %v6364_v46 = vadd.f32 %v3902_v21, %v10592_v35  ;;  %v3904_v51 = vpop.f32.mrb[46].mxu0  ;;  %5313 = vmatprep.subr.bf16.mxu1 %v4770_v61 }
 0x3c4   : > { %v6365_v10 = vadd.f32 %v3904_v51, %v10593_v0  ;;  %v3906_v53 = vpop.f32.mrb[47].mxu0  ;;  %5314 = vmatpush1.bf16.msra.mxu1 %v4769_v33  ;;  %v4473_v24 = vmax.f32 %v6363_v27, 0.0  ;;  %v10596_v27 = vld [vmem:[#allocation35_spill] sm:$0xff] }
 0x3c5   : > { %v6366_v29 = vadd.f32 %v3906_v53, %v10593_v0  ;;  %v4474_v18 = vmax.f32 %v6364_v46, 0.0 }
 0x3c6   : > { %v4475_v37 = vmax.f32 %v6365_v10, 0.0  ;;  %v10597_v10 = vld [vmem:[#allocation36_spill] sm:$0xff] }
 0x3c7   : > { %v4476_v17 = vmax.f32 %v6366_v29, 0.0 }
 0x3c8   : > { %v4771_v32 = vpack.c.bf16 %v4475_v37, %v4473_v24 }
 0x3c9   : > { %v4772_v48 = vpack.c.bf16 %v4476_v17, %v4474_v18  ;;  %v3910_v50 = vpop.f32.mrb[48].mxu0 }
 0x3ca   : > { %v6367_v45 = vadd.f32 %v3910_v50, %v10594_v59  ;;  %v3912_v15 = vpop.f32.mrb[49].mxu0 }
 0x3cb   : > { %v6368_v4 = vadd.f32 %v3912_v15, %v10594_v59  ;;  %v3914_v38 = vpop.f32.mrb[50].mxu0  ;;  %5315 = vmatprep.subr.bf16.mxu1 %v4772_v48 }
 0x3cc   : > { %v6369_v2 = vadd.f32 %v3914_v38, %v10595_v19  ;;  %v3916_v1 = vpop.f32.mrb[51].mxu0  ;;  %5316 = vmatpush1.bf16.msra.mxu1 %v4771_v32  ;;  %v4477_v52 = vmax.f32 %v6367_v45, 0.0  ;;  %v10598_v45 = vld [vmem:[#allocation40_spill] sm:$0xff] }
 0x3cd   : > { %v6370_v14 = vadd.f32 %v3916_v1, %v10595_v19  ;;  %v4478_v40 = vmax.f32 %v6368_v4, 0.0 }
 0x3ce   : > { %v4479_v7 = vmax.f32 %v6369_v2, 0.0  ;;  %v10599_v2 = vld [vmem:[#allocation42_spill] sm:$0xff] }
 0x3cf   : > { %v4480_v33 = vmax.f32 %v6370_v14, 0.0 }
 0x3d0   : > { %v4773_v61 = vpack.c.bf16 %v4479_v7, %v4477_v52 }
 0x3d1   : > { %v4774_v23 = vpack.c.bf16 %v4480_v33, %v4478_v40  ;;  %v3920_v35 = vpop.f32.mrb[52].mxu0 }
 0x3d2   : > { %v6371_v21 = vadd.f32 %v3920_v35, %v10596_v27  ;;  %v3922_v46 = vpop.f32.mrb[53].mxu0 }
 0x3d3   : > { %v6372_v51 = vadd.f32 %v3922_v46, %v10596_v27  ;;  %v3924_v0 = vpop.f32.mrb[54].mxu0  ;;  %5317 = vmatprep.subr.bf16.mxu1 %v4774_v23  ;;  %v10600_v27 = vld [vmem:[#allocation48_spill] sm:$0xff]  ;;  %v4697_v46 = vld [vmem:[%s10348_s3 + $0x60] sm:$0xff] }
 0x3d4   : > { %v6373_v53 = vadd.f32 %v3924_v0, %v10597_v10  ;;  %v3926_v29 = vpop.f32.mrb[55].mxu0  ;;  %5318 = vmatpush1.bf16.msra.mxu1 %v4773_v61  ;;  %v4481_v37 = vmax.f32 %v6371_v21, 0.0  ;;  %v4693_v21 = vld [vmem:[%s10348_s3 + $0x40] sm:$0xff] }
 0x3d5   : > { %v6374_v24 = vadd.f32 %v3926_v29, %v10597_v10  ;;  %v4482_v17 = vmax.f32 %v6372_v51, 0.0  ;;  %v10601_v51 = vld [vmem:[#allocation47_spill] sm:$0xff]  ;;  %v6243_v0 = vcombine.high %v4693_v21, %v4697_v46  ;;  %v10602_v10 = vld [vmem:[#allocation50_spill] sm:$0xff]  ;;  %v10604_v29 = vld [vmem:[#allocation52_spill] sm:$0xff] }
 0x3d6   : > { %v4483_v18 = vmax.f32 %v6373_v53, 0.0  ;;  %v10603_v53 = vld [vmem:[#allocation49_spill] sm:$0xff] }
 0x3d7   : > { %v4484_v32 = vmax.f32 %v6374_v24, 0.0  ;;  %v4701_v24 = vld [vmem:[%s10348_s3 + $0x80] sm:$0xff] }
 0x3d8   : > { %v4775_v48 = vpack.c.bf16 %v4483_v18, %v4481_v37  ;;  %v4705_v37 = vld [vmem:[%s10348_s3 + $0xa0] sm:$0xff]  ;;  %v6242_v18 = vcombine.low %v4693_v21, %v4697_v46  ;;  %v10617_v21 = vld [vmem:[#allocation64_spill] sm:$0xff] }
 0x3d9   : > { %v4776_v50 = vpack.c.bf16 %v4484_v32, %v4482_v17  ;;  %v3930_v59 = vpop.f32.mrb[56].mxu0  ;;  %v10605_v17 = vld [vmem:[#allocation51_spill] sm:$0xff]  ;;  %v6251_v32 = vcombine.high %v4701_v24, %v4705_v37 }
 0x3da   : > { %v6375_v15 = vadd.f32 %v3930_v59, %v10598_v45  ;;  %v3932_v4 = vpop.f32.mrb[57].mxu0  ;;  %v6250_v59 = vcombine.low %v4701_v24, %v4705_v37  ;;  %v10621_v37 = vld [vmem:[#allocation69_spill] sm:$0xff] }
 0x3db   : > { %v6376_v38 = vadd.f32 %v3932_v4, %v10598_v45  ;;  %v3934_v19 = vpop.f32.mrb[58].mxu0  ;;  %5319 = vmatprep.subr.bf16.mxu1 %v4776_v50  ;;  %v4713_v50 = vld [vmem:[%s10348_s3 + $0xe0] sm:$0xff]  ;;  %v10610_v4 = vld [vmem:[#allocation58_spill] sm:$0xff] }
 0x3dc   : > { %v6377_v1 = vadd.f32 %v3934_v19, %v10599_v2  ;;  %v3936_v14 = vpop.f32.mrb[59].mxu0  ;;  %5320 = vmatpush1.bf16.msra.mxu1 %v4775_v48  ;;  %v4485_v7 = vmax.f32 %v6375_v15, 0.0  ;;  %v10606_v48 = vld [vmem:[#allocation54_spill] sm:$0xff]  ;;  %v10609_v45 = vld [vmem:[#allocation55_spill] sm:$0xff]  ;;  %v10612_v19 = vld [vmem:[#allocation61_spill] sm:$0xff] }
 0x3dd   : > { %v6378_v52 = vadd.f32 %v3936_v14, %v10599_v2  ;;  %v4486_v33 = vmax.f32 %v6376_v38, 0.0  ;;  %v10611_v38 = vld [vmem:[#allocation57_spill] sm:$0xff]  ;;  %v4717_v2 = vld [vmem:[%s10348_s3 + $0x100] sm:$0xff] }
 0x3de   : > { %v4487_v40 = vmax.f32 %v6377_v1, 0.0  ;;  %v4721_v1 = vld [vmem:[%s10348_s3 + $0x120] sm:$0xff] }
 0x3df   : > { %v4488_v61 = vmax.f32 %v6378_v52, 0.0  ;;  %v10613_v52 = vld [vmem:[#allocation60_spill] sm:$0xff] }
 0x3e0   : > { %v4777_v23 = vpack.c.bf16 %v4487_v40, %v4485_v7  ;;  %v6267_v7 = vcombine.high %v4717_v2, %v4721_v1  ;;  %v10614_v40 = vld [vmem:[#allocation63_spill] sm:$0xff] }
 0x3e1   : > { %v4778_v35 = vpack.c.bf16 %v4488_v61, %v4486_v33  ;;  %v10615_v33 = vld [vmem:[#allocation62_spill] sm:$0xff]  ;;  %v10616_v61 = vld [vmem:[#allocation65_spill] sm:$0xff] }
 0x3e3   : > { %5321 = vmatprep.subr.bf16.mxu1 %v4778_v35  ;;  %v4729_v35 = vld [vmem:[%s10348_s3 + $0x160] sm:$0xff] }
 0x3e4   : > { %5322 = vmatpush1.bf16.msra.mxu1 %v4777_v23  ;;  %v4725_v23 = vld [vmem:[%s10348_s3 + $0x140] sm:$0xff] }
 0x3e5   : > { %5323 = vmatprep.subr.bf16.mxu1 %v10600_v27  ;;  %v6266_v27 = vcombine.low %v4717_v2, %v4721_v1  ;;  %v6275_v46 = vcombine.high %v4725_v23, %v4729_v35  ;;  %v6274_v24 = vcombine.low %v4725_v23, %v4729_v35  ;;  %v10629_v1 = vld [vmem:[#allocation43_spill] sm:$0xff] }
 0x3e6   : > { %v10633_v35 = vld [vmem:[#allocation79_spill] sm:$0xff] }
 0x3e8   : > { %5324 = vmatpush1.bf16.msra.mxu1 %v10601_v51  ;;  %v10618_v51 = vld [vmem:[#allocation67_spill] sm:$0xff] }
 0x3e9   : > { %5406 = vmatprep.subr.bf16.mxu1 %v10602_v10  ;;  %v10620_v10 = vld [vmem:[#allocation70_spill] sm:$0xff] }
 0x3eb   : > { %5326 = vmatmul.mubr.bf16.vlgmr.msra.gmra.mrb[196].mxu1 %v6234_v42  ;;  %v4709_v42 = vld [vmem:[%s10348_s3 + $0xc0] sm:$0xff] }
 0x3ec   : > { %5407 = vmatpush1.bf16.msra.mxu1 %v10603_v53  ;;  %5335 = vmatprep.mubr.bf16.mxu1 %v6243_v0  ;;  %v6259_v15 = vcombine.high %v4709_v42, %v4713_v50  ;;  %v6258_v14 = vcombine.low %v4709_v42, %v4713_v50  ;;  %v10619_v0 = vld [vmem:[#allocation66_spill] sm:$0xff]  ;;  %v4733_v53 = vld [vmem:[%s10348_s3 + $0x180] sm:$0xff] }
 0x3ed   : > { %5408 = vmatprep.subr.bf16.mxu1 %v10604_v29  ;;  %v4737_v29 = vld [vmem:[%s10348_s3 + $0x1a0] sm:$0xff] }
 0x3ee   : > { %v6282_v42 = vcombine.low %v4733_v53, %v4737_v29  ;;  %v10625_v50 = vld [vmem:[#allocation75_spill] sm:$0xff] }
 0x3f0   : > { %5409 = vmatpush1.bf16.msra.mxu1 %v10605_v17  ;;  %v10622_v17 = vld [vmem:[#allocation74_spill] sm:$0xff] }
 0x3f1   : > { %5410 = vmatprep.subr.bf16.mxu1 %v10606_v48  ;;  %v10624_v48 = vld [vmem:[#allocation76_spill] sm:$0xff] }
 0x3f3   : > { %5336 = vmatmul.mubr.bf16.gmra.mrb[200].mxu1 %v6242_v18  ;;  %v6283_v18 = vcombine.high %v4733_v53, %v4737_v29  ;;  %v10637_v29 = vld [vmem:[#allocation83_spill] sm:$0xff] }
 0x3f4   : > { %5411 = vmatpush1.bf16.msra.mxu1 %v10607_v57  ;;  %5345 = vmatprep.mubr.bf16.mxu1 %v6251_v32  ;;  %v10623_v32 = vld [vmem:[#allocation73_spill] sm:$0xff]  ;;  %v4741_v57 = vld [vmem:[%s10348_s3 + $0x1c0] sm:$0xff] }
 0x3f5   : > { %5412 = vmatprep.subr.bf16.mxu1 %v10608_v3  ;;  %v4745_v3 = vld [vmem:[%s10348_s3 + $0x1e0] sm:$0xff] }
 0x3f6   : > { %v6290_v2 = vcombine.low %v4741_v57, %v4745_v3 }
 0x3f8   : > { %5413 = vmatpush1.bf16.msra.mxu1 %v10609_v45  ;;  %v10626_v45 = vld [vmem:[#allocation78_spill] sm:$0xff] }
 0x3f9   : > { %5414 = vmatprep.subr.bf16.mxu1 %v10610_v4  ;;  %v10628_v4 = vld [vmem:[#allocation44_spill] sm:$0xff] }
 0x3fb   : > { %5346 = vmatmul.mubr.bf16.gmra.mrb[204].mxu1 %v6250_v59  ;;  %v6291_v59 = vcombine.high %v4741_v57, %v4745_v3  ;;  %v10641_v3 = vld [vmem:[#allocation88_spill] sm:$0xff] }
 0x3fc   : > { %5415 = vmatpush1.bf16.msra.mxu1 %v10611_v38  ;;  %5355 = vmatprep.mubr.bf16.mxu1 %v6259_v15  ;;  %v10627_v15 = vld [vmem:[#allocation77_spill] sm:$0xff]  ;;  %v4686_v38 = vld [vmem:[%s10348_s3 + $0x8] sm:$0xff] }
 0x3fd   : > { %5416 = vmatprep.subr.bf16.mxu1 %v10612_v19  ;;  %v4690_v19 = vld [vmem:[%s10348_s3 + $0x28] sm:$0xff] }
 0x3fe   : > { %v6236_v23 = vcombine.low %v4686_v38, %v4690_v19 }
 0x400   : > { %5417 = vmatpush1.bf16.msra.mxu1 %v10613_v52  ;;  %v10630_v52 = vld [vmem:[#allocation46_spill] sm:$0xff] }
 0x401   : > { %5418 = vmatprep.subr.bf16.mxu1 %v10614_v40  ;;  %v10632_v40 = vld [vmem:[#allocation80_spill] sm:$0xff] }
 0x403   : > { %5356 = vmatmul.mubr.bf16.gmra.mrb[208].mxu1 %v6258_v14  ;;  %v6237_v14 = vcombine.high %v4686_v38, %v4690_v19  ;;  %v10645_v19 = vld [vmem:[#allocation91_spill] sm:$0xff] }
 0x404   : > { %5419 = vmatpush1.bf16.msra.mxu1 %v10615_v33  ;;  %5365 = vmatprep.mubr.bf16.mxu1 %v6267_v7  ;;  %v10631_v7 = vld [vmem:[#allocation45_spill] sm:$0xff]  ;;  %v4694_v33 = vld [vmem:[%s10348_s3 + $0x48] sm:$0xff] }
 0x405   : > { %5420 = vmatprep.subr.bf16.mxu1 %v10616_v61  ;;  %v4698_v61 = vld [vmem:[%s10348_s3 + $0x68] sm:$0xff] }
 0x406   : > { %v6244_v53 = vcombine.low %v4694_v33, %v4698_v61 }
 0x408   : > { %5421 = vmatpush1.bf16.msra.mxu1 %v10617_v21  ;;  %v10634_v21 = vld [vmem:[#allocation82_spill] sm:$0xff] }
 0x409   : > { %5422 = vmatprep.subr.bf16.mxu1 %v10618_v51  ;;  %v10636_v51 = vld [vmem:[#allocation84_spill] sm:$0xff] }
 0x40b   : > { %5366 = vmatmul.mubr.bf16.gmra.mrb[212].mxu1 %v6266_v27  ;;  %v6245_v27 = vcombine.high %v4694_v33, %v4698_v61  ;;  %v10649_v61 = vld [vmem:[#allocation96_spill] sm:$0xff] }
 0x40c   : > { %5423 = vmatpush1.bf16.msra.mxu1 %v10619_v0  ;;  %5375 = vmatprep.mubr.bf16.mxu1 %v6275_v46  ;;  %v10635_v46 = vld [vmem:[#allocation81_spill] sm:$0xff]  ;;  %v4702_v0 = vld [vmem:[%s10348_s3 + $0x88] sm:$0xff] }
 0x40d   : > { %5424 = vmatprep.subr.bf16.mxu1 %v10620_v10  ;;  %v4706_v10 = vld [vmem:[%s10348_s3 + $0xa8] sm:$0xff] }
 0x40e   : > { %v6252_v57 = vcombine.low %v4702_v0, %v4706_v10 }
 0x410   : > { %5425 = vmatpush1.bf16.msra.mxu1 %v10621_v37  ;;  %v10638_v37 = vld [vmem:[#allocation86_spill] sm:$0xff] }
 0x411   : > { %5426 = vmatprep.subr.bf16.mxu1 %v10622_v17  ;;  %v10640_v17 = vld [vmem:[#allocation89_spill] sm:$0xff] }
 0x413   : > { %5376 = vmatmul.mubr.bf16.gmra.mrb[216].mxu1 %v6274_v24  ;;  %v6253_v24 = vcombine.high %v4702_v0, %v4706_v10  ;;  %v10653_v10 = vld [vmem:[#allocation103_spill] sm:$0xff] }
 0x414   : > { %5427 = vmatpush1.bf16.msra.mxu1 %v10623_v32  ;;  %5385 = vmatprep.mubr.bf16.mxu1 %v6283_v18  ;;  %v10639_v18 = vld [vmem:[#allocation85_spill] sm:$0xff]  ;;  %v4710_v32 = vld [vmem:[%s10348_s3 + $0xc8] sm:$0xff] }
 0x415   : > { %5428 = vmatprep.subr.bf16.mxu1 %v10624_v48  ;;  %v4714_v48 = vld [vmem:[%s10348_s3 + $0xe8] sm:$0xff] }
 0x416   : > { %v6260_v38 = vcombine.low %v4710_v32, %v4714_v48 }
 0x418   : > { %5429 = vmatpush1.bf16.msra.mxu1 %v10625_v50  ;;  %v10642_v50 = vld [vmem:[#allocation90_spill] sm:$0xff] }
 0x419   : > { %5430 = vmatprep.subr.bf16.mxu1 %v10626_v45  ;;  %v10644_v45 = vld [vmem:[#allocation92_spill] sm:$0xff] }
 0x41b   : > { %5386 = vmatmul.mubr.bf16.gmra.mrb[220].mxu1 %v6282_v42  ;;  %v6261_v42 = vcombine.high %v4710_v32, %v4714_v48  ;;  %v10657_v48 = vld [vmem:[#allocation37_spill] sm:$0xff] }
 0x41c   : > { %5431 = vmatpush1.bf16.msra.mxu1 %v10627_v15  ;;  %5395 = vmatprep.mubr.bf16.mxu1 %v6291_v59  ;;  %v10643_v59 = vld [vmem:[#allocation59_spill] sm:$0xff]  ;;  %v4718_v15 = vld [vmem:[%s10348_s3 + $0x108] sm:$0xff] }
 0x41d   : > { %5432 = vmatprep.subr.bf16.mxu1 %v10628_v4  ;;  %v4722_v4 = vld [vmem:[%s10348_s3 + $0x128] sm:$0xff] }
 0x41e   : > { %v6268_v33 = vcombine.low %v4718_v15, %v4722_v4 }
 0x420   : > { %5433 = vmatpush1.bf16.msra.mxu1 %v10629_v1  ;;  %v10646_v1 = vld [vmem:[#allocation94_spill] sm:$0xff] }
 0x421   : > { %5434 = vmatprep.subr.bf16.mxu1 %v10630_v52  ;;  %v10648_v52 = vld [vmem:[#allocation97_spill] sm:$0xff] }
 0x423   : > { %5396 = vmatmul.mubr.bf16.gmra.mrb[224].mxu1 %v6290_v2  ;;  %v6269_v2 = vcombine.high %v4718_v15, %v4722_v4  ;;  %v10661_v4 = vld [vmem:[#allocation107_spill] sm:$0xff] }
 0x424   : > { %5435 = vmatpush1.bf16.msra.mxu1 %v10631_v7  ;;  %5438 = vmatprep.mubr.bf16.mxu1 %v6237_v14  ;;  %v10647_v14 = vld [vmem:[#allocation93_spill] sm:$0xff]  ;;  %v4726_v7 = vld [vmem:[%s10348_s3 + $0x148] sm:$0xff] }
 0x425   : > { %5436 = vmatprep.subr.bf16.mxu1 %v10632_v40  ;;  %v4730_v40 = vld [vmem:[%s10348_s3 + $0x168] sm:$0xff] }
 0x426   : > { %v6276_v0 = vcombine.low %v4726_v7, %v4730_v40 }
 0x428   : > { %5437 = vmatpush1.bf16.msra.mxu1 %v10633_v35  ;;  %v10650_v35 = vld [vmem:[#allocation102_spill] sm:$0xff] }
 0x429   : > { %5519 = vmatprep.subr.bf16.mxu1 %v10634_v21  ;;  %v10652_v21 = vld [vmem:[#allocation104_spill] sm:$0xff] }
 0x42b   : > { %5439 = vmatmul.mubr.bf16.vlgmr.msra.gmra.mrb[196].mxu1 %v6236_v23  ;;  %v6277_v23 = vcombine.high %v4726_v7, %v4730_v40  ;;  %v10665_v40 = vld [vmem:[#allocation111_spill] sm:$0xff] }
 0x42c   : > { %5520 = vmatpush1.bf16.msra.mxu1 %v10635_v46  ;;  %5448 = vmatprep.mubr.bf16.mxu1 %v6245_v27  ;;  %v10651_v27 = vld [vmem:[#allocation101_spill] sm:$0xff]  ;;  %v4734_v46 = vld [vmem:[%s10348_s3 + $0x188] sm:$0xff] }
 0x42d   : > { %5521 = vmatprep.subr.bf16.mxu1 %v10636_v51  ;;  %v4738_v51 = vld [vmem:[%s10348_s3 + $0x1a8] sm:$0xff] }
 0x42e   : > { %v6284_v32 = vcombine.low %v4734_v46, %v4738_v51 }
 0x430   : > { %5522 = vmatpush1.bf16.msra.mxu1 %v10637_v29  ;;  %v10654_v29 = vld [vmem:[#allocation106_spill] sm:$0xff] }
 0x431   : > { %5523 = vmatprep.subr.bf16.mxu1 %v10638_v37  ;;  %v10656_v37 = vld [vmem:[#allocation38_spill] sm:$0xff] }
 0x433   : > { %5449 = vmatmul.mubr.bf16.gmra.mrb[200].mxu1 %v6244_v53  ;;  %v6285_v53 = vcombine.high %v4734_v46, %v4738_v51  ;;  %v4715_v51 = vld [vmem:[%s10348_s3 + $0xf0] sm:$0xff] }
 0x434   : > { %5524 = vmatpush1.bf16.msra.mxu1 %v10639_v18  ;;  %5458 = vmatprep.mubr.bf16.mxu1 %v6253_v24  ;;  %v10655_v24 = vld [vmem:[#allocation105_spill] sm:$0xff]  ;;  %v4742_v18 = vld [vmem:[%s10348_s3 + $0x1c8] sm:$0xff] }
 0x435   : > { %5525 = vmatprep.subr.bf16.mxu1 %v10640_v17  ;;  %v4746_v17 = vld [vmem:[%s10348_s3 + $0x1e8] sm:$0xff] }
 0x436   : > { %v6292_v15 = vcombine.low %v4742_v18, %v4746_v17 }
 0x438   : > { %5526 = vmatpush1.bf16.msra.mxu1 %v10641_v3  ;;  %v10658_v3 = vld [vmem:[#allocation41_spill] sm:$0xff] }
 0x439   : > { %5527 = vmatprep.subr.bf16.mxu1 %v10642_v50  ;;  %v10660_v50 = vld [vmem:[#allocation108_spill] sm:$0xff] }
 0x43b   : > { %5459 = vmatmul.mubr.bf16.gmra.mrb[204].mxu1 %v6252_v57  ;;  %v6293_v57 = vcombine.high %v4742_v18, %v4746_v17  ;;  %v4724_v18 = vld [vmem:[%s10348_s3 + $0x138] sm:$0xff] }
 0x43c   : > { %5528 = vmatpush1.bf16.msra.mxu1 %v10643_v59  ;;  %5468 = vmatprep.mubr.bf16.mxu1 %v6261_v42  ;;  %v10659_v42 = vld [vmem:[#allocation39_spill] sm:$0xff]  ;;  %v4687_v59 = vld [vmem:[%s10348_s3 + $0x10] sm:$0xff] }
 0x43d   : > { %5529 = vmatprep.subr.bf16.mxu1 %v10644_v45  ;;  %v4691_v45 = vld [vmem:[%s10348_s3 + $0x30] sm:$0xff] }
 0x43e   : > { %v6238_v7 = vcombine.low %v4687_v59, %v4691_v45 }
 0x440   : > { %5530 = vmatpush1.bf16.msra.mxu1 %v10645_v19  ;;  %v10662_v19 = vld [vmem:[#allocation110_spill] sm:$0xff] }
 0x441   : > { %5531 = vmatprep.subr.bf16.mxu1 %v10646_v1  ;;  %v10664_v1 = vld [vmem:[#allocation112_spill] sm:$0xff] }
 0x443   : > { %5469 = vmatmul.mubr.bf16.gmra.mrb[208].mxu1 %v6260_v38  ;;  %v6239_v38 = vcombine.high %v4687_v59, %v4691_v45  ;;  %v4740_v59 = vld [vmem:[%s10348_s3 + $0x1b8] sm:$0xff] }
 0x444   : > { %5532 = vmatpush1.bf16.msra.mxu1 %v10647_v14  ;;  %5478 = vmatprep.mubr.bf16.mxu1 %v6269_v2  ;;  %v10663_v2 = vld [vmem:[#allocation109_spill] sm:$0xff] }
 0x445   : > { %5533 = vmatprep.subr.bf16.mxu1 %v10648_v52  ;;  %v4695_v14 = vld [vmem:[%s10348_s3 + $0x50] sm:$0xff] }
 0x446   : > { %v4699_v52 = vld [vmem:[%s10348_s3 + $0x70] sm:$0xff] }
 0x448   : > { %5534 = vmatpush1.bf16.msra.mxu1 %v10649_v61  ;;  %v10666_v61 = vld [vmem:[#allocation116_spill] sm:$0xff] }
 0x449   : > { %5535 = vmatprep.subr.bf16.mxu1 %v10650_v35  ;;  %v4703_v35 = vld [vmem:[%s10348_s3 + $0x90] sm:$0xff] }
 0x44b   : > { %5479 = vmatmul.mubr.bf16.gmra.mrb[212].mxu1 %v6268_v33  ;;  %v6247_v33 = vcombine.high %v4695_v14, %v4699_v52 }
 0x44c   : > { %5536 = vmatpush1.bf16.msra.mxu1 %v10651_v27  ;;  %5488 = vmatprep.mubr.bf16.mxu1 %v6277_v23  ;;  %v10667_v23 = vld [vmem:[#allocation115_spill] sm:$0xff]  ;;  %v4707_v27 = vld [vmem:[%s10348_s3 + $0xb0] sm:$0xff] }
 0x44d   : > { %5537 = vmatprep.subr.bf16.mxu1 %v10652_v21  ;;  %v6246_v21 = vcombine.low %v4695_v14, %v4699_v52  ;;  %v6255_v46 = vcombine.high %v4703_v35, %v4707_v27  ;;  %v10668_v14 = vmov 0   ;;  %v4896_v52 = vpop.permute.xlu0 %4895 }
 0x450   : > { %5538 = vmatpush1.bf16.msra.mxu1 %v10653_v10 }
 0x451   : > { %5539 = vmatprep.subr.bf16.mxu1 %v10654_v29 }
 0x453   : > { %5489 = vmatmul.mubr.bf16.gmra.mrb[216].mxu1 %v6276_v0  ;;  %v6254_v0 = vcombine.low %v4703_v35, %v4707_v27 }
 0x454   : > { %5540 = vmatpush1.bf16.msra.mxu1 %v10655_v24  ;;  %5498 = vmatprep.mubr.bf16.mxu1 %v6285_v53  ;;  %v4712_v53 = vld [vmem:[%s10348_s3 + $0xd8] sm:$0xff] }
 0x455   : > { %5541 = vmatprep.subr.bf16.mxu1 %v10656_v37  ;;  %v4720_v37 = vld [vmem:[%s10348_s3 + $0x118] sm:$0xff] }
 0x458   : > { %5542 = vmatpush1.bf16.msra.mxu1 %v10657_v48  ;;  %v4728_v48 = vld [vmem:[%s10348_s3 + $0x158] sm:$0xff] }
 0x459   : > { %5543 = vmatprep.subr.bf16.mxu1 %v10658_v3  ;;  %v6272_v3 = vcombine.low %v4720_v37, %v4724_v18 }
 0x45b   : > { %5499 = vmatmul.mubr.bf16.gmra.mrb[220].mxu1 %v6284_v32  ;;  %v6273_v32 = vcombine.high %v4720_v37, %v4724_v18 }
 0x45c   : > { %5544 = vmatpush1.bf16.msra.mxu1 %v10659_v42  ;;  %5508 = vmatprep.mubr.bf16.mxu1 %v6293_v57  ;;  %v4732_v57 = vld [vmem:[%s10348_s3 + $0x178] sm:$0xff] }
 0x45d   : > { %5545 = vmatprep.subr.bf16.mxu1 %v10660_v50  ;;  %v6281_v42 = vcombine.high %v4728_v48, %v4732_v57  ;;  %v4736_v50 = vld [vmem:[%s10348_s3 + $0x198] sm:$0xff]  ;;  %v6280_v45 = vcombine.low %v4728_v48, %v4732_v57 }
 0x460   : > { %5546 = vmatpush1.bf16.msra.mxu1 %v10661_v4  ;;  %v4744_v4 = vld [vmem:[%s10348_s3 + $0x1d8] sm:$0xff] }
 0x461   : > { %5547 = vmatprep.subr.bf16.mxu1 %v10662_v19  ;;  %v6288_v19 = vcombine.low %v4736_v50, %v4740_v59 }
 0x463   : > { %5509 = vmatmul.mubr.bf16.gmra.mrb[224].mxu1 %v6292_v15  ;;  %v6289_v15 = vcombine.high %v4736_v50, %v4740_v59 }
 0x464   : > { %5548 = vmatpush1.bf16.msra.mxu1 %v10663_v2  ;;  %5551 = vmatprep.mubr.bf16.mxu1 %v6239_v38  ;;  %v4748_v38 = vld [vmem:[%s10348_s3 + $0x1f8] sm:$0xff] }
 0x465   : > { %5549 = vmatprep.subr.bf16.mxu1 %v10664_v1  ;;  %v6297_v2 = vcombine.high %v4744_v4, %v4748_v38  ;;  %v6296_v1 = vcombine.low %v4744_v4, %v4748_v38 }
 0x468   : > { %5550 = vmatpush1.bf16.msra.mxu1 %v10665_v40 }
 0x469   : > { %5632 = vmatprep.subr.bf16.mxu1 %v10666_v61  ;;  %v4901_v61 = vpop.permute.xlu1 %4900 }
 0x46b   : > { %5552 = vmatmul.mubr.bf16.vlgmr.msra.gmra.mrb[196].mxu1 %v6238_v7 }
 0x46c   : > { %5633 = vmatpush1.bf16.msra.mxu1 %v10667_v23  ;;  %5561 = vmatprep.mubr.bf16.mxu1 %v6247_v33 }
 0x46d   : > { %5634 = vmatprep.subr.bf16.mxu1 %v9844_v47  ;;  %v4711_v47 = vld [vmem:[%s10348_s3 + $0xd0] sm:$0xff] }
 0x470   : > { %5635 = vmatpush1.bf16.msra.mxu1 %v9839_v36  ;;  %v6263_v36 = vcombine.high %v4711_v47, %v4715_v51 }
 0x471   : > { %5636 = vmatprep.subr.bf16.mxu1 %v9859_v55  ;;  %v4723_v55 = vld [vmem:[%s10348_s3 + $0x130] sm:$0xff] }
 0x473   : > { %5562 = vmatmul.mubr.bf16.gmra.mrb[200].mxu1 %v6246_v21 }
 0x474   : > { %5637 = vmatpush1.bf16.msra.mxu1 %v9854_v22  ;;  %5571 = vmatprep.mubr.bf16.mxu1 %v6255_v46  ;;  %v4719_v22 = vld [vmem:[%s10348_s3 + $0x110] sm:$0xff] }
 0x475   : > { %5638 = vmatprep.subr.bf16.mxu1 %v9867_v34  ;;  %v6262_v34 = vcombine.low %v4711_v47, %v4715_v51 }
 0x478   : > { %5639 = vmatpush1.bf16.msra.mxu1 %v9865_v11  ;;  %v6271_v11 = vcombine.high %v4719_v22, %v4723_v55 }
 0x479   : > { %5640 = vmatprep.subr.bf16.mxu1 %v9875_v16  ;;  %v4731_v16 = vld [vmem:[%s10348_s3 + $0x170] sm:$0xff] }
 0x47b   : > { %5572 = vmatmul.mubr.bf16.gmra.mrb[204].mxu1 %v6254_v0 }
 0x47c   : > { %5641 = vmatpush1.bf16.msra.mxu1 %v9873_v41  ;;  %5581 = vmatprep.mubr.bf16.mxu1 %v6263_v36  ;;  %v4727_v41 = vld [vmem:[%s10348_s3 + $0x150] sm:$0xff] }
 0x47d   : > { %5642 = vmatprep.subr.bf16.mxu1 %v9883_v20  ;;  %v6270_v20 = vcombine.low %v4719_v22, %v4723_v55  ;;  %v4906_v55 = vpop.permute.xlu0 %4905 }
 0x480   : > { %5643 = vmatpush1.bf16.msra.mxu1 %v9881_v43  ;;  %v6279_v43 = vcombine.high %v4727_v41, %v4731_v16 }
 0x481   : > { %5644 = vmatprep.subr.bf16.mxu1 %v9891_v49  ;;  %v4739_v49 = vld [vmem:[%s10348_s3 + $0x1b0] sm:$0xff] }
 0x483   : > { %5582 = vmatmul.mubr.bf16.gmra.mrb[208].mxu1 %v6262_v34 }
 0x484   : > { %5645 = vmatpush1.bf16.msra.mxu1 %v9889_v63  ;;  %5591 = vmatprep.mubr.bf16.mxu1 %v6271_v11  ;;  %v4735_v63 = vld [vmem:[%s10348_s3 + $0x190] sm:$0xff] }
 0x485   : > { %5646 = vmatprep.subr.bf16.mxu1 %v9899_v9  ;;  %v6278_v9 = vcombine.low %v4727_v41, %v4731_v16 }
 0x488   : > { %5647 = vmatpush1.bf16.msra.mxu1 %v9897_v12  ;;  %v6287_v12 = vcombine.high %v4735_v63, %v4739_v49 }
 0x489   : > { %5648 = vmatprep.subr.bf16.mxu1 %v9907_v6  ;;  %v4747_v6 = vld [vmem:[%s10348_s3 + $0x1f0] sm:$0xff] }
 0x48b   : > { %5592 = vmatmul.mubr.bf16.gmra.mrb[212].mxu1 %v6270_v20  ;;  %v4911_v20 = vpop.permute.xlu1 %4910 }
 0x48c   : > { %5649 = vmatpush1.bf16.msra.mxu1 %v9905_v56  ;;  %5601 = vmatprep.mubr.bf16.mxu1 %v6279_v43  ;;  %v4743_v56 = vld [vmem:[%s10348_s3 + $0x1d0] sm:$0xff] }
 0x48d   : > { %5650 = vmatprep.subr.bf16.mxu1 %v9915_v39  ;;  %v6286_v39 = vcombine.low %v4735_v63, %v4739_v49 }
 0x490   : > { %5651 = vmatpush1.bf16.msra.mxu1 %v9913_v5  ;;  %v6295_v5 = vcombine.high %v4743_v56, %v4747_v6 }
 0x491   : > { %5652 = vmatprep.subr.bf16.mxu1 %v9923_v44  ;;  %v4692_v44 = vld [vmem:[%s10348_s3 + $0x38] sm:$0xff] }
 0x493   : > { %5602 = vmatmul.mubr.bf16.gmra.mrb[216].mxu1 %v6278_v9 }
 0x494   : > { %5653 = vmatpush1.bf16.msra.mxu1 %v9921_v30  ;;  %5611 = vmatprep.mubr.bf16.mxu1 %v6287_v12  ;;  %v4688_v30 = vld [vmem:[%s10348_s3 + $0x18] sm:$0xff] }
 0x495   : > { %5654 = vmatprep.subr.bf16.mxu1 %v9931_v13  ;;  %v6294_v13 = vcombine.low %v4743_v56, %v4747_v6 }
 0x498   : > { %5655 = vmatpush1.bf16.msra.mxu1 %v9929_v8  ;;  %v6241_v8 = vcombine.high %v4688_v30, %v4692_v44 }
 0x499   : > { %5656 = vmatprep.subr.bf16.mxu1 %v9939_v54  ;;  %v4700_v54 = vld [vmem:[%s10348_s3 + $0x78] sm:$0xff] }
 0x49b   : > { %5612 = vmatmul.mubr.bf16.gmra.mrb[220].mxu1 %v6286_v39 }
 0x49c   : > { %5657 = vmatpush1.bf16.msra.mxu1 %v9937_v31  ;;  %5621 = vmatprep.mubr.bf16.mxu1 %v6295_v5  ;;  %v4696_v31 = vld [vmem:[%s10348_s3 + $0x58] sm:$0xff] }
 0x49d   : > { %5658 = vmatprep.subr.bf16.mxu1 %v9947_v60  ;;  %v6240_v60 = vcombine.low %v4688_v30, %v4692_v44  ;;  %v4916_v44 = vpop.permute.xlu0 %4915 }
 0x4a0   : > { %5659 = vmatpush1.bf16.msra.mxu1 %v9945_v62  ;;  %v6249_v62 = vcombine.high %v4696_v31, %v4700_v54 }
 0x4a1   : > { %5660 = vmatprep.subr.bf16.mxu1 %v9955_v28  ;;  %v4708_v28 = vld [vmem:[%s10348_s3 + $0xb8] sm:$0xff]  ;;  %v4926_v18 = vpop.permute.xlu0 %4925 }
 0x4a3   : > { %5622 = vmatmul.mubr.bf16.gmra.mrb[224].mxu1 %v6294_v13 }
 0x4a4   : > { %5661 = vmatpush1.bf16.msra.mxu1 %v9953_v25  ;;  %5664 = vmatprep.mubr.bf16.mxu1 %v6241_v8  ;;  %v4704_v25 = vld [vmem:[%s10348_s3 + $0x98] sm:$0xff] }
 0x4a5   : > { %5662 = vmatprep.subr.bf16.mxu1 %v9978_v58  ;;  %v6248_v58 = vcombine.low %v4696_v31, %v4700_v54  ;;  %v6257_v10 = vcombine.high %v4704_v25, %v4708_v28  ;;  %v6256_v29 = vcombine.low %v4704_v25, %v4708_v28 }
 0x4a8   : > { %5663 = vmatpush1.bf16.msra.mxu1 %v9975_v26  ;;  %v4716_v26 = vld [vmem:[%s10348_s3 + $0xf8] sm:$0xff] }
 0x4a9   : > { %v6265_v24 = vcombine.high %v4712_v53, %v4716_v26  ;;  %v6264_v17 = vcombine.low %v4712_v53, %v4716_v26 }
 0x4ab   : > { %5665 = vmatmul.mubr.bf16.vlgmr.msra.gmra.mrb[196].mxu1 %v6240_v60  ;;  %v4921_v60 = vpop.permute.xlu1 %4920 }
 0x4ac   : > { %5674 = vmatprep.mubr.bf16.mxu1 %v6249_v62 }
 0x4b3   : > { %5675 = vmatmul.mubr.bf16.gmra.mrb[200].mxu1 %v6248_v58 }
 0x4b4   : > { %5684 = vmatprep.mubr.bf16.mxu1 %v6257_v10 }
 0x4bb   : > { %5685 = vmatmul.mubr.bf16.gmra.mrb[204].mxu1 %v6256_v29 }
 0x4bc   : > { %5694 = vmatprep.mubr.bf16.mxu1 %v6265_v24 }
 0x4c3   : > { %5695 = vmatmul.mubr.bf16.gmra.mrb[208].mxu1 %v6264_v17 }
 0x4c4   : > { %5704 = vmatprep.mubr.bf16.mxu1 %v6273_v32 }
 0x4cb   : > { %5705 = vmatmul.mubr.bf16.gmra.mrb[212].mxu1 %v6272_v3  ;;  %v4931_v3 = vpop.permute.xlu1 %4930 }
 0x4cc   : > { %5714 = vmatprep.mubr.bf16.mxu1 %v6281_v42 }
 0x4d3   : > { %5715 = vmatmul.mubr.bf16.gmra.mrb[216].mxu1 %v6280_v45 }
 0x4d4   : > { %5724 = vmatprep.mubr.bf16.mxu1 %v6289_v15 }
 0x4db   : > { %5725 = vmatmul.mubr.bf16.gmra.mrb[220].mxu1 %v6288_v19 }
 0x4dc   : > { %5734 = vmatprep.mubr.bf16.mxu1 %v6297_v2 }
 0x4e3   : > { %5735 = vmatmul.mubr.bf16.gmra.mrb[224].mxu1 %v6296_v1 }
 0x4e4   : > { %5832 = vmatprep.mubr.bf16.mxu1 %v10668_v14  ;;  %v4936_v14 = vpop.permute.xlu0 %4935 }
 0x57e   : > { %v5666_v7 = vpop.f32.mrb[196].mxu1 }
 0x57f   : > { %v6771_v40 = vadd.f32 %v5666_v7, %v4896_v52  ;;  %v5668_v33 = vpop.f32.mrb[197].mxu1 }
 0x580   : > { %v6772_v23 = vadd.f32 %v5668_v33, %v4896_v52  ;;  %v5670_v35 = vpop.f32.mrb[198].mxu1 }
 0x581   : > { %v6773_v27 = vadd.f32 %v5670_v35, %v4901_v61  ;;  %v5672_v21 = vpop.f32.mrb[199].mxu1  ;;  %v5745_v47 = vmax.f32 %v6771_v40, 0.0 }
 0x582   : > { %v6774_v46 = vadd.f32 %v5672_v21, %v4901_v61  ;;  %v5746_v0 = vmax.f32 %v6772_v23, 0.0  ;;  %v4941_v61 = vpop.permute.xlu1 %4940 }
 0x583   : > { %v5747_v51 = vmax.f32 %v6773_v27, 0.0 }
 0x584   : > { %v5748_v36 = vmax.f32 %v6774_v46, 0.0 }
 0x585   : > { %v5778_v22 = vpack.c.bf16 %v5747_v51, %v5745_v47 }
 0x586   : > { %v5779_v34 = vpack.c.bf16 %v5748_v36, %v5746_v0  ;;  %v5676_v11 = vpop.f32.mrb[200].mxu1 }
 0x587   : > { %v6775_v41 = vadd.f32 %v5676_v11, %v4906_v55  ;;  %v5678_v16 = vpop.f32.mrb[201].mxu1 }
 0x588   : > { %v6776_v43 = vadd.f32 %v5678_v16, %v4906_v55  ;;  %v5680_v63 = vpop.f32.mrb[202].mxu1  ;;  %5800 = vmatprep.subr.bf16.mxu1 %v5779_v34  ;;  %v4946_v55 = vpop.permute.xlu0 %4945 }
 0x589   : > { %v6777_v49 = vadd.f32 %v5680_v63, %v4911_v20  ;;  %v5682_v9 = vpop.f32.mrb[203].mxu1  ;;  %5801 = vmatpush1.bf16.msra.mxu1 %v5778_v22  ;;  %v5749_v56 = vmax.f32 %v6775_v41, 0.0 }
 0x58a   : > { %v6778_v12 = vadd.f32 %v5682_v9, %v4911_v20  ;;  %v5750_v39 = vmax.f32 %v6776_v43, 0.0  ;;  %v4951_v20 = vpop.permute.xlu1 %4950 }
 0x58b   : > { %v5751_v6 = vmax.f32 %v6777_v49, 0.0 }
 0x58c   : > { %v5752_v5 = vmax.f32 %v6778_v12, 0.0 }
 0x58d   : > { %v5780_v30 = vpack.c.bf16 %v5751_v6, %v5749_v56 }
 0x58e   : > { %v5781_v13 = vpack.c.bf16 %v5752_v5, %v5750_v39  ;;  %v5686_v8 = vpop.f32.mrb[204].mxu1 }
 0x58f   : > { %v6779_v31 = vadd.f32 %v5686_v8, %v4916_v44  ;;  %v5688_v54 = vpop.f32.mrb[205].mxu1 }
 0x590   : > { %v6780_v62 = vadd.f32 %v5688_v54, %v4916_v44  ;;  %v5690_v25 = vpop.f32.mrb[206].mxu1  ;;  %5802 = vmatprep.subr.bf16.mxu1 %v5781_v13  ;;  %v4956_v44 = vpop.permute.xlu0 %4955 }
 0x591   : > { %v6781_v28 = vadd.f32 %v5690_v25, %v4921_v60  ;;  %v5692_v58 = vpop.f32.mrb[207].mxu1  ;;  %5803 = vmatpush1.bf16.msra.mxu1 %v5780_v30  ;;  %v5753_v53 = vmax.f32 %v6779_v31, 0.0 }
 0x592   : > { %v6782_v10 = vadd.f32 %v5692_v58, %v4921_v60  ;;  %v5754_v29 = vmax.f32 %v6780_v62, 0.0  ;;  %v4961_v60 = vpop.permute.xlu1 %4960 }
 0x593   : > { %v5755_v26 = vmax.f32 %v6781_v28, 0.0 }
 0x594   : > { %v5756_v24 = vmax.f32 %v6782_v10, 0.0 }
 0x595   : > { %v5782_v37 = vpack.c.bf16 %v5755_v26, %v5753_v53 }
 0x596   : > { %v5783_v17 = vpack.c.bf16 %v5756_v24, %v5754_v29  ;;  %v5696_v32 = vpop.f32.mrb[208].mxu1 }
 0x597   : > { %v6783_v48 = vadd.f32 %v5696_v32, %v4926_v18  ;;  %v5698_v57 = vpop.f32.mrb[209].mxu1 }
 0x598   : > { %v6784_v42 = vadd.f32 %v5698_v57, %v4926_v18  ;;  %v5700_v50 = vpop.f32.mrb[210].mxu1  ;;  %5804 = vmatprep.subr.bf16.mxu1 %v5783_v17  ;;  %v4966_v18 = vpop.permute.xlu0 %4965 }
 0x599   : > { %v6785_v59 = vadd.f32 %v5700_v50, %v4931_v3  ;;  %v5702_v45 = vpop.f32.mrb[211].mxu1  ;;  %5805 = vmatpush1.bf16.msra.mxu1 %v5782_v37  ;;  %v5757_v4 = vmax.f32 %v6783_v48, 0.0 }
 0x59a   : > { %v6786_v15 = vadd.f32 %v5702_v45, %v4931_v3  ;;  %v5758_v19 = vmax.f32 %v6784_v42, 0.0  ;;  %v4971_v3 = vpop.permute.xlu1 %4970 }
 0x59b   : > { %v5759_v38 = vmax.f32 %v6785_v59, 0.0 }
 0x59c   : > { %v5760_v2 = vmax.f32 %v6786_v15, 0.0 }
 0x59d   : > { %v5784_v1 = vpack.c.bf16 %v5759_v38, %v5757_v4 }
 0x59e   : > { %v5785_v52 = vpack.c.bf16 %v5760_v2, %v5758_v19  ;;  %v5706_v7 = vpop.f32.mrb[212].mxu1 }
 0x59f   : > { %v6787_v40 = vadd.f32 %v5706_v7, %v4936_v14  ;;  %v5708_v33 = vpop.f32.mrb[213].mxu1  ;;  %v5798_v7 = vpop.permute.xlu0 %5797 }
 0x5a0   : > { %v6788_v23 = vadd.f32 %v5708_v33, %v4936_v14  ;;  %v5710_v35 = vpop.f32.mrb[214].mxu1  ;;  %5806 = vmatprep.subr.bf16.mxu1 %v5785_v52  ;;  %v5777_v52 = vld [vmem:[%s10350_s5] sm:$0xf] }
 0x5a1   : > { %v6789_v27 = vadd.f32 %v5710_v35, %v4941_v61  ;;  %v5712_v21 = vpop.f32.mrb[215].mxu1  ;;  %5807 = vmatpush1.bf16.msra.mxu1 %v5784_v1  ;;  %v5761_v47 = vmax.f32 %v6787_v40, 0.0 }
 0x5a2   : > { %v6790_v46 = vadd.f32 %v5712_v21, %v4941_v61  ;;  %v5762_v0 = vmax.f32 %v6788_v23, 0.0 }
 0x5a3   : > { %v5763_v51 = vmax.f32 %v6789_v27, 0.0 }
 0x5a4   : > { %v5764_v36 = vmax.f32 %v6790_v46, 0.0 }
 0x5a5   : > { %v5786_v22 = vpack.c.bf16 %v5763_v51, %v5761_v47 }
 0x5a6   : > { %v5787_v34 = vpack.c.bf16 %v5764_v36, %v5762_v0  ;;  %v5716_v11 = vpop.f32.mrb[216].mxu1 }
 0x5a7   : > { %v6791_v41 = vadd.f32 %v5716_v11, %v4946_v55  ;;  %v5718_v16 = vpop.f32.mrb[217].mxu1 }
 0x5a8   : > { %v6792_v43 = vadd.f32 %v5718_v16, %v4946_v55  ;;  %v5720_v63 = vpop.f32.mrb[218].mxu1  ;;  %5808 = vmatprep.subr.bf16.mxu1 %v5787_v34 }
 0x5a9   : > { %v6793_v49 = vadd.f32 %v5720_v63, %v4951_v20  ;;  %v5722_v9 = vpop.f32.mrb[219].mxu1  ;;  %5809 = vmatpush1.bf16.msra.mxu1 %v5786_v22  ;;  %v5765_v56 = vmax.f32 %v6791_v41, 0.0 }
 0x5aa   : > { %v6794_v12 = vadd.f32 %v5722_v9, %v4951_v20  ;;  %v5766_v39 = vmax.f32 %v6792_v43, 0.0 }
 0x5ab   : > { %v5767_v6 = vmax.f32 %v6793_v49, 0.0 }
 0x5ac   : > { %v5768_v5 = vmax.f32 %v6794_v12, 0.0 }
 0x5ad   : > { %v5788_v30 = vpack.c.bf16 %v5767_v6, %v5765_v56 }
 0x5ae   : > { %v5789_v13 = vpack.c.bf16 %v5768_v5, %v5766_v39  ;;  %v5726_v8 = vpop.f32.mrb[220].mxu1 }
 0x5af   : > { %v6795_v31 = vadd.f32 %v5726_v8, %v4956_v44  ;;  %v5728_v54 = vpop.f32.mrb[221].mxu1 }
 0x5b0   : > { %v6796_v62 = vadd.f32 %v5728_v54, %v4956_v44  ;;  %v5730_v25 = vpop.f32.mrb[222].mxu1  ;;  %5810 = vmatprep.subr.bf16.mxu1 %v5789_v13 }
 0x5b1   : > { %v6797_v28 = vadd.f32 %v5730_v25, %v4961_v60  ;;  %v5732_v58 = vpop.f32.mrb[223].mxu1  ;;  %5811 = vmatpush1.bf16.msra.mxu1 %v5788_v30  ;;  %v5769_v53 = vmax.f32 %v6795_v31, 0.0 }
 0x5b2   : > { %v6798_v10 = vadd.f32 %v5732_v58, %v4961_v60  ;;  %v5770_v29 = vmax.f32 %v6796_v62, 0.0 }
 0x5b3   : > { %v5771_v26 = vmax.f32 %v6797_v28, 0.0 }
 0x5b4   : > { %v5772_v24 = vmax.f32 %v6798_v10, 0.0 }
 0x5b5   : > { %v5790_v37 = vpack.c.bf16 %v5771_v26, %v5769_v53 }
 0x5b6   : > { %v5791_v17 = vpack.c.bf16 %v5772_v24, %v5770_v29  ;;  %v5736_v32 = vpop.f32.mrb[224].mxu1 }
 0x5b7   : > { %v6799_v48 = vadd.f32 %v5736_v32, %v4966_v18  ;;  %v5738_v57 = vpop.f32.mrb[225].mxu1 }
 0x5b8   : > { %v6800_v42 = vadd.f32 %v5738_v57, %v4966_v18  ;;  %v5740_v50 = vpop.f32.mrb[226].mxu1  ;;  %5812 = vmatprep.subr.bf16.mxu1 %v5791_v17 }
 0x5b9   : > { %v6801_v59 = vadd.f32 %v5740_v50, %v4971_v3  ;;  %v5742_v45 = vpop.f32.mrb[227].mxu1  ;;  %5813 = vmatpush1.bf16.msra.mxu1 %v5790_v37  ;;  %v5773_v4 = vmax.f32 %v6799_v48, 0.0 }
 0x5ba   : > { %v6802_v15 = vadd.f32 %v5742_v45, %v4971_v3  ;;  %v5774_v19 = vmax.f32 %v6800_v42, 0.0 }
 0x5bb   : > { %v5775_v38 = vmax.f32 %v6801_v59, 0.0 }
 0x5bc   : > { %v5776_v2 = vmax.f32 %v6802_v15, 0.0 }
 0x5bd   : > { %v5792_v1 = vpack.c.bf16 %v5775_v38, %v5773_v4 }
 0x5be   : > { %v5793_v14 = vpack.c.bf16 %v5776_v2, %v5774_v19 }
 0x5c0   : > { %5814 = vmatprep.subr.bf16.mxu1 %v5793_v14 }
 0x5c1   : > { %5815 = vmatpush1.bf16.msra.mxu1 %v5792_v1 }
 0x5c4   : > { %5833 = vmatmul.mubr.bf16.vlgmr.msra.gmra.mrb[228].mxu1 %v5777_v52 }
 0x697   : > { %v5834_v40 = vpop.f32.mrb[228].mxu1 }
 0x698   : > { %v5835_v33 = vadd.f32 %v5834_v40, %v5798_v7  ;;  %v5836_v61 = vpop.f32.mrb[229].mxu1 }
 0x699   : > { %v5837_v23 = vadd.f32 %v5836_v61, %v5798_v7  ;;  %v5838_v35 = vpop.f32.mrb[230].mxu1 }
 0x69a   : > { %5841 = vst [vmem:[%s497_s19] sm:$0xff] %v5835_v33  ;;  %v5839_v27 = vpop.f32.mrb[231].mxu1 }
 0x69b   : > { %5842 = vst [vmem:[%s497_s19 + $0x8] sm:$0xff] %v5837_v23 }
 0x69c PF: > { %p14_p9 = scmp.ge.s32.totalorder %s7454_s28, 4   ;;  %s10669_s24 = smov %s7390_s25 }
 0x69d   : > { %s10670_s25 = smov %s7463_s8  ;;  %s10671_s26 = smov %s7454_s28 }
 0x69e   :  { %16 = sbr.rel (!%p14_p9) target bundleno = 2 (0x2), region = 106 }

</bundles_post_ra>
